<compile_context>
chip_gen: v7x
topology: tpu7x:2x2x1
jax: 0.10.0
libtpu: 0.0.40
codegen_flags: <defaults>
</compile_context>

<pallas_src>
import jax
import jax.numpy as jnp
from jax.experimental import pallas as pl
from jax.experimental.pallas import tpu as pltpu

# --- hyperparameters (from the PyTorch module) ---
N_EMBD = 64
BLOCK_SIZE = 32
N_HEAD = 4
N_LAYER = 4
HEAD_SIZE = N_EMBD // N_HEAD
VOCAB_SIZE = 65          # deterministic synthetic vocabulary size
VOCAB_PAD = 128          # lane-dense padded vocab for the LM head / embedding table
LN_EPS = 1e-5            # nn.LayerNorm default


# ----------------------------- shared math helpers -----------------------------

def _layernorm(x, w, b):
    mu = jnp.mean(x, axis=-1, keepdims=True)
    xc = x - mu
    var = jnp.mean(xc * xc, axis=-1, keepdims=True)
    return xc * jax.lax.rsqrt(var + LN_EPS) * w + b


def _softmax_rows(s):
    m = jnp.max(s, axis=-1, keepdims=True)
    e = jnp.exp(s - m)
    return e / jnp.sum(e, axis=-1, keepdims=True)


def _bf16_dot(a_f32, w_bf16):
    # bf16 MXU operands, f32 accumulation
    return jnp.dot(a_f32.astype(jnp.bfloat16), w_bf16,
                   preferred_element_type=jnp.float32)


# ------------------------------- fused model kernel ----------------------------

def model_kernel(idx_ref, pos_ref, tok_ref,
                 ln1w_ref, ln1b_ref, wqkv_ref, wp_ref, bp_ref,
                 ln2w_ref, ln2b_ref, w1_ref, b1_ref, w2_ref, b2_ref,
                 lmw_ref, lmb_ref, o_ref):
    """Forward for a block of BB batch elements: idx (BB,T,1) -> logits (BB,T,VP)."""
    BB, T, _ = idx_ref.shape
    C = N_EMBD
    M = BB * T                                        # flattened row count

    # --- token embedding gather as a lane-dense bf16 one-hot matmul + pos add ---
    ids = idx_ref[...].reshape(M, 1)                                    # (M, 1) i32
    onehot = (ids == jax.lax.broadcasted_iota(jnp.int32, (M, VOCAB_PAD), 1)
              ).astype(jnp.bfloat16)                                    # (M, VP) bf16
    x = jnp.dot(onehot, tok_ref[...], preferred_element_type=jnp.float32) \
        + pos_ref[...]                                                  # (M, C) f32

    # --- causal mask & scale hoisted once, shared across all layers and heads ---
    row = jax.lax.broadcasted_iota(jnp.int32, (T, T), 0)
    col = jax.lax.broadcasted_iota(jnp.int32, (T, T), 1)
    causal = (col <= row)[None]                       # (1, T, T), broadcast over BB
    scale = N_EMBD ** (-0.5)                          # PyTorch Head scales by C

    # --- 4 transformer blocks, statically unrolled inside the kernel ---
    for l in range(N_LAYER):
        # multi-head self-attention on ln1(x); all rows flattened for the matmuls
        h = _layernorm(x, ln1w_ref[l], ln1b_ref[l])                     # (M, C)
        qkv = _bf16_dot(h, wqkv_ref[l])                                 # (M, 3C)
        qkv_b = qkv.reshape(BB, T, 3 * C)             # leading-dim split only
        heads = []
        for hh in range(N_HEAD):
            q = qkv_b[:, :, hh * HEAD_SIZE:(hh + 1) * HEAD_SIZE]
            k = qkv_b[:, :, C + hh * HEAD_SIZE:C + (hh + 1) * HEAD_SIZE]
            v = qkv_b[:, :, 2 * C + hh * HEAD_SIZE:2 * C + (hh + 1) * HEAD_SIZE]
            s = jnp.einsum('bqd,bkd->bqk', q, k,
                           preferred_element_type=jnp.float32) * scale  # (BB,T,T)
            s = jnp.where(causal, s, -jnp.inf)
            p = _softmax_rows(s)                                        # f32 softmax
            heads.append(jnp.einsum('bqk,bkd->bqd', p, v,
                                    preferred_element_type=jnp.float32))
        att = jnp.concatenate(heads, axis=-1).reshape(M, C)             # (M, C)
        x = x + _bf16_dot(att, wp_ref[l]) + bp_ref[l]                   # output proj

        # feed-forward on ln2(x)
        h2 = _layernorm(x, ln2w_ref[l], ln2b_ref[l])
        ff = jnp.maximum(_bf16_dot(h2, w1_ref[l]) + b1_ref[l], 0.0)     # (M, 4C)
        x = x + _bf16_dot(ff, w2_ref[l]) + b2_ref[l]                    # (M, C)

    # NOTE: self.ln_f exists in the PyTorch __init__ but is never applied in forward.
    logits = _bf16_dot(x, lmw_ref[...]) + lmb_ref[...]                  # (M, VP)
    o_ref[...] = logits.reshape(BB, T, VOCAB_PAD)


# ------------------------------- pallas wrapper --------------------------------

def _full_spec(shape):
    n = len(shape)
    return pl.BlockSpec(shape, lambda b, _n=n: (0,) * _n)


def forward(packed, idx):
    """idx: (B, T) int token ids, T <= BLOCK_SIZE. Returns logits (B, T, VOCAB_SIZE)."""
    B, T = idx.shape
    assert T <= BLOCK_SIZE
    T_pad = max(8, ((T + 7) // 8) * 8)                # sublane-aligned sequence

    # per-grid-step batch block: target ~256 MXU rows, but keep >= 2 balanced grid
    # steps whenever B >= 2 so the "parallel" axis feeds both v7x TensorCores.
    BB = max(1, min(B, 256 // T_pad))
    if B >= 2:
        BB = min(BB, -(-B // 2))
    steps = -(-B // BB)
    B_pad = steps * BB
    M = BB * T_pad

    idx_p = jnp.zeros((B_pad, T_pad), jnp.int32).at[:B, :T].set(idx.astype(jnp.int32))
    idx_p = idx_p[..., None]                          # (B_pad, T_pad, 1)
    pos_flat = jnp.tile(packed["pos"][:T_pad], (BB, 1))   # (M, C) f32

    kp = packed
    inputs = [
        idx_p, pos_flat, kp["tok"],
        kp["ln1w"], kp["ln1b"], kp["wqkv"], kp["wp"], kp["bp"],
        kp["ln2w"], kp["ln2b"], kp["w1"], kp["b1"], kp["w2"], kp["b2"],
        kp["lm_w"], kp["lm_b"],
    ]
    in_specs = [pl.BlockSpec((BB, T_pad, 1), lambda b: (b, 0, 0))]
    in_specs += [_full_spec(a.shape) for a in inputs[1:]]

    logits_pad = pl.pallas_call(
        model_kernel,
        out_shape=jax.ShapeDtypeStruct((B_pad, T_pad, VOCAB_PAD), jnp.float32),
        grid=(steps,),
        in_specs=in_specs,
        out_specs=pl.BlockSpec((BB, T_pad, VOCAB_PAD), lambda b: (b, 0, 0)),
        compiler_params=pltpu.CompilerParams(dimension_semantics=("parallel",)),
    )(*inputs)
    return logits_pad[:B, :T, :VOCAB_SIZE]            # drop pad rows / pad columns


# --------------------------- params: init / packing ----------------------------

def init_params(key):
    """Natural (PyTorch-equivalent, f32, pre-transposed so that y = x @ W) params."""
    keys = iter(jax.random.split(key, 48))

    def nrm(shape, std=0.02):
        return jax.random.normal(next(keys), shape, jnp.float32) * std

    params = {
        "tok_emb": nrm((VOCAB_SIZE, N_EMBD)),
        "pos_emb": nrm((BLOCK_SIZE, N_EMBD)),
        "lm_w": nrm((N_EMBD, VOCAB_SIZE)),            # x @ lm_w
        "lm_b": nrm((VOCAB_SIZE,)),
        "blocks": [],
    }
    for _ in range(N_LAYER):
        params["blocks"].append({
            "ln1w": jnp.ones((N_EMBD,), jnp.float32),
            "ln1b": jnp.zeros((N_EMBD,), jnp.float32),
            "wq": nrm((N_HEAD, N_EMBD, HEAD_SIZE)),   # per-head, pre-transposed
            "wk": nrm((N_HEAD, N_EMBD, HEAD_SIZE)),
            "wv": nrm((N_HEAD, N_EMBD, HEAD_SIZE)),
            "wp": nrm((N_EMBD, N_EMBD)),
            "bp": nrm((N_EMBD,)),
            "ln2w": jnp.ones((N_EMBD,), jnp.float32),
            "ln2b": jnp.zeros((N_EMBD,), jnp.float32),
            "w1": nrm((N_EMBD, 4 * N_EMBD)),
            "b1": nrm((4 * N_EMBD,)),
            "w2": nrm((4 * N_EMBD, N_EMBD)),
            "b2": nrm((N_EMBD,)),
        })
    return params


def pack_params(p):
    """Kernel layout: layer-stacked weights, fused QKV, bf16 MXU weights, padded vocab."""
    blocks = p["blocks"]

    def stack_vec(name):
        return jnp.stack([blk[name][None, :] for blk in blocks], 0)    # (L, 1, dim) f32

    wqkv = jnp.stack([
        jnp.concatenate(
            [jnp.concatenate([blk[w][h] for h in range(N_HEAD)], axis=1)
             for w in ("wq", "wk", "wv")], axis=1)
        for blk in blocks], 0).astype(jnp.bfloat16)                     # (L, C, 3C)
    wp = jnp.stack([blk["wp"] for blk in blocks], 0).astype(jnp.bfloat16)
    w1 = jnp.stack([blk["w1"] for blk in blocks], 0).astype(jnp.bfloat16)
    w2 = jnp.stack([blk["w2"] for blk in blocks], 0).astype(jnp.bfloat16)

    tok_pad = (jnp.zeros((VOCAB_PAD, N_EMBD), jnp.bfloat16)
               .at[:VOCAB_SIZE].set(p["tok_emb"].astype(jnp.bfloat16)))
    lm_w_pad = (jnp.zeros((N_EMBD, VOCAB_PAD), jnp.float32)
                .at[:, :VOCAB_SIZE].set(p["lm_w"]).astype(jnp.bfloat16))
    lm_b_pad = jnp.zeros((1, VOCAB_PAD), jnp.float32).at[0, :VOCAB_SIZE].set(p["lm_b"])

    return dict(
        tok=tok_pad, pos=p["pos_emb"],
        ln1w=stack_vec("ln1w"), ln1b=stack_vec("ln1b"),
        wqkv=wqkv, wp=wp, bp=stack_vec("bp"),
        ln2w=stack_vec("ln2w"), ln2b=stack_vec("ln2b"),
        w1=w1, b1=stack_vec("b1"), w2=w2, b2=stack_vec("b2"),
        lm_w=lm_w_pad, lm_b=lm_b_pad,
    )


# ------------------------------ pure-JAX reference ------------------------------

def forward_ref(params, idx, mxu_bf16=False):
    """Reference forward. mxu_bf16=True mirrors the kernel's bf16 MXU operand casts."""
    B, T = idx.shape
    HI = jax.lax.Precision.HIGHEST

    def mm(a, w):
        if mxu_bf16:
            a = a.astype(jnp.bfloat16)
            w = w.astype(jnp.bfloat16)
        return jnp.einsum("...ij,jk->...ik", a, w,
                          preferred_element_type=jnp.float32, precision=HI)

    tok = params["tok_emb"]
    if mxu_bf16:
        tok = tok.astype(jnp.bfloat16).astype(jnp.float32)   # kernel's bf16 table
    x = tok[idx] + params["pos_emb"][:T][None]
    causal = jnp.tril(jnp.ones((T, T), bool))
    for p in params["blocks"]:
        h = _layernorm(x, p["ln1w"], p["ln1b"])
        outs = []
        for hh in range(N_HEAD):
            q = mm(h, p["wq"][hh])
            k = mm(h, p["wk"][hh])
            v = mm(h, p["wv"][hh])
            wei = jnp.einsum("btd,bsd->bts", q, k, precision=HI,
                             preferred_element_type=jnp.float32) * N_EMBD ** (-0.5)
            wei = jnp.where(causal, wei, -jnp.inf)
            wei = jax.nn.softmax(wei, axis=-1)
            outs.append(jnp.einsum("bts,bsd->btd", wei, v, precision=HI,
                                   preferred_element_type=jnp.float32))
        sa = mm(jnp.concatenate(outs, -1), p["wp"]) + p["bp"]
        x = x + sa
        h2 = _layernorm(x, p["ln2w"], p["ln2b"])
        ff = jnp.maximum(mm(h2, p["w1"]) + p["b1"], 0.0)
        ff = mm(ff, p["w2"]) + p["b2"]
        x = x + ff
    return mm(x, params["lm_w"]) + params["lm_b"]


# ----------------------------------- main ---------------------------------------

if __name__ == "__main__":
    key = jax.random.PRNGKey(0)
    pkey, dkey = jax.random.split(key)
    params = init_params(pkey)
    packed = pack_params(params)

    B, T = 2, 8                                   # T <= block_size (32)
    idx = jax.random.randint(dkey, (B, T), 0, VOCAB_SIZE, dtype=jnp.int32)

    logits = jax.block_until_ready(forward(packed, idx))
    assert logits.shape == (B, T, VOCAB_SIZE), logits.shape

    # Tight check against a reference that mirrors the kernel's bf16 MXU operand casts.
    ref_bf16 = forward_ref(params, idx, mxu_bf16=True)
    err_b = float(jnp.max(jnp.abs(logits - ref_bf16)))
    assert jnp.allclose(logits, ref_bf16, atol=5e-3, rtol=5e-3), err_b

    # Loose check against the pure-f32 reference (difference = bf16 rounding only).
    ref_f32 = forward_ref(params, idx, mxu_bf16=False)
    err_f = float(jnp.max(jnp.abs(logits - ref_f32)))
    assert jnp.allclose(logits, ref_f32, atol=5e-2, rtol=5e-2), err_f

    print("KERNEL_OK")
</pallas_src>

<mosaic_0001>
module attributes {stable_mosaic.version = 11 : i64} {
  func.func @model_kernel(%arg0: i32, %arg1: memref<1x8x1xi32, #tpu.memory_space<vmem>>, %arg2: memref<8x64xf32, #tpu.memory_space<vmem>>, %arg3: memref<128x64xbf16, #tpu.memory_space<vmem>>, %arg4: memref<4x1x64xf32, #tpu.memory_space<vmem>>, %arg5: memref<4x1x64xf32, #tpu.memory_space<vmem>>, %arg6: memref<4x64x192xbf16, #tpu.memory_space<vmem>>, %arg7: memref<4x64x64xbf16, #tpu.memory_space<vmem>>, %arg8: memref<4x1x64xf32, #tpu.memory_space<vmem>>, %arg9: memref<4x1x64xf32, #tpu.memory_space<vmem>>, %arg10: memref<4x1x64xf32, #tpu.memory_space<vmem>>, %arg11: memref<4x64x256xbf16, #tpu.memory_space<vmem>>, %arg12: memref<4x1x256xf32, #tpu.memory_space<vmem>>, %arg13: memref<4x256x64xbf16, #tpu.memory_space<vmem>>, %arg14: memref<4x1x64xf32, #tpu.memory_space<vmem>>, %arg15: memref<64x128xbf16, #tpu.memory_space<vmem>>, %arg16: memref<1x128xf32, #tpu.memory_space<vmem>>, %arg17: memref<1x8x128xf32, #tpu.memory_space<vmem>>) attributes {dimension_semantics = [#tpu.dimension_semantics<parallel>], iteration_bounds = array<i64: 2>, scalar_prefetch = 0 : i64, scratch_operands = 0 : i64, tpu.core_type = #tpu.core_type<tc>, window_params = [{transform_indices = @transform_0, window_bounds = array<i64: 1, 8, 1>}, {pipeline_mode = #tpu.pipeline_mode<synchronous>, transform_indices = @transform_1, window_bounds = array<i64: 8, 64>}, {pipeline_mode = #tpu.pipeline_mode<synchronous>, transform_indices = @transform_2, window_bounds = array<i64: 128, 64>}, {pipeline_mode = #tpu.pipeline_mode<synchronous>, transform_indices = @transform_3, window_bounds = array<i64: 4, 1, 64>}, {pipeline_mode = #tpu.pipeline_mode<synchronous>, transform_indices = @transform_4, window_bounds = array<i64: 4, 1, 64>}, {pipeline_mode = #tpu.pipeline_mode<synchronous>, transform_indices = @transform_5, window_bounds = array<i64: 4, 64, 192>}, {pipeline_mode = #tpu.pipeline_mode<synchronous>, transform_indices = @transform_6, window_bounds = array<i64: 4, 64, 64>}, {pipeline_mode = #tpu.pipeline_mode<synchronous>, transform_indices = @transform_7, window_bounds = array<i64: 4, 1, 64>}, {pipeline_mode = #tpu.pipeline_mode<synchronous>, transform_indices = @transform_8, window_bounds = array<i64: 4, 1, 64>}, {pipeline_mode = #tpu.pipeline_mode<synchronous>, transform_indices = @transform_9, window_bounds = array<i64: 4, 1, 64>}, {pipeline_mode = #tpu.pipeline_mode<synchronous>, transform_indices = @transform_10, window_bounds = array<i64: 4, 64, 256>}, {pipeline_mode = #tpu.pipeline_mode<synchronous>, transform_indices = @transform_11, window_bounds = array<i64: 4, 1, 256>}, {pipeline_mode = #tpu.pipeline_mode<synchronous>, transform_indices = @transform_12, window_bounds = array<i64: 4, 256, 64>}, {pipeline_mode = #tpu.pipeline_mode<synchronous>, transform_indices = @transform_13, window_bounds = array<i64: 4, 1, 64>}, {pipeline_mode = #tpu.pipeline_mode<synchronous>, transform_indices = @transform_14, window_bounds = array<i64: 64, 128>}, {pipeline_mode = #tpu.pipeline_mode<synchronous>, transform_indices = @transform_15, window_bounds = array<i64: 1, 128>}, {transform_indices = @transform_16, window_bounds = array<i64: 1, 8, 128>}]} {
    %c0 = arith.constant 0 : index
    %c0_0 = arith.constant 0 : index
    %c0_1 = arith.constant 0 : index
    %0 = vector.load %arg1[%c0, %c0_0, %c0_1] : memref<1x8x1xi32, #tpu.memory_space<vmem>>, vector<1x8x1xi32>
    %1 = vector.shape_cast %0 : vector<1x8x1xi32> to vector<8x1xi32>
    %2 = tpu.iota {dimensions = array<i32: 1>} : vector<8x128xi32>
    %3 = vector.broadcast %1 : vector<8x1xi32> to vector<8x128xi32>
    %4 = arith.cmpi eq, %3, %2 : vector<8x128xi32>
    %5 = arith.extui %4 : vector<8x128xi1> to vector<8x128xi32>
    %6 = arith.sitofp %5 : vector<8x128xi32> to vector<8x128xf32>
    %7 = arith.truncf %6 : vector<8x128xf32> to vector<8x128xbf16>
    %c0_2 = arith.constant 0 : index
    %c0_3 = arith.constant 0 : index
    %8 = vector.load %arg3[%c0_2, %c0_3] : memref<128x64xbf16, #tpu.memory_space<vmem>>, vector<128x64xbf16>
    %cst = arith.constant dense<0.000000e+00> : vector<8x64xf32>
    %9 = tpu.matmul %7, %8, %cst {dimension_numbers = #tpu.dot_dimension_numbers<[1], [0], [0], [1], [0, 0, 1, 1], [], []>} : vector<8x128xbf16>, vector<128x64xbf16>, vector<8x64xf32> -> vector<8x64xf32>
    %c0_4 = arith.constant 0 : index
    %c0_5 = arith.constant 0 : index
    %10 = vector.load %arg2[%c0_4, %c0_5] : memref<8x64xf32, #tpu.memory_space<vmem>>, vector<8x64xf32>
    %11 = arith.addf %9, %10 : vector<8x64xf32>
    %12 = tpu.iota {dimensions = array<i32: 0>} : vector<8x8xi32>
    %13 = tpu.iota {dimensions = array<i32: 1>} : vector<8x8xi32>
    %14 = arith.cmpi sle, %13, %12 : vector<8x8xi32>
    %15 = vector.shape_cast %14 : vector<8x8xi1> to vector<1x8x8xi1>
    %c0_6 = arith.constant 0 : index
    %c0_7 = arith.constant 0 : index
    %c0_8 = arith.constant 0 : index
    %16 = vector.load %arg4[%c0_6, %c0_7, %c0_8] : memref<4x1x64xf32, #tpu.memory_space<vmem>>, vector<1x1x64xf32>
    %17 = vector.shape_cast %16 : vector<1x1x64xf32> to vector<1x64xf32>
    %c0_9 = arith.constant 0 : index
    %c0_10 = arith.constant 0 : index
    %c0_11 = arith.constant 0 : index
    %18 = vector.load %arg5[%c0_9, %c0_10, %c0_11] : memref<4x1x64xf32, #tpu.memory_space<vmem>>, vector<1x1x64xf32>
    %19 = vector.shape_cast %18 : vector<1x1x64xf32> to vector<1x64xf32>
    %cst_12 = arith.constant dense<0.000000e+00> : vector<8xf32>
    %20 = vector.multi_reduction <add>, %11, %cst_12 [1] : vector<8x64xf32> to vector<8xf32>
    %21 = vector.shape_cast %20 : vector<8xf32> to vector<8x1xf32>
    %cst_13 = arith.constant 6.400000e+01 : f32
    %22 = vector.broadcast %cst_13 : f32 to vector<8x1xf32>
    %23 = arith.divf %21, %22 : vector<8x1xf32>
    %24 = vector.broadcast %23 : vector<8x1xf32> to vector<8x64xf32>
    %25 = arith.subf %11, %24 : vector<8x64xf32>
    %26 = arith.mulf %25, %25 : vector<8x64xf32>
    %cst_14 = arith.constant dense<0.000000e+00> : vector<8xf32>
    %27 = vector.multi_reduction <add>, %26, %cst_14 [1] : vector<8x64xf32> to vector<8xf32>
    %28 = vector.shape_cast %27 : vector<8xf32> to vector<8x1xf32>
    %cst_15 = arith.constant 6.400000e+01 : f32
    %29 = vector.broadcast %cst_15 : f32 to vector<8x1xf32>
    %30 = arith.divf %28, %29 : vector<8x1xf32>
    %cst_16 = arith.constant 9.99999974E-6 : f32
    %31 = vector.broadcast %cst_16 : f32 to vector<8x1xf32>
    %32 = arith.addf %30, %31 : vector<8x1xf32>
    %33 = math.rsqrt %32 : vector<8x1xf32>
    %34 = vector.broadcast %33 : vector<8x1xf32> to vector<8x64xf32>
    %35 = arith.mulf %25, %34 : vector<8x64xf32>
    %36 = vector.broadcast %17 : vector<1x64xf32> to vector<8x64xf32>
    %37 = arith.mulf %35, %36 : vector<8x64xf32>
    %38 = vector.broadcast %19 : vector<1x64xf32> to vector<8x64xf32>
    %39 = arith.addf %37, %38 : vector<8x64xf32>
    %c0_17 = arith.constant 0 : index
    %c0_18 = arith.constant 0 : index
    %c0_19 = arith.constant 0 : index
    %40 = vector.load %arg6[%c0_17, %c0_18, %c0_19] : memref<4x64x192xbf16, #tpu.memory_space<vmem>>, vector<1x64x192xbf16>
    %41 = vector.shape_cast %40 : vector<1x64x192xbf16> to vector<64x192xbf16>
    %42 = arith.truncf %39 : vector<8x64xf32> to vector<8x64xbf16>
    %cst_20 = arith.constant dense<0.000000e+00> : vector<8x192xf32>
    %43 = tpu.matmul %42, %41, %cst_20 {dimension_numbers = #tpu.dot_dimension_numbers<[1], [0], [0], [1], [0, 0, 1, 1], [], []>} : vector<8x64xbf16>, vector<64x192xbf16>, vector<8x192xf32> -> vector<8x192xf32>
    %44 = vector.shape_cast %43 : vector<8x192xf32> to vector<1x8x192xf32>
    %45 = vector.extract_strided_slice %44 {offsets = [0, 0, 0], sizes = [1, 8, 16], strides = [1, 1, 1]} : vector<1x8x192xf32> to vector<1x8x16xf32>
    %46 = vector.extract_strided_slice %44 {offsets = [0, 0, 64], sizes = [1, 8, 16], strides = [1, 1, 1]} : vector<1x8x192xf32> to vector<1x8x16xf32>
    %47 = vector.extract_strided_slice %44 {offsets = [0, 0, 128], sizes = [1, 8, 16], strides = [1, 1, 1]} : vector<1x8x192xf32> to vector<1x8x16xf32>
    "tpu.trace_start"() <{level = 10 : i32, message = "bqd,bkd->bqk"}> : () -> ()
    %cst_21 = arith.constant dense<0.000000e+00> : vector<1x8x8xf32>
    %48 = tpu.matmul %45, %46, %cst_21 {dimension_numbers = #tpu.dot_dimension_numbers<[2], [2], [1], [1], [0, 0, 0, 1, 1, 1], [0], [0]>} : vector<1x8x16xf32>, vector<1x8x16xf32>, vector<1x8x8xf32> -> vector<1x8x8xf32>
    "tpu.trace_stop"() : () -> ()
    %cst_22 = arith.constant 1.250000e-01 : f32
    %49 = vector.broadcast %cst_22 : f32 to vector<1x8x8xf32>
    %50 = arith.mulf %48, %49 : vector<1x8x8xf32>
    %cst_23 = arith.constant 0xFF800000 : f32
    %51 = vector.broadcast %cst_23 : f32 to vector<1x8x8xf32>
    %52 = arith.select %15, %50, %51 : vector<1x8x8xi1>, vector<1x8x8xf32>
    %cst_24 = arith.constant dense<0xFF800000> : vector<1x8xf32>
    %53 = vector.multi_reduction <maximumf>, %52, %cst_24 [2] : vector<1x8x8xf32> to vector<1x8xf32>
    %54 = vector.shape_cast %53 : vector<1x8xf32> to vector<1x8x1xf32>
    %55 = vector.broadcast %54 : vector<1x8x1xf32> to vector<1x8x8xf32>
    %56 = arith.subf %52, %55 : vector<1x8x8xf32>
    %57 = math.exp %56 : vector<1x8x8xf32>
    %cst_25 = arith.constant dense<0.000000e+00> : vector<1x8xf32>
    %58 = vector.multi_reduction <add>, %57, %cst_25 [2] : vector<1x8x8xf32> to vector<1x8xf32>
    %59 = vector.shape_cast %58 : vector<1x8xf32> to vector<1x8x1xf32>
    %60 = vector.broadcast %59 : vector<1x8x1xf32> to vector<1x8x8xf32>
    %61 = arith.divf %57, %60 : vector<1x8x8xf32>
    "tpu.trace_start"() <{level = 10 : i32, message = "bqk,bkd->bqd"}> : () -> ()
    %cst_26 = arith.constant dense<0.000000e+00> : vector<1x8x16xf32>
    %62 = tpu.matmul %61, %47, %cst_26 {dimension_numbers = #tpu.dot_dimension_numbers<[2], [1], [1], [2], [0, 0, 0, 1, 1, 2], [0], [0]>} : vector<1x8x8xf32>, vector<1x8x16xf32>, vector<1x8x16xf32> -> vector<1x8x16xf32>
    "tpu.trace_stop"() : () -> ()
    %63 = vector.extract_strided_slice %44 {offsets = [0, 0, 16], sizes = [1, 8, 16], strides = [1, 1, 1]} : vector<1x8x192xf32> to vector<1x8x16xf32>
    %64 = vector.extract_strided_slice %44 {offsets = [0, 0, 80], sizes = [1, 8, 16], strides = [1, 1, 1]} : vector<1x8x192xf32> to vector<1x8x16xf32>
    %65 = vector.extract_strided_slice %44 {offsets = [0, 0, 144], sizes = [1, 8, 16], strides = [1, 1, 1]} : vector<1x8x192xf32> to vector<1x8x16xf32>
    "tpu.trace_start"() <{level = 10 : i32, message = "bqd,bkd->bqk"}> : () -> ()
    %cst_27 = arith.constant dense<0.000000e+00> : vector<1x8x8xf32>
    %66 = tpu.matmul %63, %64, %cst_27 {dimension_numbers = #tpu.dot_dimension_numbers<[2], [2], [1], [1], [0, 0, 0, 1, 1, 1], [0], [0]>} : vector<1x8x16xf32>, vector<1x8x16xf32>, vector<1x8x8xf32> -> vector<1x8x8xf32>
    "tpu.trace_stop"() : () -> ()
    %cst_28 = arith.constant 1.250000e-01 : f32
    %67 = vector.broadcast %cst_28 : f32 to vector<1x8x8xf32>
    %68 = arith.mulf %66, %67 : vector<1x8x8xf32>
    %cst_29 = arith.constant 0xFF800000 : f32
    %69 = vector.broadcast %cst_29 : f32 to vector<1x8x8xf32>
    %70 = arith.select %15, %68, %69 : vector<1x8x8xi1>, vector<1x8x8xf32>
    %cst_30 = arith.constant dense<0xFF800000> : vector<1x8xf32>
    %71 = vector.multi_reduction <maximumf>, %70, %cst_30 [2] : vector<1x8x8xf32> to vector<1x8xf32>
    %72 = vector.shape_cast %71 : vector<1x8xf32> to vector<1x8x1xf32>
    %73 = vector.broadcast %72 : vector<1x8x1xf32> to vector<1x8x8xf32>
    %74 = arith.subf %70, %73 : vector<1x8x8xf32>
    %75 = math.exp %74 : vector<1x8x8xf32>
    %cst_31 = arith.constant dense<0.000000e+00> : vector<1x8xf32>
    %76 = vector.multi_reduction <add>, %75, %cst_31 [2] : vector<1x8x8xf32> to vector<1x8xf32>
    %77 = vector.shape_cast %76 : vector<1x8xf32> to vector<1x8x1xf32>
    %78 = vector.broadcast %77 : vector<1x8x1xf32> to vector<1x8x8xf32>
    %79 = arith.divf %75, %78 : vector<1x8x8xf32>
    "tpu.trace_start"() <{level = 10 : i32, message = "bqk,bkd->bqd"}> : () -> ()
    %cst_32 = arith.constant dense<0.000000e+00> : vector<1x8x16xf32>
    %80 = tpu.matmul %79, %65, %cst_32 {dimension_numbers = #tpu.dot_dimension_numbers<[2], [1], [1], [2], [0, 0, 0, 1, 1, 2], [0], [0]>} : vector<1x8x8xf32>, vector<1x8x16xf32>, vector<1x8x16xf32> -> vector<1x8x16xf32>
    "tpu.trace_stop"() : () -> ()
    %81 = vector.extract_strided_slice %44 {offsets = [0, 0, 32], sizes = [1, 8, 16], strides = [1, 1, 1]} : vector<1x8x192xf32> to vector<1x8x16xf32>
    %82 = vector.extract_strided_slice %44 {offsets = [0, 0, 96], sizes = [1, 8, 16], strides = [1, 1, 1]} : vector<1x8x192xf32> to vector<1x8x16xf32>
    %83 = vector.extract_strided_slice %44 {offsets = [0, 0, 160], sizes = [1, 8, 16], strides = [1, 1, 1]} : vector<1x8x192xf32> to vector<1x8x16xf32>
    "tpu.trace_start"() <{level = 10 : i32, message = "bqd,bkd->bqk"}> : () -> ()
    %cst_33 = arith.constant dense<0.000000e+00> : vector<1x8x8xf32>
    %84 = tpu.matmul %81, %82, %cst_33 {dimension_numbers = #tpu.dot_dimension_numbers<[2], [2], [1], [1], [0, 0, 0, 1, 1, 1], [0], [0]>} : vector<1x8x16xf32>, vector<1x8x16xf32>, vector<1x8x8xf32> -> vector<1x8x8xf32>
    "tpu.trace_stop"() : () -> ()
    %cst_34 = arith.constant 1.250000e-01 : f32
    %85 = vector.broadcast %cst_34 : f32 to vector<1x8x8xf32>
    %86 = arith.mulf %84, %85 : vector<1x8x8xf32>
    %cst_35 = arith.constant 0xFF800000 : f32
    %87 = vector.broadcast %cst_35 : f32 to vector<1x8x8xf32>
    %88 = arith.select %15, %86, %87 : vector<1x8x8xi1>, vector<1x8x8xf32>
    %cst_36 = arith.constant dense<0xFF800000> : vector<1x8xf32>
    %89 = vector.multi_reduction <maximumf>, %88, %cst_36 [2] : vector<1x8x8xf32> to vector<1x8xf32>
    %90 = vector.shape_cast %89 : vector<1x8xf32> to vector<1x8x1xf32>
    %91 = vector.broadcast %90 : vector<1x8x1xf32> to vector<1x8x8xf32>
    %92 = arith.subf %88, %91 : vector<1x8x8xf32>
    %93 = math.exp %92 : vector<1x8x8xf32>
    %cst_37 = arith.constant dense<0.000000e+00> : vector<1x8xf32>
    %94 = vector.multi_reduction <add>, %93, %cst_37 [2] : vector<1x8x8xf32> to vector<1x8xf32>
    %95 = vector.shape_cast %94 : vector<1x8xf32> to vector<1x8x1xf32>
    %96 = vector.broadcast %95 : vector<1x8x1xf32> to vector<1x8x8xf32>
    %97 = arith.divf %93, %96 : vector<1x8x8xf32>
    "tpu.trace_start"() <{level = 10 : i32, message = "bqk,bkd->bqd"}> : () -> ()
    %cst_38 = arith.constant dense<0.000000e+00> : vector<1x8x16xf32>
    %98 = tpu.matmul %97, %83, %cst_38 {dimension_numbers = #tpu.dot_dimension_numbers<[2], [1], [1], [2], [0, 0, 0, 1, 1, 2], [0], [0]>} : vector<1x8x8xf32>, vector<1x8x16xf32>, vector<1x8x16xf32> -> vector<1x8x16xf32>
    "tpu.trace_stop"() : () -> ()
    %99 = vector.extract_strided_slice %44 {offsets = [0, 0, 48], sizes = [1, 8, 16], strides = [1, 1, 1]} : vector<1x8x192xf32> to vector<1x8x16xf32>
    %100 = vector.extract_strided_slice %44 {offsets = [0, 0, 112], sizes = [1, 8, 16], strides = [1, 1, 1]} : vector<1x8x192xf32> to vector<1x8x16xf32>
    %101 = vector.extract_strided_slice %44 {offsets = [0, 0, 176], sizes = [1, 8, 16], strides = [1, 1, 1]} : vector<1x8x192xf32> to vector<1x8x16xf32>
    "tpu.trace_start"() <{level = 10 : i32, message = "bqd,bkd->bqk"}> : () -> ()
    %cst_39 = arith.constant dense<0.000000e+00> : vector<1x8x8xf32>
    %102 = tpu.matmul %99, %100, %cst_39 {dimension_numbers = #tpu.dot_dimension_numbers<[2], [2], [1], [1], [0, 0, 0, 1, 1, 1], [0], [0]>} : vector<1x8x16xf32>, vector<1x8x16xf32>, vector<1x8x8xf32> -> vector<1x8x8xf32>
    "tpu.trace_stop"() : () -> ()
    %cst_40 = arith.constant 1.250000e-01 : f32
    %103 = vector.broadcast %cst_40 : f32 to vector<1x8x8xf32>
    %104 = arith.mulf %102, %103 : vector<1x8x8xf32>
    %cst_41 = arith.constant 0xFF800000 : f32
    %105 = vector.broadcast %cst_41 : f32 to vector<1x8x8xf32>
    %106 = arith.select %15, %104, %105 : vector<1x8x8xi1>, vector<1x8x8xf32>
    %cst_42 = arith.constant dense<0xFF800000> : vector<1x8xf32>
    %107 = vector.multi_reduction <maximumf>, %106, %cst_42 [2] : vector<1x8x8xf32> to vector<1x8xf32>
    %108 = vector.shape_cast %107 : vector<1x8xf32> to vector<1x8x1xf32>
    %109 = vector.broadcast %108 : vector<1x8x1xf32> to vector<1x8x8xf32>
    %110 = arith.subf %106, %109 : vector<1x8x8xf32>
    %111 = math.exp %110 : vector<1x8x8xf32>
    %cst_43 = arith.constant dense<0.000000e+00> : vector<1x8xf32>
    %112 = vector.multi_reduction <add>, %111, %cst_43 [2] : vector<1x8x8xf32> to vector<1x8xf32>
    %113 = vector.shape_cast %112 : vector<1x8xf32> to vector<1x8x1xf32>
    %114 = vector.broadcast %113 : vector<1x8x1xf32> to vector<1x8x8xf32>
    %115 = arith.divf %111, %114 : vector<1x8x8xf32>
    "tpu.trace_start"() <{level = 10 : i32, message = "bqk,bkd->bqd"}> : () -> ()
    %cst_44 = arith.constant dense<0.000000e+00> : vector<1x8x16xf32>
    %116 = tpu.matmul %115, %101, %cst_44 {dimension_numbers = #tpu.dot_dimension_numbers<[2], [1], [1], [2], [0, 0, 0, 1, 1, 2], [0], [0]>} : vector<1x8x8xf32>, vector<1x8x16xf32>, vector<1x8x16xf32> -> vector<1x8x16xf32>
    "tpu.trace_stop"() : () -> ()
    %117 = tpu.concatenate %62, %80, %98, %116 in 2 : vector<1x8x16xf32>, vector<1x8x16xf32>, vector<1x8x16xf32>, vector<1x8x16xf32> -> vector<1x8x64xf32>
    %118 = vector.shape_cast %117 : vector<1x8x64xf32> to vector<8x64xf32>
    %c0_45 = arith.constant 0 : index
    %c0_46 = arith.constant 0 : index
    %c0_47 = arith.constant 0 : index
    %119 = vector.load %arg7[%c0_45, %c0_46, %c0_47] : memref<4x64x64xbf16, #tpu.memory_space<vmem>>, vector<1x64x64xbf16>
    %120 = vector.shape_cast %119 : vector<1x64x64xbf16> to vector<64x64xbf16>
    %121 = arith.truncf %118 : vector<8x64xf32> to vector<8x64xbf16>
    %cst_48 = arith.constant dense<0.000000e+00> : vector<8x64xf32>
    %122 = tpu.matmul %121, %120, %cst_48 {dimension_numbers = #tpu.dot_dimension_numbers<[1], [0], [0], [1], [0, 0, 1, 1], [], []>} : vector<8x64xbf16>, vector<64x64xbf16>, vector<8x64xf32> -> vector<8x64xf32>
    %123 = arith.addf %11, %122 : vector<8x64xf32>
    %c0_49 = arith.constant 0 : index
    %c0_50 = arith.constant 0 : index
    %c0_51 = arith.constant 0 : index
    %124 = vector.load %arg8[%c0_49, %c0_50, %c0_51] : memref<4x1x64xf32, #tpu.memory_space<vmem>>, vector<1x1x64xf32>
    %125 = vector.shape_cast %124 : vector<1x1x64xf32> to vector<1x64xf32>
    %126 = vector.broadcast %125 : vector<1x64xf32> to vector<8x64xf32>
    %127 = arith.addf %123, %126 : vector<8x64xf32>
    %c0_52 = arith.constant 0 : index
    %c0_53 = arith.constant 0 : index
    %c0_54 = arith.constant 0 : index
    %128 = vector.load %arg9[%c0_52, %c0_53, %c0_54] : memref<4x1x64xf32, #tpu.memory_space<vmem>>, vector<1x1x64xf32>
    %129 = vector.shape_cast %128 : vector<1x1x64xf32> to vector<1x64xf32>
    %c0_55 = arith.constant 0 : index
    %c0_56 = arith.constant 0 : index
    %c0_57 = arith.constant 0 : index
    %130 = vector.load %arg10[%c0_55, %c0_56, %c0_57] : memref<4x1x64xf32, #tpu.memory_space<vmem>>, vector<1x1x64xf32>
    %131 = vector.shape_cast %130 : vector<1x1x64xf32> to vector<1x64xf32>
    %cst_58 = arith.constant dense<0.000000e+00> : vector<8xf32>
    %132 = vector.multi_reduction <add>, %127, %cst_58 [1] : vector<8x64xf32> to vector<8xf32>
    %133 = vector.shape_cast %132 : vector<8xf32> to vector<8x1xf32>
    %cst_59 = arith.constant 6.400000e+01 : f32
    %134 = vector.broadcast %cst_59 : f32 to vector<8x1xf32>
    %135 = arith.divf %133, %134 : vector<8x1xf32>
    %136 = vector.broadcast %135 : vector<8x1xf32> to vector<8x64xf32>
    %137 = arith.subf %127, %136 : vector<8x64xf32>
    %138 = arith.mulf %137, %137 : vector<8x64xf32>
    %cst_60 = arith.constant dense<0.000000e+00> : vector<8xf32>
    %139 = vector.multi_reduction <add>, %138, %cst_60 [1] : vector<8x64xf32> to vector<8xf32>
    %140 = vector.shape_cast %139 : vector<8xf32> to vector<8x1xf32>
    %cst_61 = arith.constant 6.400000e+01 : f32
    %141 = vector.broadcast %cst_61 : f32 to vector<8x1xf32>
    %142 = arith.divf %140, %141 : vector<8x1xf32>
    %cst_62 = arith.constant 9.99999974E-6 : f32
    %143 = vector.broadcast %cst_62 : f32 to vector<8x1xf32>
    %144 = arith.addf %142, %143 : vector<8x1xf32>
    %145 = math.rsqrt %144 : vector<8x1xf32>
    %146 = vector.broadcast %145 : vector<8x1xf32> to vector<8x64xf32>
    %147 = arith.mulf %137, %146 : vector<8x64xf32>
    %148 = vector.broadcast %129 : vector<1x64xf32> to vector<8x64xf32>
    %149 = arith.mulf %147, %148 : vector<8x64xf32>
    %150 = vector.broadcast %131 : vector<1x64xf32> to vector<8x64xf32>
    %151 = arith.addf %149, %150 : vector<8x64xf32>
    %c0_63 = arith.constant 0 : index
    %c0_64 = arith.constant 0 : index
    %c0_65 = arith.constant 0 : index
    %152 = vector.load %arg11[%c0_63, %c0_64, %c0_65] : memref<4x64x256xbf16, #tpu.memory_space<vmem>>, vector<1x64x256xbf16>
    %153 = vector.shape_cast %152 : vector<1x64x256xbf16> to vector<64x256xbf16>
    %154 = arith.truncf %151 : vector<8x64xf32> to vector<8x64xbf16>
    %cst_66 = arith.constant dense<0.000000e+00> : vector<8x256xf32>
    %155 = tpu.matmul %154, %153, %cst_66 {dimension_numbers = #tpu.dot_dimension_numbers<[1], [0], [0], [1], [0, 0, 1, 1], [], []>} : vector<8x64xbf16>, vector<64x256xbf16>, vector<8x256xf32> -> vector<8x256xf32>
    %c0_67 = arith.constant 0 : index
    %c0_68 = arith.constant 0 : index
    %c0_69 = arith.constant 0 : index
    %156 = vector.load %arg12[%c0_67, %c0_68, %c0_69] : memref<4x1x256xf32, #tpu.memory_space<vmem>>, vector<1x1x256xf32>
    %157 = vector.shape_cast %156 : vector<1x1x256xf32> to vector<1x256xf32>
    %158 = vector.broadcast %157 : vector<1x256xf32> to vector<8x256xf32>
    %159 = arith.addf %155, %158 : vector<8x256xf32>
    %cst_70 = arith.constant 0.000000e+00 : f32
    %160 = vector.broadcast %cst_70 : f32 to vector<8x256xf32>
    %161 = arith.maximumf %159, %160 : vector<8x256xf32>
    %c0_71 = arith.constant 0 : index
    %c0_72 = arith.constant 0 : index
    %c0_73 = arith.constant 0 : index
    %162 = vector.load %arg13[%c0_71, %c0_72, %c0_73] : memref<4x256x64xbf16, #tpu.memory_space<vmem>>, vector<1x256x64xbf16>
    %163 = vector.shape_cast %162 : vector<1x256x64xbf16> to vector<256x64xbf16>
    %164 = arith.truncf %161 : vector<8x256xf32> to vector<8x256xbf16>
    %cst_74 = arith.constant dense<0.000000e+00> : vector<8x64xf32>
    %165 = tpu.matmul %164, %163, %cst_74 {dimension_numbers = #tpu.dot_dimension_numbers<[1], [0], [0], [1], [0, 0, 1, 1], [], []>} : vector<8x256xbf16>, vector<256x64xbf16>, vector<8x64xf32> -> vector<8x64xf32>
    %166 = arith.addf %127, %165 : vector<8x64xf32>
    %c0_75 = arith.constant 0 : index
    %c0_76 = arith.constant 0 : index
    %c0_77 = arith.constant 0 : index
    %167 = vector.load %arg14[%c0_75, %c0_76, %c0_77] : memref<4x1x64xf32, #tpu.memory_space<vmem>>, vector<1x1x64xf32>
    %168 = vector.shape_cast %167 : vector<1x1x64xf32> to vector<1x64xf32>
    %169 = vector.broadcast %168 : vector<1x64xf32> to vector<8x64xf32>
    %170 = arith.addf %166, %169 : vector<8x64xf32>
    %c1 = arith.constant 1 : index
    %c0_78 = arith.constant 0 : index
    %c0_79 = arith.constant 0 : index
    %171 = vector.load %arg4[%c1, %c0_78, %c0_79] : memref<4x1x64xf32, #tpu.memory_space<vmem>>, vector<1x1x64xf32>
    %172 = vector.shape_cast %171 : vector<1x1x64xf32> to vector<1x64xf32>
    %c1_80 = arith.constant 1 : index
    %c0_81 = arith.constant 0 : index
    %c0_82 = arith.constant 0 : index
    %173 = vector.load %arg5[%c1_80, %c0_81, %c0_82] : memref<4x1x64xf32, #tpu.memory_space<vmem>>, vector<1x1x64xf32>
    %174 = vector.shape_cast %173 : vector<1x1x64xf32> to vector<1x64xf32>
    %cst_83 = arith.constant dense<0.000000e+00> : vector<8xf32>
    %175 = vector.multi_reduction <add>, %170, %cst_83 [1] : vector<8x64xf32> to vector<8xf32>
    %176 = vector.shape_cast %175 : vector<8xf32> to vector<8x1xf32>
    %cst_84 = arith.constant 6.400000e+01 : f32
    %177 = vector.broadcast %cst_84 : f32 to vector<8x1xf32>
    %178 = arith.divf %176, %177 : vector<8x1xf32>
    %179 = vector.broadcast %178 : vector<8x1xf32> to vector<8x64xf32>
    %180 = arith.subf %170, %179 : vector<8x64xf32>
    %181 = arith.mulf %180, %180 : vector<8x64xf32>
    %cst_85 = arith.constant dense<0.000000e+00> : vector<8xf32>
    %182 = vector.multi_reduction <add>, %181, %cst_85 [1] : vector<8x64xf32> to vector<8xf32>
    %183 = vector.shape_cast %182 : vector<8xf32> to vector<8x1xf32>
    %cst_86 = arith.constant 6.400000e+01 : f32
    %184 = vector.broadcast %cst_86 : f32 to vector<8x1xf32>
    %185 = arith.divf %183, %184 : vector<8x1xf32>
    %cst_87 = arith.constant 9.99999974E-6 : f32
    %186 = vector.broadcast %cst_87 : f32 to vector<8x1xf32>
    %187 = arith.addf %185, %186 : vector<8x1xf32>
    %188 = math.rsqrt %187 : vector<8x1xf32>
    %189 = vector.broadcast %188 : vector<8x1xf32> to vector<8x64xf32>
    %190 = arith.mulf %180, %189 : vector<8x64xf32>
    %191 = vector.broadcast %172 : vector<1x64xf32> to vector<8x64xf32>
    %192 = arith.mulf %190, %191 : vector<8x64xf32>
    %193 = vector.broadcast %174 : vector<1x64xf32> to vector<8x64xf32>
    %194 = arith.addf %192, %193 : vector<8x64xf32>
    %c1_88 = arith.constant 1 : index
    %c0_89 = arith.constant 0 : index
    %c0_90 = arith.constant 0 : index
    %195 = vector.load %arg6[%c1_88, %c0_89, %c0_90] : memref<4x64x192xbf16, #tpu.memory_space<vmem>>, vector<1x64x192xbf16>
    %196 = vector.shape_cast %195 : vector<1x64x192xbf16> to vector<64x192xbf16>
    %197 = arith.truncf %194 : vector<8x64xf32> to vector<8x64xbf16>
    %cst_91 = arith.constant dense<0.000000e+00> : vector<8x192xf32>
    %198 = tpu.matmul %197, %196, %cst_91 {dimension_numbers = #tpu.dot_dimension_numbers<[1], [0], [0], [1], [0, 0, 1, 1], [], []>} : vector<8x64xbf16>, vector<64x192xbf16>, vector<8x192xf32> -> vector<8x192xf32>
    %199 = vector.shape_cast %198 : vector<8x192xf32> to vector<1x8x192xf32>
    %200 = vector.extract_strided_slice %199 {offsets = [0, 0, 0], sizes = [1, 8, 16], strides = [1, 1, 1]} : vector<1x8x192xf32> to vector<1x8x16xf32>
    %201 = vector.extract_strided_slice %199 {offsets = [0, 0, 64], sizes = [1, 8, 16], strides = [1, 1, 1]} : vector<1x8x192xf32> to vector<1x8x16xf32>
    %202 = vector.extract_strided_slice %199 {offsets = [0, 0, 128], sizes = [1, 8, 16], strides = [1, 1, 1]} : vector<1x8x192xf32> to vector<1x8x16xf32>
    "tpu.trace_start"() <{level = 10 : i32, message = "bqd,bkd->bqk"}> : () -> ()
    %cst_92 = arith.constant dense<0.000000e+00> : vector<1x8x8xf32>
    %203 = tpu.matmul %200, %201, %cst_92 {dimension_numbers = #tpu.dot_dimension_numbers<[2], [2], [1], [1], [0, 0, 0, 1, 1, 1], [0], [0]>} : vector<1x8x16xf32>, vector<1x8x16xf32>, vector<1x8x8xf32> -> vector<1x8x8xf32>
    "tpu.trace_stop"() : () -> ()
    %cst_93 = arith.constant 1.250000e-01 : f32
    %204 = vector.broadcast %cst_93 : f32 to vector<1x8x8xf32>
    %205 = arith.mulf %203, %204 : vector<1x8x8xf32>
    %cst_94 = arith.constant 0xFF800000 : f32
    %206 = vector.broadcast %cst_94 : f32 to vector<1x8x8xf32>
    %207 = arith.select %15, %205, %206 : vector<1x8x8xi1>, vector<1x8x8xf32>
    %cst_95 = arith.constant dense<0xFF800000> : vector<1x8xf32>
    %208 = vector.multi_reduction <maximumf>, %207, %cst_95 [2] : vector<1x8x8xf32> to vector<1x8xf32>
    %209 = vector.shape_cast %208 : vector<1x8xf32> to vector<1x8x1xf32>
    %210 = vector.broadcast %209 : vector<1x8x1xf32> to vector<1x8x8xf32>
    %211 = arith.subf %207, %210 : vector<1x8x8xf32>
    %212 = math.exp %211 : vector<1x8x8xf32>
    %cst_96 = arith.constant dense<0.000000e+00> : vector<1x8xf32>
    %213 = vector.multi_reduction <add>, %212, %cst_96 [2] : vector<1x8x8xf32> to vector<1x8xf32>
    %214 = vector.shape_cast %213 : vector<1x8xf32> to vector<1x8x1xf32>
    %215 = vector.broadcast %214 : vector<1x8x1xf32> to vector<1x8x8xf32>
    %216 = arith.divf %212, %215 : vector<1x8x8xf32>
    "tpu.trace_start"() <{level = 10 : i32, message = "bqk,bkd->bqd"}> : () -> ()
    %cst_97 = arith.constant dense<0.000000e+00> : vector<1x8x16xf32>
    %217 = tpu.matmul %216, %202, %cst_97 {dimension_numbers = #tpu.dot_dimension_numbers<[2], [1], [1], [2], [0, 0, 0, 1, 1, 2], [0], [0]>} : vector<1x8x8xf32>, vector<1x8x16xf32>, vector<1x8x16xf32> -> vector<1x8x16xf32>
    "tpu.trace_stop"() : () -> ()
    %218 = vector.extract_strided_slice %199 {offsets = [0, 0, 16], sizes = [1, 8, 16], strides = [1, 1, 1]} : vector<1x8x192xf32> to vector<1x8x16xf32>
    %219 = vector.extract_strided_slice %199 {offsets = [0, 0, 80], sizes = [1, 8, 16], strides = [1, 1, 1]} : vector<1x8x192xf32> to vector<1x8x16xf32>
    %220 = vector.extract_strided_slice %199 {offsets = [0, 0, 144], sizes = [1, 8, 16], strides = [1, 1, 1]} : vector<1x8x192xf32> to vector<1x8x16xf32>
    "tpu.trace_start"() <{level = 10 : i32, message = "bqd,bkd->bqk"}> : () -> ()
    %cst_98 = arith.constant dense<0.000000e+00> : vector<1x8x8xf32>
    %221 = tpu.matmul %218, %219, %cst_98 {dimension_numbers = #tpu.dot_dimension_numbers<[2], [2], [1], [1], [0, 0, 0, 1, 1, 1], [0], [0]>} : vector<1x8x16xf32>, vector<1x8x16xf32>, vector<1x8x8xf32> -> vector<1x8x8xf32>
    "tpu.trace_stop"() : () -> ()
    %cst_99 = arith.constant 1.250000e-01 : f32
    %222 = vector.broadcast %cst_99 : f32 to vector<1x8x8xf32>
    %223 = arith.mulf %221, %222 : vector<1x8x8xf32>
    %cst_100 = arith.constant 0xFF800000 : f32
    %224 = vector.broadcast %cst_100 : f32 to vector<1x8x8xf32>
    %225 = arith.select %15, %223, %224 : vector<1x8x8xi1>, vector<1x8x8xf32>
    %cst_101 = arith.constant dense<0xFF800000> : vector<1x8xf32>
    %226 = vector.multi_reduction <maximumf>, %225, %cst_101 [2] : vector<1x8x8xf32> to vector<1x8xf32>
    %227 = vector.shape_cast %226 : vector<1x8xf32> to vector<1x8x1xf32>
    %228 = vector.broadcast %227 : vector<1x8x1xf32> to vector<1x8x8xf32>
    %229 = arith.subf %225, %228 : vector<1x8x8xf32>
    %230 = math.exp %229 : vector<1x8x8xf32>
    %cst_102 = arith.constant dense<0.000000e+00> : vector<1x8xf32>
    %231 = vector.multi_reduction <add>, %230, %cst_102 [2] : vector<1x8x8xf32> to vector<1x8xf32>
    %232 = vector.shape_cast %231 : vector<1x8xf32> to vector<1x8x1xf32>
    %233 = vector.broadcast %232 : vector<1x8x1xf32> to vector<1x8x8xf32>
    %234 = arith.divf %230, %233 : vector<1x8x8xf32>
    "tpu.trace_start"() <{level = 10 : i32, message = "bqk,bkd->bqd"}> : () -> ()
    %cst_103 = arith.constant dense<0.000000e+00> : vector<1x8x16xf32>
    %235 = tpu.matmul %234, %220, %cst_103 {dimension_numbers = #tpu.dot_dimension_numbers<[2], [1], [1], [2], [0, 0, 0, 1, 1, 2], [0], [0]>} : vector<1x8x8xf32>, vector<1x8x16xf32>, vector<1x8x16xf32> -> vector<1x8x16xf32>
    "tpu.trace_stop"() : () -> ()
    %236 = vector.extract_strided_slice %199 {offsets = [0, 0, 32], sizes = [1, 8, 16], strides = [1, 1, 1]} : vector<1x8x192xf32> to vector<1x8x16xf32>
    %237 = vector.extract_strided_slice %199 {offsets = [0, 0, 96], sizes = [1, 8, 16], strides = [1, 1, 1]} : vector<1x8x192xf32> to vector<1x8x16xf32>
    %238 = vector.extract_strided_slice %199 {offsets = [0, 0, 160], sizes = [1, 8, 16], strides = [1, 1, 1]} : vector<1x8x192xf32> to vector<1x8x16xf32>
    "tpu.trace_start"() <{level = 10 : i32, message = "bqd,bkd->bqk"}> : () -> ()
    %cst_104 = arith.constant dense<0.000000e+00> : vector<1x8x8xf32>
    %239 = tpu.matmul %236, %237, %cst_104 {dimension_numbers = #tpu.dot_dimension_numbers<[2], [2], [1], [1], [0, 0, 0, 1, 1, 1], [0], [0]>} : vector<1x8x16xf32>, vector<1x8x16xf32>, vector<1x8x8xf32> -> vector<1x8x8xf32>
    "tpu.trace_stop"() : () -> ()
    %cst_105 = arith.constant 1.250000e-01 : f32
    %240 = vector.broadcast %cst_105 : f32 to vector<1x8x8xf32>
    %241 = arith.mulf %239, %240 : vector<1x8x8xf32>
    %cst_106 = arith.constant 0xFF800000 : f32
    %242 = vector.broadcast %cst_106 : f32 to vector<1x8x8xf32>
    %243 = arith.select %15, %241, %242 : vector<1x8x8xi1>, vector<1x8x8xf32>
    %cst_107 = arith.constant dense<0xFF800000> : vector<1x8xf32>
    %244 = vector.multi_reduction <maximumf>, %243, %cst_107 [2] : vector<1x8x8xf32> to vector<1x8xf32>
    %245 = vector.shape_cast %244 : vector<1x8xf32> to vector<1x8x1xf32>
    %246 = vector.broadcast %245 : vector<1x8x1xf32> to vector<1x8x8xf32>
    %247 = arith.subf %243, %246 : vector<1x8x8xf32>
    %248 = math.exp %247 : vector<1x8x8xf32>
    %cst_108 = arith.constant dense<0.000000e+00> : vector<1x8xf32>
    %249 = vector.multi_reduction <add>, %248, %cst_108 [2] : vector<1x8x8xf32> to vector<1x8xf32>
    %250 = vector.shape_cast %249 : vector<1x8xf32> to vector<1x8x1xf32>
    %251 = vector.broadcast %250 : vector<1x8x1xf32> to vector<1x8x8xf32>
    %252 = arith.divf %248, %251 : vector<1x8x8xf32>
    "tpu.trace_start"() <{level = 10 : i32, message = "bqk,bkd->bqd"}> : () -> ()
    %cst_109 = arith.constant dense<0.000000e+00> : vector<1x8x16xf32>
    %253 = tpu.matmul %252, %238, %cst_109 {dimension_numbers = #tpu.dot_dimension_numbers<[2], [1], [1], [2], [0, 0, 0, 1, 1, 2], [0], [0]>} : vector<1x8x8xf32>, vector<1x8x16xf32>, vector<1x8x16xf32> -> vector<1x8x16xf32>
    "tpu.trace_stop"() : () -> ()
    %254 = vector.extract_strided_slice %199 {offsets = [0, 0, 48], sizes = [1, 8, 16], strides = [1, 1, 1]} : vector<1x8x192xf32> to vector<1x8x16xf32>
    %255 = vector.extract_strided_slice %199 {offsets = [0, 0, 112], sizes = [1, 8, 16], strides = [1, 1, 1]} : vector<1x8x192xf32> to vector<1x8x16xf32>
    %256 = vector.extract_strided_slice %199 {offsets = [0, 0, 176], sizes = [1, 8, 16], strides = [1, 1, 1]} : vector<1x8x192xf32> to vector<1x8x16xf32>
    "tpu.trace_start"() <{level = 10 : i32, message = "bqd,bkd->bqk"}> : () -> ()
    %cst_110 = arith.constant dense<0.000000e+00> : vector<1x8x8xf32>
    %257 = tpu.matmul %254, %255, %cst_110 {dimension_numbers = #tpu.dot_dimension_numbers<[2], [2], [1], [1], [0, 0, 0, 1, 1, 1], [0], [0]>} : vector<1x8x16xf32>, vector<1x8x16xf32>, vector<1x8x8xf32> -> vector<1x8x8xf32>
    "tpu.trace_stop"() : () -> ()
    %cst_111 = arith.constant 1.250000e-01 : f32
    %258 = vector.broadcast %cst_111 : f32 to vector<1x8x8xf32>
    %259 = arith.mulf %257, %258 : vector<1x8x8xf32>
    %cst_112 = arith.constant 0xFF800000 : f32
    %260 = vector.broadcast %cst_112 : f32 to vector<1x8x8xf32>
    %261 = arith.select %15, %259, %260 : vector<1x8x8xi1>, vector<1x8x8xf32>
    %cst_113 = arith.constant dense<0xFF800000> : vector<1x8xf32>
    %262 = vector.multi_reduction <maximumf>, %261, %cst_113 [2] : vector<1x8x8xf32> to vector<1x8xf32>
    %263 = vector.shape_cast %262 : vector<1x8xf32> to vector<1x8x1xf32>
    %264 = vector.broadcast %263 : vector<1x8x1xf32> to vector<1x8x8xf32>
    %265 = arith.subf %261, %264 : vector<1x8x8xf32>
    %266 = math.exp %265 : vector<1x8x8xf32>
    %cst_114 = arith.constant dense<0.000000e+00> : vector<1x8xf32>
    %267 = vector.multi_reduction <add>, %266, %cst_114 [2] : vector<1x8x8xf32> to vector<1x8xf32>
    %268 = vector.shape_cast %267 : vector<1x8xf32> to vector<1x8x1xf32>
    %269 = vector.broadcast %268 : vector<1x8x1xf32> to vector<1x8x8xf32>
    %270 = arith.divf %266, %269 : vector<1x8x8xf32>
    "tpu.trace_start"() <{level = 10 : i32, message = "bqk,bkd->bqd"}> : () -> ()
    %cst_115 = arith.constant dense<0.000000e+00> : vector<1x8x16xf32>
    %271 = tpu.matmul %270, %256, %cst_115 {dimension_numbers = #tpu.dot_dimension_numbers<[2], [1], [1], [2], [0, 0, 0, 1, 1, 2], [0], [0]>} : vector<1x8x8xf32>, vector<1x8x16xf32>, vector<1x8x16xf32> -> vector<1x8x16xf32>
    "tpu.trace_stop"() : () -> ()
    %272 = tpu.concatenate %217, %235, %253, %271 in 2 : vector<1x8x16xf32>, vector<1x8x16xf32>, vector<1x8x16xf32>, vector<1x8x16xf32> -> vector<1x8x64xf32>
    %273 = vector.shape_cast %272 : vector<1x8x64xf32> to vector<8x64xf32>
    %c1_116 = arith.constant 1 : index
    %c0_117 = arith.constant 0 : index
    %c0_118 = arith.constant 0 : index
    %274 = vector.load %arg7[%c1_116, %c0_117, %c0_118] : memref<4x64x64xbf16, #tpu.memory_space<vmem>>, vector<1x64x64xbf16>
    %275 = vector.shape_cast %274 : vector<1x64x64xbf16> to vector<64x64xbf16>
    %276 = arith.truncf %273 : vector<8x64xf32> to vector<8x64xbf16>
    %cst_119 = arith.constant dense<0.000000e+00> : vector<8x64xf32>
    %277 = tpu.matmul %276, %275, %cst_119 {dimension_numbers = #tpu.dot_dimension_numbers<[1], [0], [0], [1], [0, 0, 1, 1], [], []>} : vector<8x64xbf16>, vector<64x64xbf16>, vector<8x64xf32> -> vector<8x64xf32>
    %278 = arith.addf %170, %277 : vector<8x64xf32>
    %c1_120 = arith.constant 1 : index
    %c0_121 = arith.constant 0 : index
    %c0_122 = arith.constant 0 : index
    %279 = vector.load %arg8[%c1_120, %c0_121, %c0_122] : memref<4x1x64xf32, #tpu.memory_space<vmem>>, vector<1x1x64xf32>
    %280 = vector.shape_cast %279 : vector<1x1x64xf32> to vector<1x64xf32>
    %281 = vector.broadcast %280 : vector<1x64xf32> to vector<8x64xf32>
    %282 = arith.addf %278, %281 : vector<8x64xf32>
    %c1_123 = arith.constant 1 : index
    %c0_124 = arith.constant 0 : index
    %c0_125 = arith.constant 0 : index
    %283 = vector.load %arg9[%c1_123, %c0_124, %c0_125] : memref<4x1x64xf32, #tpu.memory_space<vmem>>, vector<1x1x64xf32>
    %284 = vector.shape_cast %283 : vector<1x1x64xf32> to vector<1x64xf32>
    %c1_126 = arith.constant 1 : index
    %c0_127 = arith.constant 0 : index
    %c0_128 = arith.constant 0 : index
    %285 = vector.load %arg10[%c1_126, %c0_127, %c0_128] : memref<4x1x64xf32, #tpu.memory_space<vmem>>, vector<1x1x64xf32>
    %286 = vector.shape_cast %285 : vector<1x1x64xf32> to vector<1x64xf32>
    %cst_129 = arith.constant dense<0.000000e+00> : vector<8xf32>
    %287 = vector.multi_reduction <add>, %282, %cst_129 [1] : vector<8x64xf32> to vector<8xf32>
    %288 = vector.shape_cast %287 : vector<8xf32> to vector<8x1xf32>
    %cst_130 = arith.constant 6.400000e+01 : f32
    %289 = vector.broadcast %cst_130 : f32 to vector<8x1xf32>
    %290 = arith.divf %288, %289 : vector<8x1xf32>
    %291 = vector.broadcast %290 : vector<8x1xf32> to vector<8x64xf32>
    %292 = arith.subf %282, %291 : vector<8x64xf32>
    %293 = arith.mulf %292, %292 : vector<8x64xf32>
    %cst_131 = arith.constant dense<0.000000e+00> : vector<8xf32>
    %294 = vector.multi_reduction <add>, %293, %cst_131 [1] : vector<8x64xf32> to vector<8xf32>
    %295 = vector.shape_cast %294 : vector<8xf32> to vector<8x1xf32>
    %cst_132 = arith.constant 6.400000e+01 : f32
    %296 = vector.broadcast %cst_132 : f32 to vector<8x1xf32>
    %297 = arith.divf %295, %296 : vector<8x1xf32>
    %cst_133 = arith.constant 9.99999974E-6 : f32
    %298 = vector.broadcast %cst_133 : f32 to vector<8x1xf32>
    %299 = arith.addf %297, %298 : vector<8x1xf32>
    %300 = math.rsqrt %299 : vector<8x1xf32>
    %301 = vector.broadcast %300 : vector<8x1xf32> to vector<8x64xf32>
    %302 = arith.mulf %292, %301 : vector<8x64xf32>
    %303 = vector.broadcast %284 : vector<1x64xf32> to vector<8x64xf32>
    %304 = arith.mulf %302, %303 : vector<8x64xf32>
    %305 = vector.broadcast %286 : vector<1x64xf32> to vector<8x64xf32>
    %306 = arith.addf %304, %305 : vector<8x64xf32>
    %c1_134 = arith.constant 1 : index
    %c0_135 = arith.constant 0 : index
    %c0_136 = arith.constant 0 : index
    %307 = vector.load %arg11[%c1_134, %c0_135, %c0_136] : memref<4x64x256xbf16, #tpu.memory_space<vmem>>, vector<1x64x256xbf16>
    %308 = vector.shape_cast %307 : vector<1x64x256xbf16> to vector<64x256xbf16>
    %309 = arith.truncf %306 : vector<8x64xf32> to vector<8x64xbf16>
    %cst_137 = arith.constant dense<0.000000e+00> : vector<8x256xf32>
    %310 = tpu.matmul %309, %308, %cst_137 {dimension_numbers = #tpu.dot_dimension_numbers<[1], [0], [0], [1], [0, 0, 1, 1], [], []>} : vector<8x64xbf16>, vector<64x256xbf16>, vector<8x256xf32> -> vector<8x256xf32>
    %c1_138 = arith.constant 1 : index
    %c0_139 = arith.constant 0 : index
    %c0_140 = arith.constant 0 : index
    %311 = vector.load %arg12[%c1_138, %c0_139, %c0_140] : memref<4x1x256xf32, #tpu.memory_space<vmem>>, vector<1x1x256xf32>
    %312 = vector.shape_cast %311 : vector<1x1x256xf32> to vector<1x256xf32>
    %313 = vector.broadcast %312 : vector<1x256xf32> to vector<8x256xf32>
    %314 = arith.addf %310, %313 : vector<8x256xf32>
    %cst_141 = arith.constant 0.000000e+00 : f32
    %315 = vector.broadcast %cst_141 : f32 to vector<8x256xf32>
    %316 = arith.maximumf %314, %315 : vector<8x256xf32>
    %c1_142 = arith.constant 1 : index
    %c0_143 = arith.constant 0 : index
    %c0_144 = arith.constant 0 : index
    %317 = vector.load %arg13[%c1_142, %c0_143, %c0_144] : memref<4x256x64xbf16, #tpu.memory_space<vmem>>, vector<1x256x64xbf16>
    %318 = vector.shape_cast %317 : vector<1x256x64xbf16> to vector<256x64xbf16>
    %319 = arith.truncf %316 : vector<8x256xf32> to vector<8x256xbf16>
    %cst_145 = arith.constant dense<0.000000e+00> : vector<8x64xf32>
    %320 = tpu.matmul %319, %318, %cst_145 {dimension_numbers = #tpu.dot_dimension_numbers<[1], [0], [0], [1], [0, 0, 1, 1], [], []>} : vector<8x256xbf16>, vector<256x64xbf16>, vector<8x64xf32> -> vector<8x64xf32>
    %321 = arith.addf %282, %320 : vector<8x64xf32>
    %c1_146 = arith.constant 1 : index
    %c0_147 = arith.constant 0 : index
    %c0_148 = arith.constant 0 : index
    %322 = vector.load %arg14[%c1_146, %c0_147, %c0_148] : memref<4x1x64xf32, #tpu.memory_space<vmem>>, vector<1x1x64xf32>
    %323 = vector.shape_cast %322 : vector<1x1x64xf32> to vector<1x64xf32>
    %324 = vector.broadcast %323 : vector<1x64xf32> to vector<8x64xf32>
    %325 = arith.addf %321, %324 : vector<8x64xf32>
    %c2 = arith.constant 2 : index
    %c0_149 = arith.constant 0 : index
    %c0_150 = arith.constant 0 : index
    %326 = vector.load %arg4[%c2, %c0_149, %c0_150] : memref<4x1x64xf32, #tpu.memory_space<vmem>>, vector<1x1x64xf32>
    %327 = vector.shape_cast %326 : vector<1x1x64xf32> to vector<1x64xf32>
    %c2_151 = arith.constant 2 : index
    %c0_152 = arith.constant 0 : index
    %c0_153 = arith.constant 0 : index
    %328 = vector.load %arg5[%c2_151, %c0_152, %c0_153] : memref<4x1x64xf32, #tpu.memory_space<vmem>>, vector<1x1x64xf32>
    %329 = vector.shape_cast %328 : vector<1x1x64xf32> to vector<1x64xf32>
    %cst_154 = arith.constant dense<0.000000e+00> : vector<8xf32>
    %330 = vector.multi_reduction <add>, %325, %cst_154 [1] : vector<8x64xf32> to vector<8xf32>
    %331 = vector.shape_cast %330 : vector<8xf32> to vector<8x1xf32>
    %cst_155 = arith.constant 6.400000e+01 : f32
    %332 = vector.broadcast %cst_155 : f32 to vector<8x1xf32>
    %333 = arith.divf %331, %332 : vector<8x1xf32>
    %334 = vector.broadcast %333 : vector<8x1xf32> to vector<8x64xf32>
    %335 = arith.subf %325, %334 : vector<8x64xf32>
    %336 = arith.mulf %335, %335 : vector<8x64xf32>
    %cst_156 = arith.constant dense<0.000000e+00> : vector<8xf32>
    %337 = vector.multi_reduction <add>, %336, %cst_156 [1] : vector<8x64xf32> to vector<8xf32>
    %338 = vector.shape_cast %337 : vector<8xf32> to vector<8x1xf32>
    %cst_157 = arith.constant 6.400000e+01 : f32
    %339 = vector.broadcast %cst_157 : f32 to vector<8x1xf32>
    %340 = arith.divf %338, %339 : vector<8x1xf32>
    %cst_158 = arith.constant 9.99999974E-6 : f32
    %341 = vector.broadcast %cst_158 : f32 to vector<8x1xf32>
    %342 = arith.addf %340, %341 : vector<8x1xf32>
    %343 = math.rsqrt %342 : vector<8x1xf32>
    %344 = vector.broadcast %343 : vector<8x1xf32> to vector<8x64xf32>
    %345 = arith.mulf %335, %344 : vector<8x64xf32>
    %346 = vector.broadcast %327 : vector<1x64xf32> to vector<8x64xf32>
    %347 = arith.mulf %345, %346 : vector<8x64xf32>
    %348 = vector.broadcast %329 : vector<1x64xf32> to vector<8x64xf32>
    %349 = arith.addf %347, %348 : vector<8x64xf32>
    %c2_159 = arith.constant 2 : index
    %c0_160 = arith.constant 0 : index
    %c0_161 = arith.constant 0 : index
    %350 = vector.load %arg6[%c2_159, %c0_160, %c0_161] : memref<4x64x192xbf16, #tpu.memory_space<vmem>>, vector<1x64x192xbf16>
    %351 = vector.shape_cast %350 : vector<1x64x192xbf16> to vector<64x192xbf16>
    %352 = arith.truncf %349 : vector<8x64xf32> to vector<8x64xbf16>
    %cst_162 = arith.constant dense<0.000000e+00> : vector<8x192xf32>
    %353 = tpu.matmul %352, %351, %cst_162 {dimension_numbers = #tpu.dot_dimension_numbers<[1], [0], [0], [1], [0, 0, 1, 1], [], []>} : vector<8x64xbf16>, vector<64x192xbf16>, vector<8x192xf32> -> vector<8x192xf32>
    %354 = vector.shape_cast %353 : vector<8x192xf32> to vector<1x8x192xf32>
    %355 = vector.extract_strided_slice %354 {offsets = [0, 0, 0], sizes = [1, 8, 16], strides = [1, 1, 1]} : vector<1x8x192xf32> to vector<1x8x16xf32>
    %356 = vector.extract_strided_slice %354 {offsets = [0, 0, 64], sizes = [1, 8, 16], strides = [1, 1, 1]} : vector<1x8x192xf32> to vector<1x8x16xf32>
    %357 = vector.extract_strided_slice %354 {offsets = [0, 0, 128], sizes = [1, 8, 16], strides = [1, 1, 1]} : vector<1x8x192xf32> to vector<1x8x16xf32>
    "tpu.trace_start"() <{level = 10 : i32, message = "bqd,bkd->bqk"}> : () -> ()
    %cst_163 = arith.constant dense<0.000000e+00> : vector<1x8x8xf32>
    %358 = tpu.matmul %355, %356, %cst_163 {dimension_numbers = #tpu.dot_dimension_numbers<[2], [2], [1], [1], [0, 0, 0, 1, 1, 1], [0], [0]>} : vector<1x8x16xf32>, vector<1x8x16xf32>, vector<1x8x8xf32> -> vector<1x8x8xf32>
    "tpu.trace_stop"() : () -> ()
    %cst_164 = arith.constant 1.250000e-01 : f32
    %359 = vector.broadcast %cst_164 : f32 to vector<1x8x8xf32>
    %360 = arith.mulf %358, %359 : vector<1x8x8xf32>
    %cst_165 = arith.constant 0xFF800000 : f32
    %361 = vector.broadcast %cst_165 : f32 to vector<1x8x8xf32>
    %362 = arith.select %15, %360, %361 : vector<1x8x8xi1>, vector<1x8x8xf32>
    %cst_166 = arith.constant dense<0xFF800000> : vector<1x8xf32>
    %363 = vector.multi_reduction <maximumf>, %362, %cst_166 [2] : vector<1x8x8xf32> to vector<1x8xf32>
    %364 = vector.shape_cast %363 : vector<1x8xf32> to vector<1x8x1xf32>
    %365 = vector.broadcast %364 : vector<1x8x1xf32> to vector<1x8x8xf32>
    %366 = arith.subf %362, %365 : vector<1x8x8xf32>
    %367 = math.exp %366 : vector<1x8x8xf32>
    %cst_167 = arith.constant dense<0.000000e+00> : vector<1x8xf32>
    %368 = vector.multi_reduction <add>, %367, %cst_167 [2] : vector<1x8x8xf32> to vector<1x8xf32>
    %369 = vector.shape_cast %368 : vector<1x8xf32> to vector<1x8x1xf32>
    %370 = vector.broadcast %369 : vector<1x8x1xf32> to vector<1x8x8xf32>
    %371 = arith.divf %367, %370 : vector<1x8x8xf32>
    "tpu.trace_start"() <{level = 10 : i32, message = "bqk,bkd->bqd"}> : () -> ()
    %cst_168 = arith.constant dense<0.000000e+00> : vector<1x8x16xf32>
    %372 = tpu.matmul %371, %357, %cst_168 {dimension_numbers = #tpu.dot_dimension_numbers<[2], [1], [1], [2], [0, 0, 0, 1, 1, 2], [0], [0]>} : vector<1x8x8xf32>, vector<1x8x16xf32>, vector<1x8x16xf32> -> vector<1x8x16xf32>
    "tpu.trace_stop"() : () -> ()
    %373 = vector.extract_strided_slice %354 {offsets = [0, 0, 16], sizes = [1, 8, 16], strides = [1, 1, 1]} : vector<1x8x192xf32> to vector<1x8x16xf32>
    %374 = vector.extract_strided_slice %354 {offsets = [0, 0, 80], sizes = [1, 8, 16], strides = [1, 1, 1]} : vector<1x8x192xf32> to vector<1x8x16xf32>
    %375 = vector.extract_strided_slice %354 {offsets = [0, 0, 144], sizes = [1, 8, 16], strides = [1, 1, 1]} : vector<1x8x192xf32> to vector<1x8x16xf32>
    "tpu.trace_start"() <{level = 10 : i32, message = "bqd,bkd->bqk"}> : () -> ()
    %cst_169 = arith.constant dense<0.000000e+00> : vector<1x8x8xf32>
    %376 = tpu.matmul %373, %374, %cst_169 {dimension_numbers = #tpu.dot_dimension_numbers<[2], [2], [1], [1], [0, 0, 0, 1, 1, 1], [0], [0]>} : vector<1x8x16xf32>, vector<1x8x16xf32>, vector<1x8x8xf32> -> vector<1x8x8xf32>
    "tpu.trace_stop"() : () -> ()
    %cst_170 = arith.constant 1.250000e-01 : f32
    %377 = vector.broadcast %cst_170 : f32 to vector<1x8x8xf32>
    %378 = arith.mulf %376, %377 : vector<1x8x8xf32>
    %cst_171 = arith.constant 0xFF800000 : f32
    %379 = vector.broadcast %cst_171 : f32 to vector<1x8x8xf32>
    %380 = arith.select %15, %378, %379 : vector<1x8x8xi1>, vector<1x8x8xf32>
    %cst_172 = arith.constant dense<0xFF800000> : vector<1x8xf32>
    %381 = vector.multi_reduction <maximumf>, %380, %cst_172 [2] : vector<1x8x8xf32> to vector<1x8xf32>
    %382 = vector.shape_cast %381 : vector<1x8xf32> to vector<1x8x1xf32>
    %383 = vector.broadcast %382 : vector<1x8x1xf32> to vector<1x8x8xf32>
    %384 = arith.subf %380, %383 : vector<1x8x8xf32>
    %385 = math.exp %384 : vector<1x8x8xf32>
    %cst_173 = arith.constant dense<0.000000e+00> : vector<1x8xf32>
    %386 = vector.multi_reduction <add>, %385, %cst_173 [2] : vector<1x8x8xf32> to vector<1x8xf32>
    %387 = vector.shape_cast %386 : vector<1x8xf32> to vector<1x8x1xf32>
    %388 = vector.broadcast %387 : vector<1x8x1xf32> to vector<1x8x8xf32>
    %389 = arith.divf %385, %388 : vector<1x8x8xf32>
    "tpu.trace_start"() <{level = 10 : i32, message = "bqk,bkd->bqd"}> : () -> ()
    %cst_174 = arith.constant dense<0.000000e+00> : vector<1x8x16xf32>
    %390 = tpu.matmul %389, %375, %cst_174 {dimension_numbers = #tpu.dot_dimension_numbers<[2], [1], [1], [2], [0, 0, 0, 1, 1, 2], [0], [0]>} : vector<1x8x8xf32>, vector<1x8x16xf32>, vector<1x8x16xf32> -> vector<1x8x16xf32>
    "tpu.trace_stop"() : () -> ()
    %391 = vector.extract_strided_slice %354 {offsets = [0, 0, 32], sizes = [1, 8, 16], strides = [1, 1, 1]} : vector<1x8x192xf32> to vector<1x8x16xf32>
    %392 = vector.extract_strided_slice %354 {offsets = [0, 0, 96], sizes = [1, 8, 16], strides = [1, 1, 1]} : vector<1x8x192xf32> to vector<1x8x16xf32>
    %393 = vector.extract_strided_slice %354 {offsets = [0, 0, 160], sizes = [1, 8, 16], strides = [1, 1, 1]} : vector<1x8x192xf32> to vector<1x8x16xf32>
    "tpu.trace_start"() <{level = 10 : i32, message = "bqd,bkd->bqk"}> : () -> ()
    %cst_175 = arith.constant dense<0.000000e+00> : vector<1x8x8xf32>
    %394 = tpu.matmul %391, %392, %cst_175 {dimension_numbers = #tpu.dot_dimension_numbers<[2], [2], [1], [1], [0, 0, 0, 1, 1, 1], [0], [0]>} : vector<1x8x16xf32>, vector<1x8x16xf32>, vector<1x8x8xf32> -> vector<1x8x8xf32>
    "tpu.trace_stop"() : () -> ()
    %cst_176 = arith.constant 1.250000e-01 : f32
    %395 = vector.broadcast %cst_176 : f32 to vector<1x8x8xf32>
    %396 = arith.mulf %394, %395 : vector<1x8x8xf32>
    %cst_177 = arith.constant 0xFF800000 : f32
    %397 = vector.broadcast %cst_177 : f32 to vector<1x8x8xf32>
    %398 = arith.select %15, %396, %397 : vector<1x8x8xi1>, vector<1x8x8xf32>
    %cst_178 = arith.constant dense<0xFF800000> : vector<1x8xf32>
    %399 = vector.multi_reduction <maximumf>, %398, %cst_178 [2] : vector<1x8x8xf32> to vector<1x8xf32>
    %400 = vector.shape_cast %399 : vector<1x8xf32> to vector<1x8x1xf32>
    %401 = vector.broadcast %400 : vector<1x8x1xf32> to vector<1x8x8xf32>
    %402 = arith.subf %398, %401 : vector<1x8x8xf32>
    %403 = math.exp %402 : vector<1x8x8xf32>
    %cst_179 = arith.constant dense<0.000000e+00> : vector<1x8xf32>
    %404 = vector.multi_reduction <add>, %403, %cst_179 [2] : vector<1x8x8xf32> to vector<1x8xf32>
    %405 = vector.shape_cast %404 : vector<1x8xf32> to vector<1x8x1xf32>
    %406 = vector.broadcast %405 : vector<1x8x1xf32> to vector<1x8x8xf32>
    %407 = arith.divf %403, %406 : vector<1x8x8xf32>
    "tpu.trace_start"() <{level = 10 : i32, message = "bqk,bkd->bqd"}> : () -> ()
    %cst_180 = arith.constant dense<0.000000e+00> : vector<1x8x16xf32>
    %408 = tpu.matmul %407, %393, %cst_180 {dimension_numbers = #tpu.dot_dimension_numbers<[2], [1], [1], [2], [0, 0, 0, 1, 1, 2], [0], [0]>} : vector<1x8x8xf32>, vector<1x8x16xf32>, vector<1x8x16xf32> -> vector<1x8x16xf32>
    "tpu.trace_stop"() : () -> ()
    %409 = vector.extract_strided_slice %354 {offsets = [0, 0, 48], sizes = [1, 8, 16], strides = [1, 1, 1]} : vector<1x8x192xf32> to vector<1x8x16xf32>
    %410 = vector.extract_strided_slice %354 {offsets = [0, 0, 112], sizes = [1, 8, 16], strides = [1, 1, 1]} : vector<1x8x192xf32> to vector<1x8x16xf32>
    %411 = vector.extract_strided_slice %354 {offsets = [0, 0, 176], sizes = [1, 8, 16], strides = [1, 1, 1]} : vector<1x8x192xf32> to vector<1x8x16xf32>
    "tpu.trace_start"() <{level = 10 : i32, message = "bqd,bkd->bqk"}> : () -> ()
    %cst_181 = arith.constant dense<0.000000e+00> : vector<1x8x8xf32>
    %412 = tpu.matmul %409, %410, %cst_181 {dimension_numbers = #tpu.dot_dimension_numbers<[2], [2], [1], [1], [0, 0, 0, 1, 1, 1], [0], [0]>} : vector<1x8x16xf32>, vector<1x8x16xf32>, vector<1x8x8xf32> -> vector<1x8x8xf32>
    "tpu.trace_stop"() : () -> ()
    %cst_182 = arith.constant 1.250000e-01 : f32
    %413 = vector.broadcast %cst_182 : f32 to vector<1x8x8xf32>
    %414 = arith.mulf %412, %413 : vector<1x8x8xf32>
    %cst_183 = arith.constant 0xFF800000 : f32
    %415 = vector.broadcast %cst_183 : f32 to vector<1x8x8xf32>
    %416 = arith.select %15, %414, %415 : vector<1x8x8xi1>, vector<1x8x8xf32>
    %cst_184 = arith.constant dense<0xFF800000> : vector<1x8xf32>
    %417 = vector.multi_reduction <maximumf>, %416, %cst_184 [2] : vector<1x8x8xf32> to vector<1x8xf32>
    %418 = vector.shape_cast %417 : vector<1x8xf32> to vector<1x8x1xf32>
    %419 = vector.broadcast %418 : vector<1x8x1xf32> to vector<1x8x8xf32>
    %420 = arith.subf %416, %419 : vector<1x8x8xf32>
    %421 = math.exp %420 : vector<1x8x8xf32>
    %cst_185 = arith.constant dense<0.000000e+00> : vector<1x8xf32>
    %422 = vector.multi_reduction <add>, %421, %cst_185 [2] : vector<1x8x8xf32> to vector<1x8xf32>
    %423 = vector.shape_cast %422 : vector<1x8xf32> to vector<1x8x1xf32>
    %424 = vector.broadcast %423 : vector<1x8x1xf32> to vector<1x8x8xf32>
    %425 = arith.divf %421, %424 : vector<1x8x8xf32>
    "tpu.trace_start"() <{level = 10 : i32, message = "bqk,bkd->bqd"}> : () -> ()
    %cst_186 = arith.constant dense<0.000000e+00> : vector<1x8x16xf32>
    %426 = tpu.matmul %425, %411, %cst_186 {dimension_numbers = #tpu.dot_dimension_numbers<[2], [1], [1], [2], [0, 0, 0, 1, 1, 2], [0], [0]>} : vector<1x8x8xf32>, vector<1x8x16xf32>, vector<1x8x16xf32> -> vector<1x8x16xf32>
    "tpu.trace_stop"() : () -> ()
    %427 = tpu.concatenate %372, %390, %408, %426 in 2 : vector<1x8x16xf32>, vector<1x8x16xf32>, vector<1x8x16xf32>, vector<1x8x16xf32> -> vector<1x8x64xf32>
    %428 = vector.shape_cast %427 : vector<1x8x64xf32> to vector<8x64xf32>
    %c2_187 = arith.constant 2 : index
    %c0_188 = arith.constant 0 : index
    %c0_189 = arith.constant 0 : index
    %429 = vector.load %arg7[%c2_187, %c0_188, %c0_189] : memref<4x64x64xbf16, #tpu.memory_space<vmem>>, vector<1x64x64xbf16>
    %430 = vector.shape_cast %429 : vector<1x64x64xbf16> to vector<64x64xbf16>
    %431 = arith.truncf %428 : vector<8x64xf32> to vector<8x64xbf16>
    %cst_190 = arith.constant dense<0.000000e+00> : vector<8x64xf32>
    %432 = tpu.matmul %431, %430, %cst_190 {dimension_numbers = #tpu.dot_dimension_numbers<[1], [0], [0], [1], [0, 0, 1, 1], [], []>} : vector<8x64xbf16>, vector<64x64xbf16>, vector<8x64xf32> -> vector<8x64xf32>
    %433 = arith.addf %325, %432 : vector<8x64xf32>
    %c2_191 = arith.constant 2 : index
    %c0_192 = arith.constant 0 : index
    %c0_193 = arith.constant 0 : index
    %434 = vector.load %arg8[%c2_191, %c0_192, %c0_193] : memref<4x1x64xf32, #tpu.memory_space<vmem>>, vector<1x1x64xf32>
    %435 = vector.shape_cast %434 : vector<1x1x64xf32> to vector<1x64xf32>
    %436 = vector.broadcast %435 : vector<1x64xf32> to vector<8x64xf32>
    %437 = arith.addf %433, %436 : vector<8x64xf32>
    %c2_194 = arith.constant 2 : index
    %c0_195 = arith.constant 0 : index
    %c0_196 = arith.constant 0 : index
    %438 = vector.load %arg9[%c2_194, %c0_195, %c0_196] : memref<4x1x64xf32, #tpu.memory_space<vmem>>, vector<1x1x64xf32>
    %439 = vector.shape_cast %438 : vector<1x1x64xf32> to vector<1x64xf32>
    %c2_197 = arith.constant 2 : index
    %c0_198 = arith.constant 0 : index
    %c0_199 = arith.constant 0 : index
    %440 = vector.load %arg10[%c2_197, %c0_198, %c0_199] : memref<4x1x64xf32, #tpu.memory_space<vmem>>, vector<1x1x64xf32>
    %441 = vector.shape_cast %440 : vector<1x1x64xf32> to vector<1x64xf32>
    %cst_200 = arith.constant dense<0.000000e+00> : vector<8xf32>
    %442 = vector.multi_reduction <add>, %437, %cst_200 [1] : vector<8x64xf32> to vector<8xf32>
    %443 = vector.shape_cast %442 : vector<8xf32> to vector<8x1xf32>
    %cst_201 = arith.constant 6.400000e+01 : f32
    %444 = vector.broadcast %cst_201 : f32 to vector<8x1xf32>
    %445 = arith.divf %443, %444 : vector<8x1xf32>
    %446 = vector.broadcast %445 : vector<8x1xf32> to vector<8x64xf32>
    %447 = arith.subf %437, %446 : vector<8x64xf32>
    %448 = arith.mulf %447, %447 : vector<8x64xf32>
    %cst_202 = arith.constant dense<0.000000e+00> : vector<8xf32>
    %449 = vector.multi_reduction <add>, %448, %cst_202 [1] : vector<8x64xf32> to vector<8xf32>
    %450 = vector.shape_cast %449 : vector<8xf32> to vector<8x1xf32>
    %cst_203 = arith.constant 6.400000e+01 : f32
    %451 = vector.broadcast %cst_203 : f32 to vector<8x1xf32>
    %452 = arith.divf %450, %451 : vector<8x1xf32>
    %cst_204 = arith.constant 9.99999974E-6 : f32
    %453 = vector.broadcast %cst_204 : f32 to vector<8x1xf32>
    %454 = arith.addf %452, %453 : vector<8x1xf32>
    %455 = math.rsqrt %454 : vector<8x1xf32>
    %456 = vector.broadcast %455 : vector<8x1xf32> to vector<8x64xf32>
    %457 = arith.mulf %447, %456 : vector<8x64xf32>
    %458 = vector.broadcast %439 : vector<1x64xf32> to vector<8x64xf32>
    %459 = arith.mulf %457, %458 : vector<8x64xf32>
    %460 = vector.broadcast %441 : vector<1x64xf32> to vector<8x64xf32>
    %461 = arith.addf %459, %460 : vector<8x64xf32>
    %c2_205 = arith.constant 2 : index
    %c0_206 = arith.constant 0 : index
    %c0_207 = arith.constant 0 : index
    %462 = vector.load %arg11[%c2_205, %c0_206, %c0_207] : memref<4x64x256xbf16, #tpu.memory_space<vmem>>, vector<1x64x256xbf16>
    %463 = vector.shape_cast %462 : vector<1x64x256xbf16> to vector<64x256xbf16>
    %464 = arith.truncf %461 : vector<8x64xf32> to vector<8x64xbf16>
    %cst_208 = arith.constant dense<0.000000e+00> : vector<8x256xf32>
    %465 = tpu.matmul %464, %463, %cst_208 {dimension_numbers = #tpu.dot_dimension_numbers<[1], [0], [0], [1], [0, 0, 1, 1], [], []>} : vector<8x64xbf16>, vector<64x256xbf16>, vector<8x256xf32> -> vector<8x256xf32>
    %c2_209 = arith.constant 2 : index
    %c0_210 = arith.constant 0 : index
    %c0_211 = arith.constant 0 : index
    %466 = vector.load %arg12[%c2_209, %c0_210, %c0_211] : memref<4x1x256xf32, #tpu.memory_space<vmem>>, vector<1x1x256xf32>
    %467 = vector.shape_cast %466 : vector<1x1x256xf32> to vector<1x256xf32>
    %468 = vector.broadcast %467 : vector<1x256xf32> to vector<8x256xf32>
    %469 = arith.addf %465, %468 : vector<8x256xf32>
    %cst_212 = arith.constant 0.000000e+00 : f32
    %470 = vector.broadcast %cst_212 : f32 to vector<8x256xf32>
    %471 = arith.maximumf %469, %470 : vector<8x256xf32>
    %c2_213 = arith.constant 2 : index
    %c0_214 = arith.constant 0 : index
    %c0_215 = arith.constant 0 : index
    %472 = vector.load %arg13[%c2_213, %c0_214, %c0_215] : memref<4x256x64xbf16, #tpu.memory_space<vmem>>, vector<1x256x64xbf16>
    %473 = vector.shape_cast %472 : vector<1x256x64xbf16> to vector<256x64xbf16>
    %474 = arith.truncf %471 : vector<8x256xf32> to vector<8x256xbf16>
    %cst_216 = arith.constant dense<0.000000e+00> : vector<8x64xf32>
    %475 = tpu.matmul %474, %473, %cst_216 {dimension_numbers = #tpu.dot_dimension_numbers<[1], [0], [0], [1], [0, 0, 1, 1], [], []>} : vector<8x256xbf16>, vector<256x64xbf16>, vector<8x64xf32> -> vector<8x64xf32>
    %476 = arith.addf %437, %475 : vector<8x64xf32>
    %c2_217 = arith.constant 2 : index
    %c0_218 = arith.constant 0 : index
    %c0_219 = arith.constant 0 : index
    %477 = vector.load %arg14[%c2_217, %c0_218, %c0_219] : memref<4x1x64xf32, #tpu.memory_space<vmem>>, vector<1x1x64xf32>
    %478 = vector.shape_cast %477 : vector<1x1x64xf32> to vector<1x64xf32>
    %479 = vector.broadcast %478 : vector<1x64xf32> to vector<8x64xf32>
    %480 = arith.addf %476, %479 : vector<8x64xf32>
    %c3 = arith.constant 3 : index
    %c0_220 = arith.constant 0 : index
    %c0_221 = arith.constant 0 : index
    %481 = vector.load %arg4[%c3, %c0_220, %c0_221] : memref<4x1x64xf32, #tpu.memory_space<vmem>>, vector<1x1x64xf32>
    %482 = vector.shape_cast %481 : vector<1x1x64xf32> to vector<1x64xf32>
    %c3_222 = arith.constant 3 : index
    %c0_223 = arith.constant 0 : index
    %c0_224 = arith.constant 0 : index
    %483 = vector.load %arg5[%c3_222, %c0_223, %c0_224] : memref<4x1x64xf32, #tpu.memory_space<vmem>>, vector<1x1x64xf32>
    %484 = vector.shape_cast %483 : vector<1x1x64xf32> to vector<1x64xf32>
    %cst_225 = arith.constant dense<0.000000e+00> : vector<8xf32>
    %485 = vector.multi_reduction <add>, %480, %cst_225 [1] : vector<8x64xf32> to vector<8xf32>
    %486 = vector.shape_cast %485 : vector<8xf32> to vector<8x1xf32>
    %cst_226 = arith.constant 6.400000e+01 : f32
    %487 = vector.broadcast %cst_226 : f32 to vector<8x1xf32>
    %488 = arith.divf %486, %487 : vector<8x1xf32>
    %489 = vector.broadcast %488 : vector<8x1xf32> to vector<8x64xf32>
    %490 = arith.subf %480, %489 : vector<8x64xf32>
    %491 = arith.mulf %490, %490 : vector<8x64xf32>
    %cst_227 = arith.constant dense<0.000000e+00> : vector<8xf32>
    %492 = vector.multi_reduction <add>, %491, %cst_227 [1] : vector<8x64xf32> to vector<8xf32>
    %493 = vector.shape_cast %492 : vector<8xf32> to vector<8x1xf32>
    %cst_228 = arith.constant 6.400000e+01 : f32
    %494 = vector.broadcast %cst_228 : f32 to vector<8x1xf32>
    %495 = arith.divf %493, %494 : vector<8x1xf32>
    %cst_229 = arith.constant 9.99999974E-6 : f32
    %496 = vector.broadcast %cst_229 : f32 to vector<8x1xf32>
    %497 = arith.addf %495, %496 : vector<8x1xf32>
    %498 = math.rsqrt %497 : vector<8x1xf32>
    %499 = vector.broadcast %498 : vector<8x1xf32> to vector<8x64xf32>
    %500 = arith.mulf %490, %499 : vector<8x64xf32>
    %501 = vector.broadcast %482 : vector<1x64xf32> to vector<8x64xf32>
    %502 = arith.mulf %500, %501 : vector<8x64xf32>
    %503 = vector.broadcast %484 : vector<1x64xf32> to vector<8x64xf32>
    %504 = arith.addf %502, %503 : vector<8x64xf32>
    %c3_230 = arith.constant 3 : index
    %c0_231 = arith.constant 0 : index
    %c0_232 = arith.constant 0 : index
    %505 = vector.load %arg6[%c3_230, %c0_231, %c0_232] : memref<4x64x192xbf16, #tpu.memory_space<vmem>>, vector<1x64x192xbf16>
    %506 = vector.shape_cast %505 : vector<1x64x192xbf16> to vector<64x192xbf16>
    %507 = arith.truncf %504 : vector<8x64xf32> to vector<8x64xbf16>
    %cst_233 = arith.constant dense<0.000000e+00> : vector<8x192xf32>
    %508 = tpu.matmul %507, %506, %cst_233 {dimension_numbers = #tpu.dot_dimension_numbers<[1], [0], [0], [1], [0, 0, 1, 1], [], []>} : vector<8x64xbf16>, vector<64x192xbf16>, vector<8x192xf32> -> vector<8x192xf32>
    %509 = vector.shape_cast %508 : vector<8x192xf32> to vector<1x8x192xf32>
    %510 = vector.extract_strided_slice %509 {offsets = [0, 0, 0], sizes = [1, 8, 16], strides = [1, 1, 1]} : vector<1x8x192xf32> to vector<1x8x16xf32>
    %511 = vector.extract_strided_slice %509 {offsets = [0, 0, 64], sizes = [1, 8, 16], strides = [1, 1, 1]} : vector<1x8x192xf32> to vector<1x8x16xf32>
    %512 = vector.extract_strided_slice %509 {offsets = [0, 0, 128], sizes = [1, 8, 16], strides = [1, 1, 1]} : vector<1x8x192xf32> to vector<1x8x16xf32>
    "tpu.trace_start"() <{level = 10 : i32, message = "bqd,bkd->bqk"}> : () -> ()
    %cst_234 = arith.constant dense<0.000000e+00> : vector<1x8x8xf32>
    %513 = tpu.matmul %510, %511, %cst_234 {dimension_numbers = #tpu.dot_dimension_numbers<[2], [2], [1], [1], [0, 0, 0, 1, 1, 1], [0], [0]>} : vector<1x8x16xf32>, vector<1x8x16xf32>, vector<1x8x8xf32> -> vector<1x8x8xf32>
    "tpu.trace_stop"() : () -> ()
    %cst_235 = arith.constant 1.250000e-01 : f32
    %514 = vector.broadcast %cst_235 : f32 to vector<1x8x8xf32>
    %515 = arith.mulf %513, %514 : vector<1x8x8xf32>
    %cst_236 = arith.constant 0xFF800000 : f32
    %516 = vector.broadcast %cst_236 : f32 to vector<1x8x8xf32>
    %517 = arith.select %15, %515, %516 : vector<1x8x8xi1>, vector<1x8x8xf32>
    %cst_237 = arith.constant dense<0xFF800000> : vector<1x8xf32>
    %518 = vector.multi_reduction <maximumf>, %517, %cst_237 [2] : vector<1x8x8xf32> to vector<1x8xf32>
    %519 = vector.shape_cast %518 : vector<1x8xf32> to vector<1x8x1xf32>
    %520 = vector.broadcast %519 : vector<1x8x1xf32> to vector<1x8x8xf32>
    %521 = arith.subf %517, %520 : vector<1x8x8xf32>
    %522 = math.exp %521 : vector<1x8x8xf32>
    %cst_238 = arith.constant dense<0.000000e+00> : vector<1x8xf32>
    %523 = vector.multi_reduction <add>, %522, %cst_238 [2] : vector<1x8x8xf32> to vector<1x8xf32>
    %524 = vector.shape_cast %523 : vector<1x8xf32> to vector<1x8x1xf32>
    %525 = vector.broadcast %524 : vector<1x8x1xf32> to vector<1x8x8xf32>
    %526 = arith.divf %522, %525 : vector<1x8x8xf32>
    "tpu.trace_start"() <{level = 10 : i32, message = "bqk,bkd->bqd"}> : () -> ()
    %cst_239 = arith.constant dense<0.000000e+00> : vector<1x8x16xf32>
    %527 = tpu.matmul %526, %512, %cst_239 {dimension_numbers = #tpu.dot_dimension_numbers<[2], [1], [1], [2], [0, 0, 0, 1, 1, 2], [0], [0]>} : vector<1x8x8xf32>, vector<1x8x16xf32>, vector<1x8x16xf32> -> vector<1x8x16xf32>
    "tpu.trace_stop"() : () -> ()
    %528 = vector.extract_strided_slice %509 {offsets = [0, 0, 16], sizes = [1, 8, 16], strides = [1, 1, 1]} : vector<1x8x192xf32> to vector<1x8x16xf32>
    %529 = vector.extract_strided_slice %509 {offsets = [0, 0, 80], sizes = [1, 8, 16], strides = [1, 1, 1]} : vector<1x8x192xf32> to vector<1x8x16xf32>
    %530 = vector.extract_strided_slice %509 {offsets = [0, 0, 144], sizes = [1, 8, 16], strides = [1, 1, 1]} : vector<1x8x192xf32> to vector<1x8x16xf32>
    "tpu.trace_start"() <{level = 10 : i32, message = "bqd,bkd->bqk"}> : () -> ()
    %cst_240 = arith.constant dense<0.000000e+00> : vector<1x8x8xf32>
    %531 = tpu.matmul %528, %529, %cst_240 {dimension_numbers = #tpu.dot_dimension_numbers<[2], [2], [1], [1], [0, 0, 0, 1, 1, 1], [0], [0]>} : vector<1x8x16xf32>, vector<1x8x16xf32>, vector<1x8x8xf32> -> vector<1x8x8xf32>
    "tpu.trace_stop"() : () -> ()
    %cst_241 = arith.constant 1.250000e-01 : f32
    %532 = vector.broadcast %cst_241 : f32 to vector<1x8x8xf32>
    %533 = arith.mulf %531, %532 : vector<1x8x8xf32>
    %cst_242 = arith.constant 0xFF800000 : f32
    %534 = vector.broadcast %cst_242 : f32 to vector<1x8x8xf32>
    %535 = arith.select %15, %533, %534 : vector<1x8x8xi1>, vector<1x8x8xf32>
    %cst_243 = arith.constant dense<0xFF800000> : vector<1x8xf32>
    %536 = vector.multi_reduction <maximumf>, %535, %cst_243 [2] : vector<1x8x8xf32> to vector<1x8xf32>
    %537 = vector.shape_cast %536 : vector<1x8xf32> to vector<1x8x1xf32>
    %538 = vector.broadcast %537 : vector<1x8x1xf32> to vector<1x8x8xf32>
    %539 = arith.subf %535, %538 : vector<1x8x8xf32>
    %540 = math.exp %539 : vector<1x8x8xf32>
    %cst_244 = arith.constant dense<0.000000e+00> : vector<1x8xf32>
    %541 = vector.multi_reduction <add>, %540, %cst_244 [2] : vector<1x8x8xf32> to vector<1x8xf32>
    %542 = vector.shape_cast %541 : vector<1x8xf32> to vector<1x8x1xf32>
    %543 = vector.broadcast %542 : vector<1x8x1xf32> to vector<1x8x8xf32>
    %544 = arith.divf %540, %543 : vector<1x8x8xf32>
    "tpu.trace_start"() <{level = 10 : i32, message = "bqk,bkd->bqd"}> : () -> ()
    %cst_245 = arith.constant dense<0.000000e+00> : vector<1x8x16xf32>
    %545 = tpu.matmul %544, %530, %cst_245 {dimension_numbers = #tpu.dot_dimension_numbers<[2], [1], [1], [2], [0, 0, 0, 1, 1, 2], [0], [0]>} : vector<1x8x8xf32>, vector<1x8x16xf32>, vector<1x8x16xf32> -> vector<1x8x16xf32>
    "tpu.trace_stop"() : () -> ()
    %546 = vector.extract_strided_slice %509 {offsets = [0, 0, 32], sizes = [1, 8, 16], strides = [1, 1, 1]} : vector<1x8x192xf32> to vector<1x8x16xf32>
    %547 = vector.extract_strided_slice %509 {offsets = [0, 0, 96], sizes = [1, 8, 16], strides = [1, 1, 1]} : vector<1x8x192xf32> to vector<1x8x16xf32>
    %548 = vector.extract_strided_slice %509 {offsets = [0, 0, 160], sizes = [1, 8, 16], strides = [1, 1, 1]} : vector<1x8x192xf32> to vector<1x8x16xf32>
    "tpu.trace_start"() <{level = 10 : i32, message = "bqd,bkd->bqk"}> : () -> ()
    %cst_246 = arith.constant dense<0.000000e+00> : vector<1x8x8xf32>
    %549 = tpu.matmul %546, %547, %cst_246 {dimension_numbers = #tpu.dot_dimension_numbers<[2], [2], [1], [1], [0, 0, 0, 1, 1, 1], [0], [0]>} : vector<1x8x16xf32>, vector<1x8x16xf32>, vector<1x8x8xf32> -> vector<1x8x8xf32>
    "tpu.trace_stop"() : () -> ()
    %cst_247 = arith.constant 1.250000e-01 : f32
    %550 = vector.broadcast %cst_247 : f32 to vector<1x8x8xf32>
    %551 = arith.mulf %549, %550 : vector<1x8x8xf32>
    %cst_248 = arith.constant 0xFF800000 : f32
    %552 = vector.broadcast %cst_248 : f32 to vector<1x8x8xf32>
    %553 = arith.select %15, %551, %552 : vector<1x8x8xi1>, vector<1x8x8xf32>
    %cst_249 = arith.constant dense<0xFF800000> : vector<1x8xf32>
    %554 = vector.multi_reduction <maximumf>, %553, %cst_249 [2] : vector<1x8x8xf32> to vector<1x8xf32>
    %555 = vector.shape_cast %554 : vector<1x8xf32> to vector<1x8x1xf32>
    %556 = vector.broadcast %555 : vector<1x8x1xf32> to vector<1x8x8xf32>
    %557 = arith.subf %553, %556 : vector<1x8x8xf32>
    %558 = math.exp %557 : vector<1x8x8xf32>
    %cst_250 = arith.constant dense<0.000000e+00> : vector<1x8xf32>
    %559 = vector.multi_reduction <add>, %558, %cst_250 [2] : vector<1x8x8xf32> to vector<1x8xf32>
    %560 = vector.shape_cast %559 : vector<1x8xf32> to vector<1x8x1xf32>
    %561 = vector.broadcast %560 : vector<1x8x1xf32> to vector<1x8x8xf32>
    %562 = arith.divf %558, %561 : vector<1x8x8xf32>
    "tpu.trace_start"() <{level = 10 : i32, message = "bqk,bkd->bqd"}> : () -> ()
    %cst_251 = arith.constant dense<0.000000e+00> : vector<1x8x16xf32>
    %563 = tpu.matmul %562, %548, %cst_251 {dimension_numbers = #tpu.dot_dimension_numbers<[2], [1], [1], [2], [0, 0, 0, 1, 1, 2], [0], [0]>} : vector<1x8x8xf32>, vector<1x8x16xf32>, vector<1x8x16xf32> -> vector<1x8x16xf32>
    "tpu.trace_stop"() : () -> ()
    %564 = vector.extract_strided_slice %509 {offsets = [0, 0, 48], sizes = [1, 8, 16], strides = [1, 1, 1]} : vector<1x8x192xf32> to vector<1x8x16xf32>
    %565 = vector.extract_strided_slice %509 {offsets = [0, 0, 112], sizes = [1, 8, 16], strides = [1, 1, 1]} : vector<1x8x192xf32> to vector<1x8x16xf32>
    %566 = vector.extract_strided_slice %509 {offsets = [0, 0, 176], sizes = [1, 8, 16], strides = [1, 1, 1]} : vector<1x8x192xf32> to vector<1x8x16xf32>
    "tpu.trace_start"() <{level = 10 : i32, message = "bqd,bkd->bqk"}> : () -> ()
    %cst_252 = arith.constant dense<0.000000e+00> : vector<1x8x8xf32>
    %567 = tpu.matmul %564, %565, %cst_252 {dimension_numbers = #tpu.dot_dimension_numbers<[2], [2], [1], [1], [0, 0, 0, 1, 1, 1], [0], [0]>} : vector<1x8x16xf32>, vector<1x8x16xf32>, vector<1x8x8xf32> -> vector<1x8x8xf32>
    "tpu.trace_stop"() : () -> ()
    %cst_253 = arith.constant 1.250000e-01 : f32
    %568 = vector.broadcast %cst_253 : f32 to vector<1x8x8xf32>
    %569 = arith.mulf %567, %568 : vector<1x8x8xf32>
    %cst_254 = arith.constant 0xFF800000 : f32
    %570 = vector.broadcast %cst_254 : f32 to vector<1x8x8xf32>
    %571 = arith.select %15, %569, %570 : vector<1x8x8xi1>, vector<1x8x8xf32>
    %cst_255 = arith.constant dense<0xFF800000> : vector<1x8xf32>
    %572 = vector.multi_reduction <maximumf>, %571, %cst_255 [2] : vector<1x8x8xf32> to vector<1x8xf32>
    %573 = vector.shape_cast %572 : vector<1x8xf32> to vector<1x8x1xf32>
    %574 = vector.broadcast %573 : vector<1x8x1xf32> to vector<1x8x8xf32>
    %575 = arith.subf %571, %574 : vector<1x8x8xf32>
    %576 = math.exp %575 : vector<1x8x8xf32>
    %cst_256 = arith.constant dense<0.000000e+00> : vector<1x8xf32>
    %577 = vector.multi_reduction <add>, %576, %cst_256 [2] : vector<1x8x8xf32> to vector<1x8xf32>
    %578 = vector.shape_cast %577 : vector<1x8xf32> to vector<1x8x1xf32>
    %579 = vector.broadcast %578 : vector<1x8x1xf32> to vector<1x8x8xf32>
    %580 = arith.divf %576, %579 : vector<1x8x8xf32>
    "tpu.trace_start"() <{level = 10 : i32, message = "bqk,bkd->bqd"}> : () -> ()
    %cst_257 = arith.constant dense<0.000000e+00> : vector<1x8x16xf32>
    %581 = tpu.matmul %580, %566, %cst_257 {dimension_numbers = #tpu.dot_dimension_numbers<[2], [1], [1], [2], [0, 0, 0, 1, 1, 2], [0], [0]>} : vector<1x8x8xf32>, vector<1x8x16xf32>, vector<1x8x16xf32> -> vector<1x8x16xf32>
    "tpu.trace_stop"() : () -> ()
    %582 = tpu.concatenate %527, %545, %563, %581 in 2 : vector<1x8x16xf32>, vector<1x8x16xf32>, vector<1x8x16xf32>, vector<1x8x16xf32> -> vector<1x8x64xf32>
    %583 = vector.shape_cast %582 : vector<1x8x64xf32> to vector<8x64xf32>
    %c3_258 = arith.constant 3 : index
    %c0_259 = arith.constant 0 : index
    %c0_260 = arith.constant 0 : index
    %584 = vector.load %arg7[%c3_258, %c0_259, %c0_260] : memref<4x64x64xbf16, #tpu.memory_space<vmem>>, vector<1x64x64xbf16>
    %585 = vector.shape_cast %584 : vector<1x64x64xbf16> to vector<64x64xbf16>
    %586 = arith.truncf %583 : vector<8x64xf32> to vector<8x64xbf16>
    %cst_261 = arith.constant dense<0.000000e+00> : vector<8x64xf32>
    %587 = tpu.matmul %586, %585, %cst_261 {dimension_numbers = #tpu.dot_dimension_numbers<[1], [0], [0], [1], [0, 0, 1, 1], [], []>} : vector<8x64xbf16>, vector<64x64xbf16>, vector<8x64xf32> -> vector<8x64xf32>
    %588 = arith.addf %480, %587 : vector<8x64xf32>
    %c3_262 = arith.constant 3 : index
    %c0_263 = arith.constant 0 : index
    %c0_264 = arith.constant 0 : index
    %589 = vector.load %arg8[%c3_262, %c0_263, %c0_264] : memref<4x1x64xf32, #tpu.memory_space<vmem>>, vector<1x1x64xf32>
    %590 = vector.shape_cast %589 : vector<1x1x64xf32> to vector<1x64xf32>
    %591 = vector.broadcast %590 : vector<1x64xf32> to vector<8x64xf32>
    %592 = arith.addf %588, %591 : vector<8x64xf32>
    %c3_265 = arith.constant 3 : index
    %c0_266 = arith.constant 0 : index
    %c0_267 = arith.constant 0 : index
    %593 = vector.load %arg9[%c3_265, %c0_266, %c0_267] : memref<4x1x64xf32, #tpu.memory_space<vmem>>, vector<1x1x64xf32>
    %594 = vector.shape_cast %593 : vector<1x1x64xf32> to vector<1x64xf32>
    %c3_268 = arith.constant 3 : index
    %c0_269 = arith.constant 0 : index
    %c0_270 = arith.constant 0 : index
    %595 = vector.load %arg10[%c3_268, %c0_269, %c0_270] : memref<4x1x64xf32, #tpu.memory_space<vmem>>, vector<1x1x64xf32>
    %596 = vector.shape_cast %595 : vector<1x1x64xf32> to vector<1x64xf32>
    %cst_271 = arith.constant dense<0.000000e+00> : vector<8xf32>
    %597 = vector.multi_reduction <add>, %592, %cst_271 [1] : vector<8x64xf32> to vector<8xf32>
    %598 = vector.shape_cast %597 : vector<8xf32> to vector<8x1xf32>
    %cst_272 = arith.constant 6.400000e+01 : f32
    %599 = vector.broadcast %cst_272 : f32 to vector<8x1xf32>
    %600 = arith.divf %598, %599 : vector<8x1xf32>
    %601 = vector.broadcast %600 : vector<8x1xf32> to vector<8x64xf32>
    %602 = arith.subf %592, %601 : vector<8x64xf32>
    %603 = arith.mulf %602, %602 : vector<8x64xf32>
    %cst_273 = arith.constant dense<0.000000e+00> : vector<8xf32>
    %604 = vector.multi_reduction <add>, %603, %cst_273 [1] : vector<8x64xf32> to vector<8xf32>
    %605 = vector.shape_cast %604 : vector<8xf32> to vector<8x1xf32>
    %cst_274 = arith.constant 6.400000e+01 : f32
    %606 = vector.broadcast %cst_274 : f32 to vector<8x1xf32>
    %607 = arith.divf %605, %606 : vector<8x1xf32>
    %cst_275 = arith.constant 9.99999974E-6 : f32
    %608 = vector.broadcast %cst_275 : f32 to vector<8x1xf32>
    %609 = arith.addf %607, %608 : vector<8x1xf32>
    %610 = math.rsqrt %609 : vector<8x1xf32>
    %611 = vector.broadcast %610 : vector<8x1xf32> to vector<8x64xf32>
    %612 = arith.mulf %602, %611 : vector<8x64xf32>
    %613 = vector.broadcast %594 : vector<1x64xf32> to vector<8x64xf32>
    %614 = arith.mulf %612, %613 : vector<8x64xf32>
    %615 = vector.broadcast %596 : vector<1x64xf32> to vector<8x64xf32>
    %616 = arith.addf %614, %615 : vector<8x64xf32>
    %c3_276 = arith.constant 3 : index
    %c0_277 = arith.constant 0 : index
    %c0_278 = arith.constant 0 : index
    %617 = vector.load %arg11[%c3_276, %c0_277, %c0_278] : memref<4x64x256xbf16, #tpu.memory_space<vmem>>, vector<1x64x256xbf16>
    %618 = vector.shape_cast %617 : vector<1x64x256xbf16> to vector<64x256xbf16>
    %619 = arith.truncf %616 : vector<8x64xf32> to vector<8x64xbf16>
    %cst_279 = arith.constant dense<0.000000e+00> : vector<8x256xf32>
    %620 = tpu.matmul %619, %618, %cst_279 {dimension_numbers = #tpu.dot_dimension_numbers<[1], [0], [0], [1], [0, 0, 1, 1], [], []>} : vector<8x64xbf16>, vector<64x256xbf16>, vector<8x256xf32> -> vector<8x256xf32>
    %c3_280 = arith.constant 3 : index
    %c0_281 = arith.constant 0 : index
    %c0_282 = arith.constant 0 : index
    %621 = vector.load %arg12[%c3_280, %c0_281, %c0_282] : memref<4x1x256xf32, #tpu.memory_space<vmem>>, vector<1x1x256xf32>
    %622 = vector.shape_cast %621 : vector<1x1x256xf32> to vector<1x256xf32>
    %623 = vector.broadcast %622 : vector<1x256xf32> to vector<8x256xf32>
    %624 = arith.addf %620, %623 : vector<8x256xf32>
    %cst_283 = arith.constant 0.000000e+00 : f32
    %625 = vector.broadcast %cst_283 : f32 to vector<8x256xf32>
    %626 = arith.maximumf %624, %625 : vector<8x256xf32>
    %c3_284 = arith.constant 3 : index
    %c0_285 = arith.constant 0 : index
    %c0_286 = arith.constant 0 : index
    %627 = vector.load %arg13[%c3_284, %c0_285, %c0_286] : memref<4x256x64xbf16, #tpu.memory_space<vmem>>, vector<1x256x64xbf16>
    %628 = vector.shape_cast %627 : vector<1x256x64xbf16> to vector<256x64xbf16>
    %629 = arith.truncf %626 : vector<8x256xf32> to vector<8x256xbf16>
    %cst_287 = arith.constant dense<0.000000e+00> : vector<8x64xf32>
    %630 = tpu.matmul %629, %628, %cst_287 {dimension_numbers = #tpu.dot_dimension_numbers<[1], [0], [0], [1], [0, 0, 1, 1], [], []>} : vector<8x256xbf16>, vector<256x64xbf16>, vector<8x64xf32> -> vector<8x64xf32>
    %631 = arith.addf %592, %630 : vector<8x64xf32>
    %c3_288 = arith.constant 3 : index
    %c0_289 = arith.constant 0 : index
    %c0_290 = arith.constant 0 : index
    %632 = vector.load %arg14[%c3_288, %c0_289, %c0_290] : memref<4x1x64xf32, #tpu.memory_space<vmem>>, vector<1x1x64xf32>
    %633 = vector.shape_cast %632 : vector<1x1x64xf32> to vector<1x64xf32>
    %634 = vector.broadcast %633 : vector<1x64xf32> to vector<8x64xf32>
    %635 = arith.addf %631, %634 : vector<8x64xf32>
    %c0_291 = arith.constant 0 : index
    %c0_292 = arith.constant 0 : index
    %636 = vector.load %arg15[%c0_291, %c0_292] : memref<64x128xbf16, #tpu.memory_space<vmem>>, vector<64x128xbf16>
    %637 = arith.truncf %635 : vector<8x64xf32> to vector<8x64xbf16>
    %cst_293 = arith.constant dense<0.000000e+00> : vector<8x128xf32>
    %638 = tpu.matmul %637, %636, %cst_293 {dimension_numbers = #tpu.dot_dimension_numbers<[1], [0], [0], [1], [0, 0, 1, 1], [], []>} : vector<8x64xbf16>, vector<64x128xbf16>, vector<8x128xf32> -> vector<8x128xf32>
    %c0_294 = arith.constant 0 : index
    %c0_295 = arith.constant 0 : index
    %639 = vector.load %arg16[%c0_294, %c0_295] : memref<1x128xf32, #tpu.memory_space<vmem>>, vector<1x128xf32>
    %640 = vector.broadcast %639 : vector<1x128xf32> to vector<8x128xf32>
    %641 = arith.addf %638, %640 : vector<8x128xf32>
    %642 = vector.shape_cast %641 : vector<8x128xf32> to vector<1x8x128xf32>
    %c0_296 = arith.constant 0 : index
    %c0_297 = arith.constant 0 : index
    %c0_298 = arith.constant 0 : index
    %643 = vector.load %arg17[%c0_296, %c0_297, %c0_298] : memref<1x8x128xf32, #tpu.memory_space<vmem>>, vector<1x8x128xf32>
    tpu.vector_store %arg17[%c0_296, %c0_297, %c0_298], %642 {strides = array<i32>} : memref<1x8x128xf32, #tpu.memory_space<vmem>>, vector<1x8x128xf32>,
    return
  }
  func.func @transform_0(%arg0: i32) -> (i32, i32, i32) {
    %c0_i32 = arith.constant 0 : i32
    %c0_i32_0 = arith.constant 0 : i32
    %c0_i32_1 = arith.constant 0 : i32
    return %arg0, %c0_i32, %c0_i32_0 : i32, i32, i32
  }
  func.func @transform_1(%arg0: i32) -> (i32, i32) {
    %c0_i32 = arith.constant 0 : i32
    %c0_i32_0 = arith.constant 0 : i32
    %c0_i32_1 = arith.constant 0 : i32
    return %c0_i32, %c0_i32_0 : i32, i32
  }
  func.func @transform_2(%arg0: i32) -> (i32, i32) {
    %c0_i32 = arith.constant 0 : i32
    %c0_i32_0 = arith.constant 0 : i32
    %c0_i32_1 = arith.constant 0 : i32
    return %c0_i32, %c0_i32_0 : i32, i32
  }
  func.func @transform_3(%arg0: i32) -> (i32, i32, i32) {
    %c0_i32 = arith.constant 0 : i32
    %c0_i32_0 = arith.constant 0 : i32
    %c0_i32_1 = arith.constant 0 : i32
    %c0_i32_2 = arith.constant 0 : i32
    return %c0_i32, %c0_i32_0, %c0_i32_1 : i32, i32, i32
  }
  func.func @transform_4(%arg0: i32) -> (i32, i32, i32) {
    %c0_i32 = arith.constant 0 : i32
    %c0_i32_0 = arith.constant 0 : i32
    %c0_i32_1 = arith.constant 0 : i32
    %c0_i32_2 = arith.constant 0 : i32
    return %c0_i32, %c0_i32_0, %c0_i32_1 : i32, i32, i32
  }
  func.func @transform_5(%arg0: i32) -> (i32, i32, i32) {
    %c0_i32 = arith.constant 0 : i32
    %c0_i32_0 = arith.constant 0 : i32
    %c0_i32_1 = arith.constant 0 : i32
    %c0_i32_2 = arith.constant 0 : i32
    return %c0_i32, %c0_i32_0, %c0_i32_1 : i32, i32, i32
  }
  func.func @transform_6(%arg0: i32) -> (i32, i32, i32) {
    %c0_i32 = arith.constant 0 : i32
    %c0_i32_0 = arith.constant 0 : i32
    %c0_i32_1 = arith.constant 0 : i32
    %c0_i32_2 = arith.constant 0 : i32
    return %c0_i32, %c0_i32_0, %c0_i32_1 : i32, i32, i32
  }
  func.func @transform_7(%arg0: i32) -> (i32, i32, i32) {
    %c0_i32 = arith.constant 0 : i32
    %c0_i32_0 = arith.constant 0 : i32
    %c0_i32_1 = arith.constant 0 : i32
    %c0_i32_2 = arith.constant 0 : i32
    return %c0_i32, %c0_i32_0, %c0_i32_1 : i32, i32, i32
  }
  func.func @transform_8(%arg0: i32) -> (i32, i32, i32) {
    %c0_i32 = arith.constant 0 : i32
    %c0_i32_0 = arith.constant 0 : i32
    %c0_i32_1 = arith.constant 0 : i32
    %c0_i32_2 = arith.constant 0 : i32
    return %c0_i32, %c0_i32_0, %c0_i32_1 : i32, i32, i32
  }
  func.func @transform_9(%arg0: i32) -> (i32, i32, i32) {
    %c0_i32 = arith.constant 0 : i32
    %c0_i32_0 = arith.constant 0 : i32
    %c0_i32_1 = arith.constant 0 : i32
    %c0_i32_2 = arith.constant 0 : i32
    return %c0_i32, %c0_i32_0, %c0_i32_1 : i32, i32, i32
  }
  func.func @transform_10(%arg0: i32) -> (i32, i32, i32) {
    %c0_i32 = arith.constant 0 : i32
    %c0_i32_0 = arith.constant 0 : i32
    %c0_i32_1 = arith.constant 0 : i32
    %c0_i32_2 = arith.constant 0 : i32
    return %c0_i32, %c0_i32_0, %c0_i32_1 : i32, i32, i32
  }
  func.func @transform_11(%arg0: i32) -> (i32, i32, i32) {
    %c0_i32 = arith.constant 0 : i32
    %c0_i32_0 = arith.constant 0 : i32
    %c0_i32_1 = arith.constant 0 : i32
    %c0_i32_2 = arith.constant 0 : i32
    return %c0_i32, %c0_i32_0, %c0_i32_1 : i32, i32, i32
  }
  func.func @transform_12(%arg0: i32) -> (i32, i32, i32) {
    %c0_i32 = arith.constant 0 : i32
    %c0_i32_0 = arith.constant 0 : i32
    %c0_i32_1 = arith.constant 0 : i32
    %c0_i32_2 = arith.constant 0 : i32
    return %c0_i32, %c0_i32_0, %c0_i32_1 : i32, i32, i32
  }
  func.func @transform_13(%arg0: i32) -> (i32, i32, i32) {
    %c0_i32 = arith.constant 0 : i32
    %c0_i32_0 = arith.constant 0 : i32
    %c0_i32_1 = arith.constant 0 : i32
    %c0_i32_2 = arith.constant 0 : i32
    return %c0_i32, %c0_i32_0, %c0_i32_1 : i32, i32, i32
  }
  func.func @transform_14(%arg0: i32) -> (i32, i32) {
    %c0_i32 = arith.constant 0 : i32
    %c0_i32_0 = arith.constant 0 : i32
    %c0_i32_1 = arith.constant 0 : i32
    return %c0_i32, %c0_i32_0 : i32, i32
  }
  func.func @transform_15(%arg0: i32) -> (i32, i32) {
    %c0_i32 = arith.constant 0 : i32
    %c0_i32_0 = arith.constant 0 : i32
    %c0_i32_1 = arith.constant 0 : i32
    return %c0_i32, %c0_i32_0 : i32, i32
  }
  func.func @transform_16(%arg0: i32) -> (i32, i32, i32) {
    %c0_i32 = arith.constant 0 : i32
    %c0_i32_0 = arith.constant 0 : i32
    %c0_i32_1 = arith.constant 0 : i32
    return %arg0, %c0_i32, %c0_i32_0 : i32, i32, i32
  }
}

</mosaic_0001>

<bundles_post_ra>
// kernel: tpu_custom_call.1
= control target key start
LH: loop header
LB: loop body
LE: loop exit
PB: predicated region body
PF: predicated region fallthrough
CT: control target
= control target key end

     0   :  { %s8111_s0 = inlined_call_operand.vmem [shape: s32[2,8,1], index: 0, kind: input, shape index: {}]   ;;  %s8112_s1 = inlined_call_operand.vmem [shape: f32[8,64], index: 1, kind: input, shape index: {}]   ;;  %s8113_s2 = inlined_call_operand.vmem [shape: bf16[128,64], index: 2, kind: input, shape index: {}]   ;;  %s8114_s3 = inlined_call_operand.vmem [shape: f32[4,1,64], index: 3, kind: input, shape index: {}]   ;;  %s8115_s4 = inlined_call_operand.vmem [shape: f32[4,1,64], index: 4, kind: input, shape index: {}]   ;;  %s8116_s5 = inlined_call_operand.vmem [shape: bf16[4,64,192], index: 5, kind: input, shape index: {}]   ;;  %s8117_s6 = inlined_call_operand.vmem [shape: bf16[4,64,64], index: 6, kind: input, shape index: {}]   ;;  %s8118_s7 = inlined_call_operand.vmem [shape: f32[4,1,64], index: 7, kind: input, shape index: {}]   ;;  %s8119_s8 = inlined_call_operand.vmem [shape: f32[4,1,64], index: 8, kind: input, shape index: {}]   ;;  %s8120_s9 = inlined_call_operand.vmem [shape: f32[4,1,64], index: 9, kind: input, shape index: {}]   ;;  %s8121_s10 = inlined_call_operand.vmem [shape: bf16[4,64,256], index: 10, kind: input, shape index: {}]   ;;  %s8122_s11 = inlined_call_operand.vmem [shape: f32[4,1,256], index: 11, kind: input, shape index: {}]   ;;  %s8123_s12 = inlined_call_operand.vmem [shape: bf16[4,256,64], index: 12, kind: input, shape index: {}]   ;;  %s8124_s13 = inlined_call_operand.vmem [shape: f32[4,1,64], index: 13, kind: input, shape index: {}]   ;;  %s8125_s14 = inlined_call_operand.vmem [shape: bf16[64,128], index: 14, kind: input, shape index: {}]   ;;  %s8126_s15 = inlined_call_operand.vmem [shape: f32[1,128], index: 15, kind: input, shape index: {}]   ;;  %s8127_s16 = inlined_call_operand.hbm [shape: f32[2,8,128], index: 16, kind: output, shape index: {}]  }
   0x1   :  { %8151 = sst [smem:[#allocation12_spill]] %s8111_s0 }
   0x2   :  { %8152 = sst [smem:[#allocation13_spill]] %s8112_s1 }
   0x3   :  { %8153 = sst [smem:[#allocation14_spill]] %s8113_s2 }
   0x4   :  { %8154 = sst [smem:[#allocation15_spill]] %s8126_s15 }
   0x5   :  { %8155 = sst [smem:[#allocation16_spill]] %s8127_s16 }
   0x6   :  { %21 = vsyncpa [#allocation3], 0 }
   0x7   :  { %23 = vsyncpa [#allocation3 + $0x1], 0  ;;  %s6990_s21 = smov 0   ;;  %s6992_s22 = smov 0  }
   0x8   :  { %s6994_s23 = smov 0   ;;  %s6996_s24 = smov 0  }
   0x9 LB: > { %8156 = sst [smem:[#allocation5_spill]] %s6879_s21  ;;  %s7011_s25 = sadd.s32 4294967295, %s6891_s24   ;;  %s6891_s24 = sphi %s6996_s24, %s8183_s24   ;;  %s6887_s23 = sphi %s6994_s23, %s8185_s23   ;;  %s6883_s22 = sphi %s6992_s22, %s8187_s22   ;;  %s6879_s21 = sphi %s6990_s21, %s8186_s21  }
   0xa   : > { %8157 = sst [smem:[#allocation6_spill]] %s6887_s23  ;;  %s5640_s26 = sadd.s32 4294967294, %s6891_s24  }
   0xb   : > { %8158 = sst [smem:[#allocation7_spill]] %s6891_s24  ;;  %s7015_s27 = sadd.s32 1, %s6891_s24  }
   0xc   : > { %8159 = sst [smem:[#allocation8_spill]] %s7015_s27  ;;  %s377_s28 = sadd.s32 1, %s6887_s23 }
   0xd   : > { %s374_s29 = ssub.s32 %s6891_s24, %s7015_s27  ;;  %p387_p0 = scmp.ne.s32.totalorder %s6887_s23, %s6883_s22 }
   0xe   : > { %p375_p1 = scmp.eq.s32.totalorder %s374_s29, 0  ;;  %p388_p2 = scmp.eq.s32.totalorder %s7011_s25, 1 }
   0xf   : > { %p393_p3 = scmp.ne.s32.totalorder %s6883_s22, %s6879_s21  ;;  %p394_p4 = scmp.eq.s32.totalorder %s5640_s26, 1 }
  0x10   : > { %s7026_s30 = scalar_select %p375_p1, %s6887_s23, %s377_s28  }
  0x11   : > { %p7028_p5 = por %p388_p2, %p387_p0  ;;  %p7032_p6 = por %p394_p4, %p393_p3 }
  0x12   : > { %8160 = sst [smem:[#allocation9_spill]] %s7026_s30  ;;  %p5643_p7 = scmp.ge.s32.totalorder %s6891_s24, 1 }
  0x13   : > { %s8161_s0 = scalar_select %p7028_p5, 1, 0 }
  0x14   : > { %s8163_s17 = scalar_select %p7032_p6, 1, 0 }
  0x15   : > { %8162 = sst [smem:[#allocation10_spill]] %s8161_s0  ;;  %p464_p8 = scmp.lt.s32.totalorder %s6891_s24, 3 }
  0x16   : > { %8164 = sst [smem:[#allocation11_spill]] %s8163_s17 }
  0x17   : > { %p465_p9 = pnand %p5643_p7, %p464_p8 }
  0x18   : > { %p513_p10 = scmp.lt.s32.totalorder (!%p465_p9), %s7011_s25, 1  ;;  %s8165_s2 = sld [smem:[#allocation14_spill]] (!%p465_p9)  ;;  %v6893_v1 = vmov (!%p465_p9), 0   ;;  %v6894_v2 = vmov (!%p465_p9), 0.0   ;;  %vm6895_vm0 = vmmov (!%p465_p9), 0   ;;  %v519_v11 = vlaneseq (!%p465_p9) }
  0x19   : > { %468 = sbr.rel (%p465_p9) target bundleno = 13789 (0x35dd), region = 84  ;;  %6560 = vset.pattern.permute.xlu0 (!%p465_p9), %v6893_v1  ;;  %6270 = vmatprep.subr.bf16.mxu0 (!%p465_p9), %v6894_v2  ;;  %s8166_s19 = sld [smem:[#allocation12_spill]] (!%p465_p9)  ;;  %v6896_v14 = vmov (!%p465_p9), 1.0|1.0   ;;  %vm638_vm3 = vcmask (!%p465_p9), 523264   ;;  %vm763_vm4 = vcmask (!%p465_p9), 130048  }
  0x1a   : > { %751 = vmatprep.mubr.bf16.mxu1 (!%p465_p9), %v6893_v1  ;;  %6286 = vmatprep.mubr.msk.bf16.mxu0 (!%p465_p9), %vm6895_vm0, %v6894_v2  ;;  %v7081_v12 = vand.u32 (!%p465_p9), 127, %v519_v11  ;;  %s8167_s1 = sld [smem:[#allocation13_spill]] (!%p465_p9)  ;;  %v6569_v27 = vld [vmem:[%s8116_s5 + $0x4] ss:$8 sps:$4 sm:$0xff] (!%p465_p9)   ;;  %v6571_v28 = vld [vmem:[%s8116_s5] ss:$8 sps:$4 sm:$0xff] (!%p465_p9)  }
  0x1b   : > { %v6572_v29 = vld [vmem:[%s8116_s5 + $0x14] ss:$8 sps:$4 sm:$0xff] (!%p465_p9)   ;;  %719 = vmatprep.subr.bf16.mxu1 (!%p465_p9), %v6569_v27  ;;  %v6574_v30 = vld [vmem:[%s8116_s5 + $0x10] ss:$8 sps:$4 sm:$0xff] (!%p465_p9)   ;;  %v6575_v31 = vld [vmem:[%s8116_s5 + $0x24] ss:$8 sps:$4 sm:$0xff] (!%p465_p9)  }
  0x1c   : > { %720 = vmatpush1.bf16.msra.mxu1 (!%p465_p9), %v6571_v28  ;;  %v6577_v32 = vld [vmem:[%s8116_s5 + $0x20] ss:$8 sps:$4 sm:$0xff] (!%p465_p9)   ;;  %v6578_v33 = vld [vmem:[%s8116_s5 + $0x34] ss:$8 sps:$4 sm:$0xff] (!%p465_p9)   ;;  %v6580_v34 = vld [vmem:[%s8116_s5 + $0x30] ss:$8 sps:$4 sm:$0xff] (!%p465_p9)  }
  0x1d   : > { %721 = vmatprep.subr.bf16.mxu1 (!%p465_p9), %v6572_v29  ;;  %v5657_v39 = vld [vmem:[%s8114_s3] ss:$0 sm:$0xff] (!%p465_p9)  ;;  %v7144_v50 = vshrl.u32 (!%p465_p9), %v519_v11, 7  ;;  %vm840_vm6 = vcmask (!%p465_p9), 64512   ;;  %s8142_s30 = smov (!%p465_p9), 112   ;;  %s8140_s27 = smov (!%p465_p9), 48  }
  0x1e   : > { %v6561_v0 = vld [vmem:[%s8165_s2] sm:$0xff] (!%p465_p9)   ;;  %v6562_v3 = vld [vmem:[%s8165_s2 + $0x8] sm:$0xff] (!%p465_p9)   ;;  %v6563_v5 = vld [vmem:[%s8165_s2 + $0x10] sm:$0xff] (!%p465_p9)   ;;  %s8134_s17 = smov (!%p465_p9), 96   ;;  %s8136_s18 = smov (!%p465_p9), 16   ;;  %vm1440_vm7 = vcmask (!%p465_p9), 261120  }
  0x1f   : > { %6271 = vmatpush3.bf16.msra.mxu0 (!%p465_p9), %v6561_v0  ;;  %v6564_v6 = vld [vmem:[%s8165_s2 + $0x18] sm:$0xff] (!%p465_p9)   ;;  %v6565_v7 = vld [vmem:[%s8165_s2 + $0x20] sm:$0xff] (!%p465_p9)   ;;  %v6566_v8 = vld [vmem:[%s8165_s2 + $0x28] sm:$0xff] (!%p465_p9)   ;;  %vm7148_vm5 = vcmp.le.s32.totalorder (!%p465_p9), %v7081_v12, %v7144_v50  ;;  %vm1442_vm8 = vcmask (!%p465_p9), 392192   ;;  %s8176_s26 = smov (!%p465_p9), 80   ;;  %s510_s28 = sand.u32 (!%p465_p9), 1, %s6883_s22  }
  0x20   : > { %s514_s20 = scalar_select %p513_p10, %s7011_s25, 1  ;;  %6272 = vmatprep.subr.bf16.mxu0 %v6894_v2  ;;  %v6567_v9 = vld [vmem:[%s8165_s2 + $0x30] sm:$0xff]   ;;  %v6568_v10 = vld [vmem:[%s8165_s2 + $0x38] sm:$0xff]   ;;  %v544_v15 = vld [vmem:[%s8167_s1] sm:$0xff]  ;;  %722 = vmatpush1.bf16.msra.mxu1 %v6574_v30 }
  0x21   : > { %723 = vmatprep.subr.bf16.mxu1 %v6575_v31  ;;  %v5658_v41 = vld [vmem:[%s8115_s4] ss:$0 sm:$0xff]  ;;  %s5644_s1 = sshll.u32 %s510_s28, 3  ;;  %s6081_s2 = sshll.u32 %s7011_s25, 7 }
  0x22   : > { %s5645_s29 = sshll.u32 %s514_s20, 3  ;;  %s8138_s20 = smov 32  }
  0x23   : > { %s516_s23 = scalar_lea.vmem %s8166_s19, %s5645_s29  ;;  %6273 = vmatpush3.bf16.msra.mxu0 %v6562_v3  ;;  %s8132_s29 = smov 80  }
  0x24   : > { %v518_v4 = vld [vmem:[%s516_s23] sm:$0xff]  ;;  %6274 = vmatprep.subr.bf16.mxu0 %v6894_v2  ;;  %724 = vmatpush1.bf16.msra.mxu1 %v6577_v32  ;;  %s8144_s23 = smov 64   ;;  %s512_s15 = scalar_lea.vmem [#allocation2], %s5644_s1 }
  0x25   : > { %522 = vperm.xlu0 %6560, %v518_v4   ;;  %725 = vmatprep.subr.bf16.mxu1 %v6578_v33  ;;  %s5581_s0 = sshll.u32 %s512_s15, 4  ;;  %s8071_s0 = int_to_ptr.vmem [resolvable:$true] %s5581_s0 }
  0x26   : > { %s6829_s25 = scalar_lea.vmem %s8071_s0, 128 }
  0x27   : > { %6275 = vmatpush3.bf16.msra.mxu0 %v6563_v5  ;;  %p6830_p11 = scmp.ne.s32.totalorder %s8071_s0, %s6829_s25 }
  0x28   : > { %6276 = vmatprep.subr.bf16.mxu0 %v6894_v2  ;;  %726 = vmatpush1.bf16.msra.mxu1 %v6580_v34 }
  0x29   : > { %6290 = vmatprep.subr.mxu1 %v6894_v2  ;;  %p6831_p12 = pnand %p6830_p11, %p7028_p5 }
  0x2b   : > { %6277 = vmatpush3.bf16.msra.mxu0 %v6564_v6  ;;  %p6832_p13 = pneg %p6831_p12 }
  0x2c   : > { %6278 = vmatprep.subr.bf16.mxu0 %v6894_v2 }
  0x2f   : > { %6279 = vmatpush3.bf16.msra.mxu0 %v6565_v7 }
  0x30   : > { %6280 = vmatprep.subr.bf16.mxu0 %v6894_v2 }
  0x33   : > { %6281 = vmatpush3.bf16.msra.mxu0 %v6566_v8 }
  0x34   : > { %6282 = vmatprep.subr.bf16.mxu0 %v6894_v2 }
  0x37   : > { %6283 = vmatpush3.bf16.msra.mxu0 %v6567_v9 }
  0x38   : > { %6284 = vmatprep.subr.bf16.mxu0 %v6894_v2 }
  0x3b   : > { %6285 = vmatpush3.bf16.msra.mxu0 %v6568_v10 }
  0x3c   : > { %6330 = vmatprep.subr.bf16.mxu0 %v6894_v2 }
  0xa4   : > { %v523_v13 = vpop.permute.xlu0 %522 }
  0xa5   : > { %vm524_vm1 = vcmp.eq.s32.totalorder %v523_v13, %v7081_v12 }
  0xa6   : > { %vm5655_vm2 = vmpackc.low %vm524_vm1, %vm524_vm1 }
  0xa7   : > { %6287 = vmatmul.mubr.msk.bf16.vlgmr.msra.gmra.mrb[0].mxu0 %vm5655_vm2, %v6896_v14 }
  0xa8   : > { %6338 = vmatprep.mubr.msk.bf16.mxu0 %vm6895_vm0, %v6894_v2 }
 0x17a   : > { %v627_v16 = vpop.f32.mrb[0].mxu0 }
 0x17b   : > { %v7089_v17 = vadd.f32 %v627_v16, %v544_v15  ;;  %v6288_v18 = vpop.f32.mrb[1].mxu0 }
 0x17c   : > { %v630_v19 = vpop.f32.mrb[2].mxu0 }
 0x17d   : > { %v6289_v20 = vpop.f32.mrb[3].mxu0  ;;  %v639_v21 = vsel %vm638_vm3, %v7089_v17, 0.0 }
 0x17e   : > { %640 = vadd.xlane.f32.xlu0 %v639_v21 }
 0x20b   : > { %v641_v22 = vpop.xlane.xlu0 %640 }
 0x20c   : > { %v643_v23 = vmul.f32 0.015625, %v641_v22 }
 0x20e   : > { %v644_v24 = vsub.f32 %v7089_v17, %v643_v23 }
 0x210   : > { %v645_v25 = vmul.f32 %v644_v24, %v644_v24 }
 0x212   : > { %v646_v26 = vsel %vm638_vm3, %v645_v25, 0.0 }
 0x213   : > { %647 = vadd.xlane.f32.xlu1 %v646_v26 }
 0x2a0   : > { %v648_v35 = vpop.xlane.xlu1 %647 }
 0x2a1   : > { %v649_v36 = vmul.f32 0.015625, %v648_v35 }
 0x2a3   : > { %v650_v37 = vadd.f32 1e-05, %v649_v36 }
 0x2a5   : > { %6749 = vrsqrt.f32 %v650_v37 }
 0x2af   : > { %v6750_v38 = vpop.eup %6749 }
 0x2b0   : > { %v652_v40 = vmul.f32 %v6750_v38, %v644_v24 }
 0x2b2   : > { %v659_v42 = vmul.f32 %v5657_v39, %v652_v40 }
 0x2b4   : > { %v666_v43 = vadd.f32 %v5658_v41, %v659_v42 }
 0x2b6   : > { %v675_v44 = vpack.c.bf16 %v666_v43, %v666_v43 }
 0x2b8   : > { %5667 = vmatmul.mubr.msk.bf16.vlgmr.msra.gmra.mrb[0].mxu1 %vm638_vm3, %v675_v44 }
 0x2b9   : > { %6292 = vmatprep.mubr.msk.f32.mxu1 %vm6895_vm0, %v6894_v2 }
 0x38b   : > { %v7129_v45 = vpop.f32.mrb[0].mxu1 }
 0x38c   : > { %761 = vrot.lane.b32.xlu1 %v7129_v45, %s8144_s23  ;;  %v7133_v46 = vpop.f32.mrb[1].mxu1  ;;  %s8172_s23 = smov 32  }
 0x38d   : > { %v757_v47 = vpop.f32.mrb[2].mxu1 }
 0x38e   : > { %v758_v48 = vpop.f32.mrb[3].mxu1 }
 0x3fe   : > { %v762_v49 = vpop.permute.xlu1 %761 }
 0x3ff   : > { %6291 = vmatpush3.xpose.msk.msra.mxu1 %vm763_vm4, %v762_v49 }
 0x400   : > { %6295 = vmatprep.subr.mxu1 %v6894_v2 }
 0x402   : > { %6293 = vmatmul.mubr.msk.f32.vlgmr.msra.gmra.mrb[4].mxu1 %vm763_vm4, %v7129_v45 }
 0x403   : > { %6296 = vmatpush3.msra.mxu1 %v7133_v46  ;;  %6297 = vmatprep.mubr.msk.f32.mxu1 %vm6895_vm0, %v6894_v2 }
 0x404   : > { %6300 = vmatprep.subr.mxu1 %v6894_v2 }
 0x4d5   : > { %v834_v52 = vpop.f32.mrb[4].mxu1 }
 0x4d6   : > { %v838_v53 = vmul.f32 0.125, %v834_v52  ;;  %v6294_v54 = vpop.f32.mrb[5].mxu1 }
 0x4d8   : > { %v839_v55 = vsel %vm7148_vm5, %v838_v53, -inf }
 0x4d9   : > { %v841_v56 = vsel %vm840_vm6, %v839_v55, -inf }
 0x4da   : > { %842 = vmax.xlane.f32.xlu1 %v841_v56 }
 0x4eb   : > { %925 = vrot.lane.b32.xlu1 %v7129_v45, %s8142_s30 }
 0x567   : > { %v843_v57 = vpop.xlane.xlu1 %842 }
 0x568   : > { %v844_v58 = vsub.f32 %v839_v55, %v843_v57 }
 0x56a   : > { %v845_v59 = vmul.f32 1.442695, %v844_v58 }
 0x56b   : > { %v926_v4 = vpop.permute.xlu1 %925 }
 0x56c   : > { %6751 = vpow2.f32 %v845_v59 }
 0x576   : > { %v6752_v60 = vpop.eup %6751 }
 0x577   : > { %v847_v61 = vsel %vm840_vm6, %v6752_v60, 0.0 }
 0x578   : > { %848 = vadd.xlane.f32.xlu0 %v847_v61  ;;  %v6582_v61 = vld [vmem:[%s8117_s6 + $0x8] sm:$0xff]  }
 0x58e   : > { %927 = vrot.lane.b32.xlu0 %v7129_v45, %s8140_s27 }
 0x605   : > { %v849_v62 = vpop.xlane.xlu0 %848 }
 0x606   : > { %6753 = vrcp.f32 %v849_v62  ;;  %v6583_v62 = vld [vmem:[%s8117_s6 + $0x10] sm:$0xff]  }
 0x609   : > { %v928_v3 = vpop.permute.xlu0 %927 }
 0x610   : > { %v6754_v63 = vpop.eup %6753 }
 0x611   : > { %v851_v0 = vmul.f32 %v6754_v63, %v6752_v60  ;;  %v6584_v63 = vld [vmem:[%s8117_s6 + $0x18] sm:$0xff]  }
 0x613   : > { %6298 = vmatmul.mubr.msk.f32.vlgmr.msra.gmra.mrb[6].mxu1 %vm840_vm6, %v851_v0 }
 0x614   : > { %6301 = vmatpush3.xpose.msk.msra.mxu1 %vm763_vm4, %v928_v3  ;;  %6302 = vmatprep.mubr.msk.f32.mxu1 %vm6895_vm0, %v6894_v2 }
 0x615   : > { %6305 = vmatprep.subr.mxu1 %v6894_v2 }
 0x617   : > { %6303 = vmatmul.mubr.msk.f32.vlgmr.msra.gmra.mrb[8].mxu1 %vm763_vm4, %v926_v4 }
 0x618   : > { %6307 = vmatprep.mubr.msk.f32.mxu1 %vm6895_vm0, %v6894_v2 }
 0x6e6   : > { %v7168_v5 = vpop.f32.mrb[6].mxu1 }
 0x6e7   : > { %v6299_v6 = vpop.f32.mrb[7].mxu1 }
 0x6ea   : > { %v999_v7 = vpop.f32.mrb[8].mxu1 }
 0x6eb   : > { %v1003_v8 = vmul.f32 0.125, %v999_v7  ;;  %v6304_v9 = vpop.f32.mrb[9].mxu1 }
 0x6ed   : > { %v1004_v10 = vsel %vm7148_vm5, %v1003_v8, -inf }
 0x6ee   : > { %v1005_v11 = vsel %vm840_vm6, %v1004_v10, -inf }
 0x6ef   : > { %1006 = vmax.xlane.f32.xlu0 %v1005_v11 }
 0x705   : > { %1017 = vrot.lane.b32.xlu0 %v7133_v46, %s8142_s30  ;;  %s8173_s30 = smov 16  }
 0x709   : > { %1093 = vrot.lane.b32.xlu0 %v7129_v45, %s8134_s17 }
 0x77c   : > { %v1007_v12 = vpop.xlane.xlu0 %1006 }
 0x77d   : > { %v1008_v13 = vsub.f32 %v1004_v10, %v1007_v12 }
 0x77f   : > { %v1009_v14 = vmul.f32 1.442695, %v1008_v13  ;;  %v5685_v13 = vld [vmem:[%s8118_s7] ss:$0 sm:$0xff] }
 0x780   : > { %v1018_v15 = vpop.permute.xlu0 %1017 }
 0x781   : > { %6755 = vpow2.f32 %v1009_v14  ;;  %6306 = vmatpush3.msra.mxu1 %v1018_v15 }
 0x782   : > { %6310 = vmatprep.subr.mxu1 %v6894_v2 }
 0x784   : > { %v1094_v23 = vpop.permute.xlu0 %1093 }
 0x78b   : > { %v6756_v16 = vpop.eup %6755 }
 0x78c   : > { %v1011_v18 = vsel %vm840_vm6, %v6756_v16, 0.0 }
 0x78d   : > { %1012 = vadd.xlane.f32.xlu1 %v1011_v18 }
 0x79e   : > { %1095 = vrot.lane.b32.xlu1 %v7129_v45, %s8138_s20 }
 0x81a   : > { %v1013_v19 = vpop.xlane.xlu1 %1012 }
 0x81b   : > { %6757 = vrcp.f32 %v1013_v19 }
 0x81e   : > { %v1096_v22 = vpop.permute.xlu1 %1095 }
 0x825   : > { %v6758_v20 = vpop.eup %6757 }
 0x826   : > { %v1015_v21 = vmul.f32 %v6758_v20, %v6756_v16 }
 0x828   : > { %6308 = vmatmul.mubr.msk.f32.vlgmr.msra.gmra.mrb[10].mxu1 %vm840_vm6, %v1015_v21 }
 0x829   : > { %6311 = vmatpush3.xpose.msk.msra.mxu1 %vm763_vm4, %v1096_v22  ;;  %6312 = vmatprep.mubr.msk.f32.mxu1 %vm6895_vm0, %v6894_v2 }
 0x82a   : > { %6315 = vmatprep.subr.mxu1 %v6894_v2 }
 0x82c   : > { %6313 = vmatmul.mubr.msk.f32.vlgmr.msra.gmra.mrb[12].mxu1 %vm763_vm4, %v1094_v23 }
 0x82d   : > { %6317 = vmatprep.mubr.msk.f32.mxu1 %vm6895_vm0, %v6894_v2 }
 0x8fb   : > { %v1089_v24 = vpop.f32.mrb[10].mxu1 }
 0x8fc   : > { %v6309_v25 = vpop.f32.mrb[11].mxu1 }
 0x8fd   : > { %v6585_v25 = vld [vmem:[%s8121_s10] ss:$8 sps:$4 sm:$0xff]  }
 0x8ff   : > { %v1167_v26 = vpop.f32.mrb[12].mxu1 }
 0x900   : > { %v1171_v27 = vmul.f32 0.125, %v1167_v26  ;;  %v6314_v28 = vpop.f32.mrb[13].mxu1  ;;  %v6590_v26 = vld [vmem:[%s8121_s10 + $0x14] ss:$8 sps:$4 sm:$0xff]  }
 0x901   : > { %v6593_v28 = vld [vmem:[%s8121_s10 + $0x24] ss:$8 sps:$4 sm:$0xff]  }
 0x902   : > { %v1172_v29 = vsel %vm7148_vm5, %v1171_v27, -inf  ;;  %v6588_v27 = vld [vmem:[%s8121_s10 + $0x10] ss:$8 sps:$4 sm:$0xff]  }
 0x903   : > { %v1173_v30 = vsel %vm840_vm6, %v1172_v29, -inf }
 0x904   : > { %1174 = vmax.xlane.f32.xlu0 %v1173_v30  ;;  %v6596_v30 = vld [vmem:[%s8121_s10 + $0x34] ss:$8 sps:$4 sm:$0xff]  }
 0x91a   : > { %1184 = vrot.lane.b32.xlu0 %v7133_v46, %s8134_s17 }
 0x91e   : > { %1260 = vrot.lane.b32.xlu0 %v7129_v45, %s8132_s29 }
 0x991   : > { %v1175_v31 = vpop.xlane.xlu0 %1174 }
 0x992   : > { %v1176_v32 = vsub.f32 %v1172_v29, %v1175_v31  ;;  %v6591_v29 = vld [vmem:[%s8121_s10 + $0x20] ss:$8 sps:$4 sm:$0xff]   ;;  %v6594_v31 = vld [vmem:[%s8121_s10 + $0x30] ss:$8 sps:$4 sm:$0xff]  }
 0x994   : > { %v1177_v33 = vmul.f32 1.442695, %v1176_v32  ;;  %v6597_v32 = vld [vmem:[%s8123_s12 + $0x40] sm:$0xff]  }
 0x995   : > { %v1185_v34 = vpop.permute.xlu0 %1184 }
 0x996   : > { %6759 = vpow2.f32 %v1177_v33  ;;  %6316 = vmatpush3.msra.mxu1 %v1185_v34  ;;  %v6598_v33 = vld [vmem:[%s8123_s12] sm:$0xff]   ;;  %v6599_v34 = vld [vmem:[%s8123_s12 + $0x48] sm:$0xff]  }
 0x997   : > { %6320 = vmatprep.subr.mxu1 %v6894_v2 }
 0x999   : > { %v1261_v41 = vpop.permute.xlu0 %1260 }
 0x9a0   : > { %v6760_v35 = vpop.eup %6759 }
 0x9a1   : > { %v1179_v36 = vsel %vm840_vm6, %v6760_v35, 0.0 }
 0x9a2   : > { %1180 = vadd.xlane.f32.xlu1 %v1179_v36  ;;  %v6601_v36 = vld [vmem:[%s8123_s12 + $0x50] sm:$0xff]  }
 0x9b3   : > { %1262 = vrot.lane.b32.xlu1 %v7129_v45, %s8136_s18 }
 0xa2f   : > { %v1181_v37 = vpop.xlane.xlu1 %1180 }
 0xa30   : > { %6761 = vrcp.f32 %v1181_v37  ;;  %v6602_v37 = vld [vmem:[%s8123_s12 + $0x10] sm:$0xff]  }
 0xa33   : > { %v1263_v40 = vpop.permute.xlu1 %1262 }
 0xa3a   : > { %v6762_v38 = vpop.eup %6761 }
 0xa3b   : > { %v1183_v39 = vmul.f32 %v6762_v38, %v6760_v35  ;;  %v6600_v35 = vld [vmem:[%s8123_s12 + $0x8] sm:$0xff]   ;;  %v6603_v38 = vld [vmem:[%s8123_s12 + $0x58] sm:$0xff]  }
 0xa3d   : > { %6318 = vmatmul.mubr.msk.f32.vlgmr.msra.gmra.mrb[14].mxu1 %vm840_vm6, %v1183_v39  ;;  %v6604_v39 = vld [vmem:[%s8123_s12 + $0x18] sm:$0xff]  }
 0xa3e   : > { %6321 = vmatpush3.xpose.msk.msra.mxu1 %vm763_vm4, %v1263_v40  ;;  %6322 = vmatprep.mubr.msk.f32.mxu1 %vm6895_vm0, %v6894_v2  ;;  %v6605_v40 = vld [vmem:[%s8123_s12 + $0x60] sm:$0xff]  }
 0xa3f   : > { %6325 = vmatprep.subr.mxu1 %v6894_v2 }
 0xa41   : > { %6323 = vmatmul.mubr.msk.f32.vlgmr.msra.gmra.mrb[16].mxu1 %vm763_vm4, %v1261_v41  ;;  %v6606_v41 = vld [vmem:[%s8123_s12 + $0x20] sm:$0xff]  }
 0xa42   : > { %6327 = vmatprep.mubr.msk.f32.mxu1 %vm6895_vm0, %v6894_v2 }
 0xb10   : > { %v1256_v42 = vpop.f32.mrb[14].mxu1 }
 0xb11   : > { %v6319_v43 = vpop.f32.mrb[15].mxu1 }
 0xb12   : > { %v6608_v43 = vld [vmem:[%s8123_s12 + $0x28] sm:$0xff]  }
 0xb14   : > { %v1334_v44 = vpop.f32.mrb[16].mxu1 }
 0xb15   : > { %v1338_v45 = vmul.f32 0.125, %v1334_v44  ;;  %v6324_v47 = vpop.f32.mrb[17].mxu1 }
 0xb17   : > { %v1339_v48 = vsel %vm7148_vm5, %v1338_v45, -inf }
 0xb18   : > { %v1340_v49 = vsel %vm840_vm6, %v1339_v48, -inf }
 0xb19   : > { %1341 = vmax.xlane.f32.xlu0 %v1340_v49  ;;  %v5686_v49 = vld [vmem:[%s8119_s8] ss:$0 sm:$0xff] }
 0xb2f   : > { %1351 = vrot.lane.b32.xlu0 %v7133_v46, %s8132_s29  ;;  %v6581_v46 = vld [vmem:[%s8117_s6] sm:$0xff]   ;;  %s8174_s29 = smov 48  }
 0xb30   : > { %6331 = vmatpush3.bf16.msra.mxu0 %v6581_v46  ;;  %v7331_v46 = vsub.s32 0, %v7144_v50 }
 0xb31   : > { %6332 = vmatprep.subr.bf16.mxu0 %v6894_v2 }
 0xb33   : > { %1432 = vrot.lane.b32.xlu0 %v1256_v42, %s8138_s20  ;;  %v6607_v42 = vld [vmem:[%s8123_s12 + $0x68] sm:$0xff]   ;;  %s8171_s20 = smov 112  }
 0xb34   : > { %6333 = vmatpush3.bf16.msra.mxu0 %v6582_v61  ;;  %v1567_v61 = vld [vmem:[%s8122_s11] sm:$0x3] }
 0xb35   : > { %6334 = vmatprep.subr.bf16.mxu0 %v6894_v2 }
 0xb38   : > { %6335 = vmatpush3.bf16.msra.mxu0 %v6583_v62  ;;  %v7337_v62 = vsub.s32 1, %v7144_v50 }
 0xb39   : > { %6336 = vmatprep.subr.bf16.mxu0 %v6894_v2 }
 0xb3c   : > { %6337 = vmatpush3.bf16.msra.mxu0 %v6584_v63  ;;  %v1572_v63 = vrot.slane %v1567_v61, %v7331_v46 }
 0xb3d   : > { %6114 = vmatprep.subr.bf16.mxu0 %v6597_v32  ;;  %v6624_v32 = vld [vmem:[%s8116_s5 + $0x74] ss:$8 sps:$4 sm:$0xff]  }
 0xba6   : > { %v1342_v52 = vpop.xlane.xlu0 %1341 }
 0xba7   : > { %v1343_v53 = vsub.f32 %v1339_v48, %v1342_v52 }
 0xba9   : > { %v1344_v54 = vmul.f32 1.442695, %v1343_v53  ;;  %v5687_v53 = vld [vmem:[%s8120_s9] ss:$0 sm:$0xff] }
 0xbaa   : > { %v1352_v55 = vpop.permute.xlu0 %1351 }
 0xbab   : > { %6763 = vpow2.f32 %v1344_v54  ;;  %6326 = vmatpush3.msra.mxu1 %v1352_v55 }
 0xbae   : > { %v1433_v6 = vpop.permute.xlu0 %1432 }
 0xbb5   : > { %v6764_v56 = vpop.eup %6763 }
 0xbb6   : > { %v1346_v57 = vsel %vm840_vm6, %v6764_v56, 0.0 }
 0xbb7   : > { %1347 = vadd.xlane.f32.xlu1 %v1346_v57  ;;  %v6609_v57 = vld [vmem:[%s8123_s12 + $0x70] sm:$0xff]  }
 0xbc8   : > { %1428 = vrot.lane.b32.xlu1 %v1089_v24, %s8136_s18  ;;  %s8175_s18 = smov 96  }
 0xc44   : > { %v1348_v58 = vpop.xlane.xlu1 %1347 }
 0xc45   : > { %6765 = vrcp.f32 %v1348_v58  ;;  %v6610_v58 = vld [vmem:[%s8123_s12 + $0x30] sm:$0xff]  }
 0xc48   : > { %v1429_v4 = vpop.permute.xlu1 %1428 }
 0xc49   : > { %v1439_v7 = vsel %vm763_vm4, %v7168_v5, %v1429_v4 }
 0xc4a   : > { %v1441_v8 = vsel %vm1440_vm7, %v1439_v7, %v1433_v6 }
 0xc4f   : > { %v6766_v59 = vpop.eup %6765 }
 0xc50   : > { %v1350_v60 = vmul.f32 %v6766_v59, %v6764_v56  ;;  %v6611_v59 = vld [vmem:[%s8123_s12 + $0x78] sm:$0xff]  }
 0xc52   : > { %6328 = vmatmul.mubr.msk.f32.vlgmr.msra.gmra.mrb[18].mxu1 %vm840_vm6, %v1350_v60  ;;  %v6612_v60 = vld [vmem:[%s8123_s12 + $0x38] sm:$0xff]  }
 0xc53   : > { %1654 = vmatprep.mubr.bf16.mxu1 %v6893_v1 }
 0xd25   : > { %v1423_v0 = vpop.f32.mrb[18].mxu1 }
 0xd26   : > { %1436 = vrot.lane.b32.xlu0 %v1423_v0, %s8140_s27  ;;  %v6329_v3 = vpop.f32.mrb[19].mxu1  ;;  %v1576_v0 = vrot.slane %v1567_v61, %v7337_v62  ;;  %s8170_s27 = smov 64  }
 0xd98   : > { %v1437_v9 = vpop.permute.xlu0 %1436 }
 0xd99   : > { %v1443_v10 = vsel %vm1442_vm8, %v1441_v8, %v1437_v9 }
 0xd9a   : > { %v1452_v11 = vpack.c.bf16 %v1443_v10, %v1443_v10 }
 0xd9c   : > { %6339 = vmatmul.mubr.msk.bf16.vlgmr.msra.gmra.mrb[4].mxu0 %vm638_vm3, %v1452_v11 }
 0xd9d   : > { %6115 = vmatpush3.bf16.msra.mxu0 %v6598_v33  ;;  %v6622_v33 = vld [vmem:[%s8116_s5 + $0x70] ss:$8 sps:$4 sm:$0xff]  }
 0xd9e   : > { %6116 = vmatprep.subr.bf16.mxu0 %v6599_v34 }
 0xda1   : > { %6117 = vmatpush3.bf16.msra.mxu0 %v6600_v35 }
 0xda2   : > { %6118 = vmatprep.subr.bf16.mxu0 %v6601_v36 }
 0xda5   : > { %6119 = vmatpush3.bf16.msra.mxu0 %v6602_v37 }
 0xda6   : > { %6120 = vmatprep.subr.bf16.mxu0 %v6603_v38  ;;  %v5716_v38 = vld [vmem:[%s8114_s3 + $0x1] ss:$0 sm:$0xff] }
 0xda9   : > { %6121 = vmatpush3.bf16.msra.mxu0 %v6604_v39 }
 0xdaa   : > { %6122 = vmatprep.subr.bf16.mxu0 %v6605_v40  ;;  %v5717_v40 = vld [vmem:[%s8115_s4 + $0x1] ss:$0 sm:$0xff] }
 0xdad   : > { %6123 = vmatpush3.bf16.msra.mxu0 %v6606_v41 }
 0xdae   : > { %6124 = vmatprep.subr.bf16.mxu0 %v6607_v42 }
 0xdb1   : > { %6125 = vmatpush3.bf16.msra.mxu0 %v6608_v43 }
 0xdb2   : > { %6126 = vmatprep.subr.bf16.mxu0 %v6609_v57 }
 0xdb5   : > { %6127 = vmatpush3.bf16.msra.mxu0 %v6610_v58 }
 0xdb6   : > { %6128 = vmatprep.subr.bf16.mxu0 %v6611_v59 }
 0xdb9   : > { %6129 = vmatpush3.bf16.msra.mxu0 %v6612_v60 }
 0xdba   : > { %6362 = vmatprep.subr.mxu0 %v6894_v2 }
 0xe6f   : > { %v1514_v12 = vpop.f32.mrb[4].mxu0 }
 0xe70   : > { %v1520_v14 = vadd.f32 %v1514_v12, %v7089_v17  ;;  %v6340_v15 = vpop.f32.mrb[5].mxu0  ;;  %v6587_v17 = vld [vmem:[%s8121_s10 + $0x4] ss:$8 sps:$4 sm:$0xff]  }
 0xe71   : > { %v1517_v16 = vpop.f32.mrb[6].mxu0  ;;  %1622 = vmatprep.subr.bf16.mxu1 %v6587_v17 }
 0xe72   : > { %v7243_v5 = vadd.f32 %v5685_v13, %v1520_v14  ;;  %v6341_v18 = vpop.f32.mrb[7].mxu0  ;;  %1623 = vmatpush1.bf16.msra.mxu1 %v6585_v25 }
 0xe73   : > { %1624 = vmatprep.subr.bf16.mxu1 %v6590_v26  ;;  %v5713_v18 = vld [vmem:[%s8124_s13] ss:$0 sm:$0xff] }
 0xe74   : > { %v1531_v19 = vsel %vm638_vm3, %v7243_v5, 0.0 }
 0xe75   : > { %1532 = vadd.xlane.f32.xlu1 %v1531_v19 }
 0xe76   : > { %1625 = vmatpush1.bf16.msra.mxu1 %v6588_v27  ;;  %v6615_v27 = vld [vmem:[%s8116_s5 + $0x44] ss:$8 sps:$4 sm:$0xff]  }
 0xe77   : > { %1626 = vmatprep.subr.bf16.mxu1 %v6593_v28  ;;  %v6618_v28 = vld [vmem:[%s8116_s5 + $0x54] ss:$8 sps:$4 sm:$0xff]  }
 0xe7a   : > { %1627 = vmatpush1.bf16.msra.mxu1 %v6591_v29  ;;  %v6616_v29 = vld [vmem:[%s8116_s5 + $0x50] ss:$8 sps:$4 sm:$0xff]  }
 0xe7b   : > { %1628 = vmatprep.subr.bf16.mxu1 %v6596_v30  ;;  %v6621_v30 = vld [vmem:[%s8116_s5 + $0x64] ss:$8 sps:$4 sm:$0xff]  }
 0xe7e   : > { %1629 = vmatpush1.bf16.msra.mxu1 %v6594_v31  ;;  %v6619_v31 = vld [vmem:[%s8116_s5 + $0x60] ss:$8 sps:$4 sm:$0xff]  }
 0xe7f   : > { %1928 = vmatprep.subr.bf16.mxu1 %v6615_v27 }
 0xf02   : > { %v1533_v20 = vpop.xlane.xlu1 %1532 }
 0xf03   : > { %v1534_v21 = vmul.f32 0.015625, %v1533_v20 }
 0xf05   : > { %v1535_v22 = vsub.f32 %v7243_v5, %v1534_v21 }
 0xf07   : > { %v1536_v23 = vmul.f32 %v1535_v22, %v1535_v22 }
 0xf09   : > { %v1537_v24 = vsel %vm638_vm3, %v1536_v23, 0.0 }
 0xf0a   : > { %1538 = vadd.xlane.f32.xlu0 %v1537_v24 }
 0xf97   : > { %v1539_v44 = vpop.xlane.xlu0 %1538 }
 0xf98   : > { %v1540_v45 = vmul.f32 0.015625, %v1539_v44 }
 0xf9a   : > { %v1541_v47 = vadd.f32 1e-05, %v1540_v45 }
 0xf9c   : > { %6767 = vrsqrt.f32 %v1541_v47 }
 0xfa6   : > { %v6768_v48 = vpop.eup %6767 }
 0xfa7   : > { %v1543_v52 = vmul.f32 %v6768_v48, %v1535_v22 }
 0xfa9   : > { %v1550_v54 = vmul.f32 %v5686_v49, %v1543_v52 }
 0xfab   : > { %v1557_v55 = vadd.f32 %v5687_v53, %v1550_v54 }
 0xfad   : > { %v1566_v56 = vpack.c.bf16 %v1557_v55, %v1557_v55 }
 0xfaf   : > { %5696 = vmatmul.mubr.msk.bf16.vlgmr.msra.gmra.mrb[20].mxu1 %vm638_vm3, %v1566_v56 }
 0xfb0   : > { %1960 = vmatprep.mubr.bf16.mxu1 %v6893_v1 }
0x1082   : > { %v1656_v3 = vpop.f32.mrb[20].mxu1 }
0x1083   : > { %v1657_v4 = vadd.f32 %v1656_v3, %v1572_v63  ;;  %v1658_v6 = vpop.f32.mrb[21].mxu1 }
0x1084   : > { %v1659_v7 = vadd.f32 %v1658_v6, %v1576_v0  ;;  %v1660_v8 = vpop.f32.mrb[22].mxu1 }
0x1085   : > { %v1663_v9 = vmax.f32 %v1657_v4, 0.0  ;;  %v1661_v10 = vpop.f32.mrb[23].mxu1 }
0x1086   : > { %v1664_v11 = vmax.f32 %v1659_v7, 0.0 }
0x1087   : > { %v1697_v13 = vpack.c.bf16 %v1663_v9, %v1663_v9 }
0x1088   : > { %v1698_v12 = vpack.c.bf16 %v1664_v11, %v1664_v11 }
0x108a   : > { %1827 = vmatprep.mubr.bf16.mxu0 %v1698_v12 }
0x108b   : > { %1828 = vmatmul.mubr.bf16.vlgmr.msra.gmra.mrb[8].mxu0 %v1697_v13 }
0x108c   : > { %6364 = vmatprep.mubr.msk.f32.mxu0 %vm6895_vm0, %v6894_v2 }
0x115e   : > { %v6130_v50 = vpop.f32.mrb[8].mxu0 }
0x115f   : > { %v6131_v14 = vpop.f32.mrb[9].mxu0 }
0x1160   : > { %v6132_v15 = vadd.f32 %v6131_v14, %v6130_v50  ;;  %v6133_v16 = vpop.f32.mrb[10].mxu0 }
0x1161   : > { %v6134_v19 = vpop.f32.mrb[11].mxu0 }
0x1162   : > { %v1835_v20 = vadd.f32 %v6132_v15, %v7243_v5  ;;  %v6613_v5 = vld [vmem:[%s8116_s5 + $0x40] ss:$8 sps:$4 sm:$0xff]  }
0x1163   : > { %1929 = vmatpush1.bf16.msra.mxu1 %v6613_v5 }
0x1164   : > { %v7347_v21 = vadd.f32 %v5713_v18, %v1835_v20  ;;  %1930 = vmatprep.subr.bf16.mxu1 %v6618_v28 }
0x1166   : > { %v1848_v22 = vsel %vm638_vm3, %v7347_v21, 0.0 }
0x1167   : > { %1849 = vadd.xlane.f32.xlu0 %v1848_v22  ;;  %1931 = vmatpush1.bf16.msra.mxu1 %v6616_v29 }
0x1168   : > { %1932 = vmatprep.subr.bf16.mxu1 %v6621_v30 }
0x116b   : > { %1933 = vmatpush1.bf16.msra.mxu1 %v6619_v31 }
0x116c   : > { %1934 = vmatprep.subr.bf16.mxu1 %v6624_v32 }
0x116f   : > { %1935 = vmatpush1.bf16.msra.mxu1 %v6622_v33 }
0x1170   : > { %6342 = vmatprep.subr.mxu1 %v6894_v2 }
0x11f4   : > { %v1850_v23 = vpop.xlane.xlu0 %1849 }
0x11f5   : > { %v1851_v24 = vmul.f32 0.015625, %v1850_v23 }
0x11f7   : > { %v1852_v17 = vsub.f32 %v7347_v21, %v1851_v24 }
0x11f9   : > { %v1853_v25 = vmul.f32 %v1852_v17, %v1852_v17 }
0x11fb   : > { %v1854_v26 = vsel %vm638_vm3, %v1853_v25, 0.0 }
0x11fc   : > { %1855 = vadd.xlane.f32.xlu1 %v1854_v26 }
0x1289   : > { %v1856_v34 = vpop.xlane.xlu1 %1855 }
0x128a   : > { %v1857_v35 = vmul.f32 0.015625, %v1856_v34 }
0x128c   : > { %v1858_v36 = vadd.f32 1e-05, %v1857_v35 }
0x128e   : > { %6769 = vrsqrt.f32 %v1858_v36 }
0x1298   : > { %v6770_v37 = vpop.eup %6769 }
0x1299   : > { %v1860_v39 = vmul.f32 %v6770_v37, %v1852_v17 }
0x129b   : > { %v1867_v41 = vmul.f32 %v5716_v38, %v1860_v39 }
0x129d   : > { %v1874_v42 = vadd.f32 %v5717_v40, %v1867_v41 }
0x129f   : > { %v1884_v43 = vpack.c.bf16 %v1874_v42, %v1874_v42 }
0x12a1   : > { %5734 = vmatmul.mubr.msk.bf16.vlgmr.msra.gmra.mrb[24].mxu1 %vm638_vm3, %v1884_v43 }
0x12a2   : > { %6344 = vmatprep.mubr.msk.f32.mxu1 %vm6895_vm0, %v6894_v2 }
0x1374   : > { %v1962_v44 = vpop.f32.mrb[24].mxu1 }
0x1375   : > { %1970 = vrot.lane.b32.xlu0 %v1962_v44, %s8170_s27  ;;  %v7388_v45 = vpop.f32.mrb[25].mxu1 }
0x1376   : > { %v1966_v47 = vpop.f32.mrb[26].mxu1 }
0x1377   : > { %v1967_v48 = vpop.f32.mrb[27].mxu1 }
0x1379   : > { %2132 = vrot.lane.b32.xlu0 %v1962_v44, %s8171_s20 }
0x137d   : > { %2302 = vrot.lane.b32.xlu0 %v1962_v44, %s8172_s23 }
0x1381   : > { %2469 = vrot.lane.b32.xlu0 %v1962_v44, %s8173_s30 }
0x13e7   : > { %v1971_v49 = vpop.permute.xlu0 %1970 }
0x13e8   : > { %6343 = vmatpush3.xpose.msk.msra.mxu1 %vm763_vm4, %v1971_v49 }
0x13e9   : > { %6347 = vmatprep.subr.mxu1 %v6894_v2 }
0x13eb   : > { %6345 = vmatmul.mubr.msk.f32.vlgmr.msra.gmra.mrb[28].mxu1 %vm763_vm4, %v1962_v44  ;;  %v2133_v52 = vpop.permute.xlu0 %2132 }
0x13ec   : > { %6348 = vmatpush3.msra.mxu1 %v7388_v45  ;;  %6349 = vmatprep.mubr.msk.f32.mxu1 %vm6895_vm0, %v6894_v2 }
0x13ed   : > { %6352 = vmatprep.subr.mxu1 %v6894_v2 }
0x13ef   : > { %v2303_v53 = vpop.permute.xlu0 %2302 }
0x13f0   : > { %6363 = vmatpush3.xpose.msk.msra.mxu0 %vm763_vm4, %v2303_v53 }
0x13f1   : > { %6372 = vmatprep.subr.mxu0 %v6894_v2 }
0x13f3   : > { %v2470_v7 = vpop.permute.xlu0 %2469 }
0x14be   : > { %v2042_v54 = vpop.f32.mrb[28].mxu1 }
0x14bf   : > { %v2046_v55 = vmul.f32 0.125, %v2042_v54  ;;  %v6346_v56 = vpop.f32.mrb[29].mxu1 }
0x14c1   : > { %v2047_v57 = vsel %vm7148_vm5, %v2046_v55, -inf }
0x14c2   : > { %v2048_v58 = vsel %vm840_vm6, %v2047_v57, -inf }
0x14c3   : > { %2049 = vmax.xlane.f32.xlu1 %v2048_v58  ;;  %v6626_v58 = vld [vmem:[%s8117_s6 + $0x28] sm:$0xff]  }
0x14d4   : > { %2134 = vrot.lane.b32.xlu1 %v1962_v44, %s8174_s29 }
0x1550   : > { %v2050_v59 = vpop.xlane.xlu1 %2049 }
0x1551   : > { %v2051_v60 = vsub.f32 %v2047_v57, %v2050_v59  ;;  %v6625_v57 = vld [vmem:[%s8117_s6 + $0x20] sm:$0xff]   ;;  %v6627_v59 = vld [vmem:[%s8117_s6 + $0x30] sm:$0xff]  }
0x1553   : > { %v2052_v61 = vmul.f32 1.442695, %v2051_v60  ;;  %v6628_v60 = vld [vmem:[%s8117_s6 + $0x38] sm:$0xff]  }
0x1554   : > { %v2135_v3 = vpop.permute.xlu1 %2134 }
0x1555   : > { %6771 = vpow2.f32 %v2052_v61 }
0x155f   : > { %v6772_v63 = vpop.eup %6771 }
0x1560   : > { %v2054_v0 = vsel %vm840_vm6, %v6772_v63, 0.0 }
0x1561   : > { %2055 = vadd.xlane.f32.xlu1 %v2054_v0 }
0x1572   : > { %2300 = vrot.lane.b32.xlu1 %v1962_v44, %s8175_s18 }
0x1576   : > { %2467 = vrot.lane.b32.xlu1 %v1962_v44, %s8176_s26 }
0x15ee   : > { %v2056_v4 = vpop.xlane.xlu1 %2055 }
0x15ef   : > { %6773 = vrcp.f32 %v2056_v4 }
0x15f2   : > { %v2301_v6 = vpop.permute.xlu1 %2300 }
0x15f3   : > { %6365 = vmatmul.mubr.msk.f32.vlgmr.msra.gmra.mrb[12].mxu0 %vm763_vm4, %v2301_v6 }
0x15f4   : > { %6373 = vmatpush3.xpose.msk.msra.mxu0 %vm763_vm4, %v2470_v7  ;;  %6374 = vmatprep.mubr.msk.f32.mxu0 %vm6895_vm0, %v6894_v2 }
0x15f5   : > { %6382 = vmatprep.subr.bf16.mxu0 %v6894_v2 }
0x15f6   : > { %v2468_v8 = vpop.permute.xlu1 %2467 }
0x15f7   : > { %6375 = vmatmul.mubr.msk.f32.vlgmr.msra.gmra.mrb[14].mxu0 %vm763_vm4, %v2468_v8 }
0x15f8   : > { %6390 = vmatprep.mubr.msk.bf16.mxu0 %vm6895_vm0, %v6894_v2  ;;  %6383 = vmatpush3.bf16.msra.mxu0 %v6625_v57 }
0x15f9   : > { %v6774_v9 = vpop.eup %6773  ;;  %6384 = vmatprep.subr.bf16.mxu0 %v6894_v2 }
0x15fa   : > { %v2058_v10 = vmul.f32 %v6774_v9, %v6772_v63 }
0x15fc   : > { %6350 = vmatmul.mubr.msk.f32.vlgmr.msra.gmra.mrb[30].mxu1 %vm840_vm6, %v2058_v10  ;;  %6385 = vmatpush3.bf16.msra.mxu0 %v6626_v58  ;;  %v6653_v58 = vld [vmem:[%s8123_s12 + $0xf0] sm:$0xff]  }
0x15fd   : > { %6353 = vmatpush3.xpose.msk.msra.mxu1 %vm763_vm4, %v2135_v3  ;;  %6354 = vmatprep.mubr.msk.f32.mxu1 %vm6895_vm0, %v6894_v2 }
0x15fe   : > { %6357 = vmatprep.subr.mxu1 %v6894_v2  ;;  %6386 = vmatprep.subr.bf16.mxu0 %v6894_v2 }
0x1600   : > { %6355 = vmatmul.mubr.msk.f32.vlgmr.msra.gmra.mrb[32].mxu1 %vm763_vm4, %v2133_v52  ;;  %6387 = vmatpush3.bf16.msra.mxu0 %v6627_v59  ;;  %v6654_v59 = vld [vmem:[%s8123_s12 + $0xb0] sm:$0xff]  }
0x1601   : > { %6359 = vmatprep.mubr.msk.f32.mxu1 %vm6895_vm0, %v6894_v2  ;;  %6388 = vmatprep.subr.bf16.mxu0 %v6894_v2 }
0x1604   : > { %6389 = vmatpush3.bf16.msra.mxu0 %v6628_v60  ;;  %v6655_v60 = vld [vmem:[%s8123_s12 + $0xf8] sm:$0xff]  }
0x16c6   : > { %v2374_v11 = vpop.f32.mrb[12].mxu0 }
0x16c7   : > { %v2378_v12 = vmul.f32 0.125, %v2374_v11  ;;  %v6366_v13 = vpop.f32.mrb[13].mxu0 }
0x16c9   : > { %v2379_v50 = vsel %vm7148_vm5, %v2378_v12, -inf }
0x16ca   : > { %v2541_v14 = vpop.f32.mrb[14].mxu0  ;;  %v2380_v15 = vsel %vm840_vm6, %v2379_v50, -inf }
0x16cb   : > { %2381 = vmax.xlane.f32.xlu1 %v2380_v15  ;;  %v6376_v16 = vpop.f32.mrb[15].mxu0  ;;  %v2545_v22 = vmul.f32 0.125, %v2541_v14  ;;  %v5761_v14 = vld [vmem:[%s8118_s7 + $0x1] ss:$0 sm:$0xff] }
0x16cd   : > { %v2546_v26 = vsel %vm7148_vm5, %v2545_v22, -inf }
0x16ce   : > { %v2547_v27 = vsel %vm840_vm6, %v2546_v26, -inf }
0x16cf   : > { %v7428_v18 = vpop.f32.mrb[30].mxu1 }
0x16d0   : > { %v6351_v19 = vpop.f32.mrb[31].mxu1 }
0x16d3   : > { %v2206_v20 = vpop.f32.mrb[32].mxu1 }
0x16d4   : > { %v2210_v23 = vmul.f32 0.125, %v2206_v20  ;;  %v6356_v24 = vpop.f32.mrb[33].mxu1 }
0x16d6   : > { %v2211_v17 = vsel %vm7148_vm5, %v2210_v23, -inf }
0x16d7   : > { %v2212_v25 = vsel %vm840_vm6, %v2211_v17, -inf }
0x16d8   : > { %2213 = vmax.xlane.f32.xlu0 %v2212_v25 }
0x16dc   : > { %2548 = vmax.xlane.f32.xlu0 %v2547_v27  ;;  %v6629_v27 = vld [vmem:[%s8121_s10 + $0x40] ss:$8 sps:$4 sm:$0xff]  }
0x1758   : > { %v2382_v5 = vpop.xlane.xlu1 %2381 }
0x1759   : > { %v2383_v28 = vsub.f32 %v2379_v50, %v2382_v5  ;;  %v6634_v5 = vld [vmem:[%s8121_s10 + $0x54] ss:$8 sps:$4 sm:$0xff]  }
0x175b   : > { %v2384_v29 = vmul.f32 1.442695, %v2383_v28  ;;  %v6632_v28 = vld [vmem:[%s8121_s10 + $0x50] ss:$8 sps:$4 sm:$0xff]  }
0x175d   : > { %6775 = vpow2.f32 %v2384_v29  ;;  %v6637_v29 = vld [vmem:[%s8121_s10 + $0x64] ss:$8 sps:$4 sm:$0xff]  }
0x1765   : > { %v2214_v30 = vpop.xlane.xlu0 %2213 }
0x1766   : > { %v2215_v32 = vsub.f32 %v2211_v17, %v2214_v30  ;;  %v6635_v30 = vld [vmem:[%s8121_s10 + $0x60] ss:$8 sps:$4 sm:$0xff]  }
0x1767   : > { %v6776_v31 = vpop.eup %6775 }
0x1768   : > { %v2386_v33 = vsel %vm840_vm6, %v6776_v31, 0.0  ;;  %v2216_v36 = vmul.f32 1.442695, %v2215_v32  ;;  %v6638_v32 = vld [vmem:[%s8121_s10 + $0x70] ss:$8 sps:$4 sm:$0xff]  }
0x1769   : > { %2387 = vadd.xlane.f32.xlu1 %v2386_v33  ;;  %v2549_v34 = vpop.xlane.xlu0 %2548  ;;  %v6641_v33 = vld [vmem:[%s8123_s12 + $0xc0] sm:$0xff]  }
0x176a   : > { %v2550_v35 = vsub.f32 %v2546_v26, %v2549_v34  ;;  %v6642_v34 = vld [vmem:[%s8123_s12 + $0x80] sm:$0xff]   ;;  %6157 = vmatprep.subr.bf16.mxu0 %v6641_v33  ;;  %v6668_v33 = vld [vmem:[%s8116_s5 + $0xb4] ss:$8 sps:$4 sm:$0xff]  }
0x176c   : > { %v2551_v37 = vmul.f32 1.442695, %v2550_v35  ;;  %v6643_v35 = vld [vmem:[%s8123_s12 + $0xc8] sm:$0xff]  }
0x176e   : > { %6777 = vpow2.f32 %v2551_v37  ;;  %v6645_v37 = vld [vmem:[%s8123_s12 + $0xd0] sm:$0xff]  }
0x176f   : > { %6779 = vpow2.f32 %v2216_v36  ;;  %v6644_v36 = vld [vmem:[%s8123_s12 + $0x88] sm:$0xff]  }
0x1778   : > { %v6778_v38 = vpop.eup %6777 }
0x1779   : > { %v2553_v39 = vsel %vm840_vm6, %v6778_v38, 0.0  ;;  %v6780_v40 = vpop.eup %6779 }
0x177a   : > { %2224 = vrot.lane.b32.xlu1 %v7388_v45, %s8171_s20  ;;  %2554 = vadd.xlane.f32.xlu0 %v2553_v39  ;;  %v2218_v41 = vsel %vm840_vm6, %v6780_v40, 0.0  ;;  %v6647_v39 = vld [vmem:[%s8123_s12 + $0xd8] sm:$0xff]  }
0x177e   : > { %2558 = vrot.lane.b32.xlu1 %v7388_v45, %s8176_s26  ;;  %2219 = vadd.xlane.f32.xlu0 %v2218_v41  ;;  %v6649_v41 = vld [vmem:[%s8123_s12 + $0xe0] sm:$0xff]  }
0x1794   : > { %2391 = vrot.lane.b32.xlu0 %v7388_v45, %s8175_s18 }
0x17f6   : > { %v2388_v42 = vpop.xlane.xlu1 %2387 }
0x17fa   : > { %v2225_v43 = vpop.permute.xlu1 %2224 }
0x17fb   : > { %6358 = vmatpush3.msra.mxu1 %v2225_v43  ;;  %v6651_v43 = vld [vmem:[%s8123_s12 + $0xe8] sm:$0xff]  }
0x17fc   : > { %6367 = vmatprep.subr.mxu1 %v6894_v2 }
0x17fe   : > { %v2559_v55 = vpop.permute.xlu1 %2558 }
0x1807   : > { %v2555_v44 = vpop.xlane.xlu0 %2554 }
0x180b   : > { %v2220_v47 = vpop.xlane.xlu0 %2219 }
0x180c   : > { %6781 = vrcp.f32 %v2220_v47 }
0x180d   : > { %6783 = vrcp.f32 %v2388_v42  ;;  %v6650_v42 = vld [vmem:[%s8123_s12 + $0xa0] sm:$0xff]  }
0x180e   : > { %6785 = vrcp.f32 %v2555_v44  ;;  %v6652_v44 = vld [vmem:[%s8123_s12 + $0xa8] sm:$0xff]  }
0x180f   : > { %v2392_v53 = vpop.permute.xlu0 %2391 }
0x1816   : > { %v6782_v48 = vpop.eup %6781 }
0x1817   : > { %v2222_v49 = vmul.f32 %v6782_v48, %v6780_v40  ;;  %v6784_v52 = vpop.eup %6783  ;;  %v6648_v40 = vld [vmem:[%s8123_s12 + $0x98] sm:$0xff]  }
0x1818   : > { %v2390_v45 = vmul.f32 %v6784_v52, %v6776_v31  ;;  %v6786_v54 = vpop.eup %6785  ;;  %v6640_v31 = vld [vmem:[%s8121_s10 + $0x74] ss:$8 sps:$4 sm:$0xff]  }
0x1819   : > { %6360 = vmatmul.mubr.msk.f32.vlgmr.msra.gmra.mrb[34].mxu1 %vm840_vm6, %v2222_v49  ;;  %v2557_v56 = vmul.f32 %v6786_v54, %v6778_v38  ;;  %v6646_v38 = vld [vmem:[%s8123_s12 + $0x90] sm:$0xff]   ;;  %v5765_v54 = vld [vmem:[%s8120_s9 + $0x1] ss:$0 sm:$0xff] }
0x181a   : > { %6368 = vmatpush3.msra.mxu1 %v2392_v53  ;;  %6369 = vmatprep.mubr.msk.f32.mxu1 %vm6895_vm0, %v6894_v2  ;;  %v5764_v53 = vld [vmem:[%s8119_s8 + $0x1] ss:$0 sm:$0xff] }
0x181b   : > { %6377 = vmatprep.subr.mxu1 %v6894_v2 }
0x181d   : > { %6370 = vmatmul.mubr.msk.f32.vlgmr.msra.gmra.mrb[36].mxu1 %vm840_vm6, %v2390_v45 }
0x181e   : > { %6378 = vmatpush3.msra.mxu1 %v2559_v55  ;;  %6379 = vmatprep.mubr.msk.f32.mxu1 %vm6895_vm0, %v6894_v2 }
0x1821   : > { %6380 = vmatmul.mubr.msk.f32.vlgmr.msra.gmra.mrb[38].mxu1 %vm840_vm6, %v2557_v56 }
0x1822   : > { %2865 = vmatprep.mubr.bf16.mxu1 %v6893_v1 }
0x18ec   : > { %v2296_v61 = vpop.f32.mrb[34].mxu1 }
0x18ed   : > { %2635 = vrot.lane.b32.xlu1 %v2296_v61, %s8173_s30  ;;  %v6361_v63 = vpop.f32.mrb[35].mxu1  ;;  %v6656_v61 = vld [vmem:[%s8123_s12 + $0xb8] sm:$0xff]  }
0x18ee   : > { %v5774_v63 = vld [vmem:[%s8122_s11 + $0x2] sm:$0x3] }
0x18f0   : > { %v2463_v0 = vpop.f32.mrb[36].mxu1 }
0x18f1   : > { %2639 = vrot.lane.b32.xlu0 %v2463_v0, %s8172_s23  ;;  %v6371_v3 = vpop.f32.mrb[37].mxu1  ;;  %v2783_v0 = vrot.slane %v5774_v63, %v7331_v46 }
0x18f2   : > { %v2787_v3 = vrot.slane %v5774_v63, %v7337_v62 }
0x18f4   : > { %v2630_v4 = vpop.f32.mrb[38].mxu1 }
0x18f5   : > { %2643 = vrot.lane.b32.xlu1 %v2630_v4, %s8174_s29  ;;  %v6381_v6 = vpop.f32.mrb[39].mxu1 }
0x195f   : > { %v2636_v7 = vpop.permute.xlu1 %2635 }
0x1960   : > { %v2646_v9 = vsel %vm763_vm4, %v7428_v18, %v2636_v7 }
0x1963   : > { %v2640_v8 = vpop.permute.xlu0 %2639 }
0x1964   : > { %v2647_v10 = vsel %vm1440_vm7, %v2646_v9, %v2640_v8 }
0x1967   : > { %v2644_v11 = vpop.permute.xlu1 %2643 }
0x1968   : > { %v2648_v12 = vsel %vm1442_vm8, %v2647_v10, %v2644_v11 }
0x1969   : > { %v2658_v13 = vpack.c.bf16 %v2648_v12, %v2648_v12 }
0x196b   : > { %6391 = vmatmul.mubr.msk.bf16.vlgmr.msra.gmra.mrb[16].mxu0 %vm638_vm3, %v2658_v13 }
0x196c   : > { %6158 = vmatpush3.bf16.msra.mxu0 %v6642_v34  ;;  %v6666_v34 = vld [vmem:[%s8116_s5 + $0xb0] ss:$8 sps:$4 sm:$0xff]  }
0x196d   : > { %6159 = vmatprep.subr.bf16.mxu0 %v6643_v35 }
0x1970   : > { %6160 = vmatpush3.bf16.msra.mxu0 %v6644_v36 }
0x1971   : > { %6161 = vmatprep.subr.bf16.mxu0 %v6645_v37 }
0x1974   : > { %6162 = vmatpush3.bf16.msra.mxu0 %v6646_v38 }
0x1975   : > { %6163 = vmatprep.subr.bf16.mxu0 %v6647_v39  ;;  %v5836_v39 = vld [vmem:[%s8114_s3 + $0x2] ss:$0 sm:$0xff] }
0x1978   : > { %6164 = vmatpush3.bf16.msra.mxu0 %v6648_v40 }
0x1979   : > { %6165 = vmatprep.subr.bf16.mxu0 %v6649_v41  ;;  %v5837_v41 = vld [vmem:[%s8115_s4 + $0x2] ss:$0 sm:$0xff] }
0x197c   : > { %6166 = vmatpush3.bf16.msra.mxu0 %v6650_v42 }
0x197d   : > { %6167 = vmatprep.subr.bf16.mxu0 %v6651_v43 }
0x1980   : > { %6168 = vmatpush3.bf16.msra.mxu0 %v6652_v44 }
0x1981   : > { %6169 = vmatprep.subr.bf16.mxu0 %v6653_v58 }
0x1984   : > { %6170 = vmatpush3.bf16.msra.mxu0 %v6654_v59 }
0x1985   : > { %6171 = vmatprep.subr.bf16.mxu0 %v6655_v60 }
0x1988   : > { %6172 = vmatpush3.bf16.msra.mxu0 %v6656_v61 }
0x1989   : > { %6414 = vmatprep.subr.mxu0 %v6894_v2 }
0x1a3e   : > { %v2720_v50 = vpop.f32.mrb[16].mxu0 }
0x1a3f   : > { %v2726_v15 = vadd.f32 %v2720_v50, %v7347_v21  ;;  %v6392_v16 = vpop.f32.mrb[17].mxu0  ;;  %v6631_v21 = vld [vmem:[%s8121_s10 + $0x44] ss:$8 sps:$4 sm:$0xff]  }
0x1a40   : > { %v2723_v19 = vpop.f32.mrb[18].mxu0  ;;  %2833 = vmatprep.subr.bf16.mxu1 %v6631_v21 }
0x1a41   : > { %v7482_v20 = vadd.f32 %v5761_v14, %v2726_v15  ;;  %v6393_v18 = vpop.f32.mrb[19].mxu0  ;;  %2834 = vmatpush1.bf16.msra.mxu1 %v6629_v27 }
0x1a42   : > { %2835 = vmatprep.subr.bf16.mxu1 %v6634_v5  ;;  %v5833_v18 = vld [vmem:[%s8124_s13 + $0x1] ss:$0 sm:$0xff] }
0x1a43   : > { %v2740_v22 = vsel %vm638_vm3, %v7482_v20, 0.0 }
0x1a44   : > { %2741 = vadd.xlane.f32.xlu0 %v2740_v22 }
0x1a45   : > { %2836 = vmatpush1.bf16.msra.mxu1 %v6632_v28  ;;  %v6659_v28 = vld [vmem:[%s8116_s5 + $0x84] ss:$8 sps:$4 sm:$0xff]  }
0x1a46   : > { %2837 = vmatprep.subr.bf16.mxu1 %v6637_v29  ;;  %v6662_v29 = vld [vmem:[%s8116_s5 + $0x94] ss:$8 sps:$4 sm:$0xff]  }
0x1a49   : > { %2838 = vmatpush1.bf16.msra.mxu1 %v6635_v30  ;;  %v6660_v30 = vld [vmem:[%s8116_s5 + $0x90] ss:$8 sps:$4 sm:$0xff]  }
0x1a4a   : > { %2839 = vmatprep.subr.bf16.mxu1 %v6640_v31  ;;  %v6665_v31 = vld [vmem:[%s8116_s5 + $0xa4] ss:$8 sps:$4 sm:$0xff]  }
0x1a4d   : > { %2840 = vmatpush1.bf16.msra.mxu1 %v6638_v32  ;;  %v6663_v32 = vld [vmem:[%s8116_s5 + $0xa0] ss:$8 sps:$4 sm:$0xff]  }
0x1a4e   : > { %3141 = vmatprep.subr.bf16.mxu1 %v6659_v28 }
0x1ad1   : > { %v2742_v23 = vpop.xlane.xlu0 %2741 }
0x1ad2   : > { %v2743_v24 = vmul.f32 0.015625, %v2742_v23 }
0x1ad4   : > { %v2744_v17 = vsub.f32 %v7482_v20, %v2743_v24 }
0x1ad6   : > { %v2745_v25 = vmul.f32 %v2744_v17, %v2744_v17 }
0x1ad8   : > { %v2746_v26 = vsel %vm638_vm3, %v2745_v25, 0.0 }
0x1ad9   : > { %2747 = vadd.xlane.f32.xlu1 %v2746_v26 }
0x1b66   : > { %v2748_v47 = vpop.xlane.xlu1 %2747 }
0x1b67   : > { %v2749_v48 = vmul.f32 0.015625, %v2748_v47 }
0x1b69   : > { %v2750_v49 = vadd.f32 1e-05, %v2749_v48 }
0x1b6b   : > { %6787 = vrsqrt.f32 %v2750_v49 }
0x1b75   : > { %v6788_v52 = vpop.eup %6787 }
0x1b76   : > { %v2752_v45 = vmul.f32 %v6788_v52, %v2744_v17 }
0x1b78   : > { %v2759_v55 = vmul.f32 %v5764_v53, %v2752_v45 }
0x1b7a   : > { %v2766_v56 = vadd.f32 %v5765_v54, %v2759_v55 }
0x1b7c   : > { %v2776_v57 = vpack.c.bf16 %v2766_v56, %v2766_v56 }
0x1b7e   : > { %5783 = vmatmul.mubr.msk.bf16.vlgmr.msra.gmra.mrb[40].mxu1 %vm638_vm3, %v2776_v57 }
0x1b7f   : > { %3173 = vmatprep.mubr.bf16.mxu1 %v6893_v1 }
0x1c51   : > { %v2867_v4 = vpop.f32.mrb[40].mxu1 }
0x1c52   : > { %v2868_v6 = vadd.f32 %v2867_v4, %v2783_v0  ;;  %v2869_v7 = vpop.f32.mrb[41].mxu1 }
0x1c53   : > { %v2870_v8 = vadd.f32 %v2869_v7, %v2787_v3  ;;  %v2871_v9 = vpop.f32.mrb[42].mxu1 }
0x1c54   : > { %v2874_v10 = vmax.f32 %v2868_v6, 0.0  ;;  %v2872_v11 = vpop.f32.mrb[43].mxu1 }
0x1c55   : > { %v2875_v12 = vmax.f32 %v2870_v8, 0.0 }
0x1c56   : > { %v2909_v50 = vpack.c.bf16 %v2874_v10, %v2874_v10 }
0x1c57   : > { %v2910_v13 = vpack.c.bf16 %v2875_v12, %v2875_v12 }
0x1c59   : > { %3039 = vmatprep.mubr.bf16.mxu0 %v2910_v13 }
0x1c5a   : > { %3040 = vmatmul.mubr.bf16.vlgmr.msra.gmra.mrb[20].mxu0 %v2909_v50 }
0x1c5b   : > { %6416 = vmatprep.mubr.msk.f32.mxu0 %vm6895_vm0, %v6894_v2 }
0x1d2d   : > { %v6173_v14 = vpop.f32.mrb[20].mxu0 }
0x1d2e   : > { %v6174_v15 = vpop.f32.mrb[21].mxu0 }
0x1d2f   : > { %v6175_v16 = vadd.f32 %v6174_v15, %v6173_v14  ;;  %v6176_v19 = vpop.f32.mrb[22].mxu0 }
0x1d30   : > { %v6177_v22 = vpop.f32.mrb[23].mxu0 }
0x1d31   : > { %v3047_v23 = vadd.f32 %v6175_v16, %v7482_v20  ;;  %v6657_v20 = vld [vmem:[%s8116_s5 + $0x80] ss:$8 sps:$4 sm:$0xff]  }
0x1d32   : > { %3142 = vmatpush1.bf16.msra.mxu1 %v6657_v20 }
0x1d33   : > { %v7580_v24 = vadd.f32 %v5833_v18, %v3047_v23  ;;  %3143 = vmatprep.subr.bf16.mxu1 %v6662_v29 }
0x1d35   : > { %v3061_v17 = vsel %vm638_vm3, %v7580_v24, 0.0 }
0x1d36   : > { %3062 = vadd.xlane.f32.xlu0 %v3061_v17  ;;  %3144 = vmatpush1.bf16.msra.mxu1 %v6660_v30 }
0x1d37   : > { %3145 = vmatprep.subr.bf16.mxu1 %v6665_v31 }
0x1d3a   : > { %3146 = vmatpush1.bf16.msra.mxu1 %v6663_v32 }
0x1d3b   : > { %3147 = vmatprep.subr.bf16.mxu1 %v6668_v33 }
0x1d3e   : > { %3148 = vmatpush1.bf16.msra.mxu1 %v6666_v34 }
0x1d3f   : > { %6394 = vmatprep.subr.mxu1 %v6894_v2 }
0x1dc3   : > { %v3063_v25 = vpop.xlane.xlu0 %3062 }
0x1dc4   : > { %v3064_v26 = vmul.f32 0.015625, %v3063_v25 }
0x1dc6   : > { %v3065_v21 = vsub.f32 %v7580_v24, %v3064_v26 }
0x1dc8   : > { %v3066_v27 = vmul.f32 %v3065_v21, %v3065_v21 }
0x1dca   : > { %v3067_v5 = vsel %vm638_vm3, %v3066_v27, 0.0 }
0x1dcb   : > { %3068 = vadd.xlane.f32.xlu0 %v3067_v5 }
0x1e58   : > { %v3069_v35 = vpop.xlane.xlu0 %3068 }
0x1e59   : > { %v3070_v36 = vmul.f32 0.015625, %v3069_v35 }
0x1e5b   : > { %v3071_v37 = vadd.f32 1e-05, %v3070_v36 }
0x1e5d   : > { %6789 = vrsqrt.f32 %v3071_v37 }
0x1e67   : > { %v6790_v38 = vpop.eup %6789 }
0x1e68   : > { %v3073_v40 = vmul.f32 %v6790_v38, %v3065_v21 }
0x1e6a   : > { %v3080_v42 = vmul.f32 %v5836_v39, %v3073_v40 }
0x1e6c   : > { %v3087_v43 = vadd.f32 %v5837_v41, %v3080_v42 }
0x1e6e   : > { %v3097_v44 = vpack.c.bf16 %v3087_v43, %v3087_v43 }
0x1e70   : > { %5854 = vmatmul.mubr.msk.bf16.vlgmr.msra.gmra.mrb[44].mxu1 %vm638_vm3, %v3097_v44 }
0x1e71   : > { %6396 = vmatprep.mubr.msk.f32.mxu1 %vm6895_vm0, %v6894_v2 }
0x1f43   : > { %v3175_v47 = vpop.f32.mrb[44].mxu1 }
0x1f44   : > { %3183 = vrot.lane.b32.xlu1 %v3175_v47, %s8170_s27  ;;  %v7621_v48 = vpop.f32.mrb[45].mxu1 }
0x1f45   : > { %v3179_v49 = vpop.f32.mrb[46].mxu1 }
0x1f46   : > { %v3180_v52 = vpop.f32.mrb[47].mxu1 }
0x1f48   : > { %3345 = vrot.lane.b32.xlu1 %v3175_v47, %s8171_s20 }
0x1f4c   : > { %3515 = vrot.lane.b32.xlu1 %v3175_v47, %s8172_s23 }
0x1f50   : > { %3513 = vrot.lane.b32.xlu1 %v3175_v47, %s8175_s18 }
0x1f54   : > { %3682 = vrot.lane.b32.xlu1 %v3175_v47, %s8173_s30 }
0x1fb6   : > { %v3184_v53 = vpop.permute.xlu1 %3183 }
0x1fb7   : > { %6395 = vmatpush3.xpose.msk.msra.mxu1 %vm763_vm4, %v3184_v53 }
0x1fb8   : > { %6399 = vmatprep.subr.mxu1 %v6894_v2 }
0x1fba   : > { %6397 = vmatmul.mubr.msk.f32.vlgmr.msra.gmra.mrb[48].mxu1 %vm763_vm4, %v3175_v47  ;;  %v3346_v45 = vpop.permute.xlu1 %3345 }
0x1fbb   : > { %6400 = vmatpush3.msra.mxu1 %v7621_v48  ;;  %6401 = vmatprep.mubr.msk.f32.mxu1 %vm6895_vm0, %v6894_v2 }
0x1fbc   : > { %6404 = vmatprep.subr.mxu1 %v6894_v2 }
0x1fbe   : > { %v3516_v54 = vpop.permute.xlu1 %3515 }
0x1fbf   : > { %6415 = vmatpush3.xpose.msk.msra.mxu0 %vm763_vm4, %v3516_v54 }
0x1fc0   : > { %6424 = vmatprep.subr.mxu0 %v6894_v2 }
0x1fc2   : > { %v3514_v55 = vpop.permute.xlu1 %3513 }
0x1fc3   : > { %6417 = vmatmul.mubr.msk.f32.vlgmr.msra.gmra.mrb[24].mxu0 %vm763_vm4, %v3514_v55 }
0x1fc4   : > { %6426 = vmatprep.mubr.msk.f32.mxu0 %vm6895_vm0, %v6894_v2 }
0x1fc6   : > { %v3683_v56 = vpop.permute.xlu1 %3682 }
0x1fc7   : > { %6425 = vmatpush3.xpose.msk.msra.mxu0 %vm763_vm4, %v3683_v56 }
0x1fc8   : > { %6434 = vmatprep.subr.bf16.mxu0 %v6894_v2 }
0x208d   : > { %v3255_v57 = vpop.f32.mrb[48].mxu1 }
0x208e   : > { %v3259_v58 = vmul.f32 0.125, %v3255_v57  ;;  %v6398_v59 = vpop.f32.mrb[49].mxu1 }
0x208f   : > { %v6670_v59 = vld [vmem:[%s8117_s6 + $0x48] sm:$0xff]  }
0x2090   : > { %v3260_v60 = vsel %vm7148_vm5, %v3259_v58, -inf  ;;  %v6669_v58 = vld [vmem:[%s8117_s6 + $0x40] sm:$0xff]  }
0x2091   : > { %v3261_v61 = vsel %vm840_vm6, %v3260_v60, -inf }
0x2092   : > { %3262 = vmax.xlane.f32.xlu0 %v3261_v61  ;;  %v6672_v61 = vld [vmem:[%s8117_s6 + $0x58] sm:$0xff]  }
0x2096   : > { %v3587_v63 = vpop.f32.mrb[24].mxu0 }
0x2097   : > { %v6418_v0 = vpop.f32.mrb[25].mxu0  ;;  %v3591_v9 = vmul.f32 0.125, %v3587_v63 }
0x2099   : > { %v3592_v10 = vsel %vm7148_vm5, %v3591_v9, -inf }
0x209a   : > { %v3593_v11 = vsel %vm840_vm6, %v3592_v10, -inf }
0x211f   : > { %v3263_v3 = vpop.xlane.xlu0 %3262 }
0x2120   : > { %v3264_v4 = vsub.f32 %v3260_v60, %v3263_v3  ;;  %v6671_v60 = vld [vmem:[%s8117_s6 + $0x50] sm:$0xff]  }
0x2122   : > { %v3265_v6 = vmul.f32 1.442695, %v3264_v4 }
0x2124   : > { %6791 = vpow2.f32 %v3265_v6 }
0x212e   : > { %v6792_v7 = vpop.eup %6791 }
0x212f   : > { %v3267_v8 = vsel %vm840_vm6, %v6792_v7, 0.0 }
0x2130   : > { %3268 = vadd.xlane.f32.xlu0 %v3267_v8 }
0x2146   : > { %3347 = vrot.lane.b32.xlu0 %v3175_v47, %s8174_s29 }
0x214a   : > { %3680 = vrot.lane.b32.xlu0 %v3175_v47, %s8176_s26 }
0x2169   : > { %3594 = vmax.xlane.f32.xlu0 %v3593_v11 }
0x21bd   : > { %v3269_v12 = vpop.xlane.xlu0 %3268 }
0x21be   : > { %6793 = vrcp.f32 %v3269_v12 }
0x21c1   : > { %v3348_v13 = vpop.permute.xlu0 %3347 }
0x21c5   : > { %v3681_v50 = vpop.permute.xlu0 %3680 }
0x21c6   : > { %6427 = vmatmul.mubr.msk.f32.vlgmr.msra.gmra.mrb[26].mxu0 %vm763_vm4, %v3681_v50 }
0x21c7   : > { %6442 = vmatprep.mubr.msk.bf16.mxu0 %vm6895_vm0, %v6894_v2  ;;  %6435 = vmatpush3.bf16.msra.mxu0 %v6669_v58 }
0x21c8   : > { %v6794_v14 = vpop.eup %6793  ;;  %6436 = vmatprep.subr.bf16.mxu0 %v6894_v2 }
0x21c9   : > { %v3271_v15 = vmul.f32 %v6794_v14, %v6792_v7 }
0x21cb   : > { %6402 = vmatmul.mubr.msk.f32.vlgmr.msra.gmra.mrb[50].mxu1 %vm840_vm6, %v3271_v15  ;;  %6437 = vmatpush3.bf16.msra.mxu0 %v6670_v59  ;;  %v5881_v15 = vld [vmem:[%s8118_s7 + $0x2] ss:$0 sm:$0xff]  ;;  %v6697_v59 = vld [vmem:[%s8123_s12 + $0x170] sm:$0xff]  }
0x21cc   : > { %6405 = vmatpush3.xpose.msk.msra.mxu1 %vm763_vm4, %v3348_v13  ;;  %6406 = vmatprep.mubr.msk.f32.mxu1 %vm6895_vm0, %v6894_v2 }
0x21cd   : > { %6409 = vmatprep.subr.mxu1 %v6894_v2  ;;  %6438 = vmatprep.subr.bf16.mxu0 %v6894_v2 }
0x21cf   : > { %6407 = vmatmul.mubr.msk.f32.vlgmr.msra.gmra.mrb[52].mxu1 %vm763_vm4, %v3346_v45  ;;  %6439 = vmatpush3.bf16.msra.mxu0 %v6671_v60  ;;  %v6698_v60 = vld [vmem:[%s8123_s12 + $0x130] sm:$0xff]  }
0x21d0   : > { %6411 = vmatprep.mubr.msk.f32.mxu1 %vm6895_vm0, %v6894_v2  ;;  %6440 = vmatprep.subr.bf16.mxu0 %v6894_v2 }
0x21d3   : > { %6441 = vmatpush3.bf16.msra.mxu0 %v6672_v61  ;;  %v6699_v61 = vld [vmem:[%s8123_s12 + $0x178] sm:$0xff]  }
0x21f6   : > { %v3595_v16 = vpop.xlane.xlu0 %3594 }
0x21f7   : > { %v3596_v19 = vsub.f32 %v3592_v10, %v3595_v16 }
0x21f9   : > { %v3597_v18 = vmul.f32 1.442695, %v3596_v19 }
0x21fb   : > { %6795 = vpow2.f32 %v3597_v18 }
0x2205   : > { %v6796_v21 = vpop.eup %6795 }
0x2206   : > { %v3599_v28 = vsel %vm840_vm6, %v6796_v21, 0.0 }
0x2299   : > { %v3754_v22 = vpop.f32.mrb[26].mxu0 }
0x229a   : > { %v3758_v23 = vmul.f32 0.125, %v3754_v22  ;;  %v6428_v17 = vpop.f32.mrb[27].mxu0 }
0x229c   : > { %v3759_v25 = vsel %vm7148_vm5, %v3758_v23, -inf }
0x229d   : > { %v3760_v26 = vsel %vm840_vm6, %v3759_v25, -inf }
0x229e   : > { %3761 = vmax.xlane.f32.xlu0 %v3760_v26  ;;  %v7664_v27 = vpop.f32.mrb[50].mxu1 }
0x229f   : > { %v6403_v5 = vpop.f32.mrb[51].mxu1 }
0x22a2   : > { %3600 = vadd.xlane.f32.xlu0 %v3599_v28  ;;  %v3419_v20 = vpop.f32.mrb[52].mxu1  ;;  %v6673_v28 = vld [vmem:[%s8121_s10 + $0x80] ss:$8 sps:$4 sm:$0xff]  }
0x22a3   : > { %v3423_v29 = vmul.f32 0.125, %v3419_v20  ;;  %v6408_v30 = vpop.f32.mrb[53].mxu1  ;;  %v6678_v20 = vld [vmem:[%s8121_s10 + $0x94] ss:$8 sps:$4 sm:$0xff]  }
0x22a4   : > { %v6681_v30 = vld [vmem:[%s8121_s10 + $0xa4] ss:$8 sps:$4 sm:$0xff]  }
0x22a5   : > { %v3424_v31 = vsel %vm7148_vm5, %v3423_v29, -inf  ;;  %v6676_v29 = vld [vmem:[%s8121_s10 + $0x90] ss:$8 sps:$4 sm:$0xff]  }
0x22a6   : > { %v3425_v32 = vsel %vm840_vm6, %v3424_v31, -inf }
0x22a7   : > { %3426 = vmax.xlane.f32.xlu1 %v3425_v32  ;;  %v6684_v32 = vld [vmem:[%s8121_s10 + $0xb4] ss:$8 sps:$4 sm:$0xff]  }
0x22b8   : > { %3437 = vrot.lane.b32.xlu0 %v7621_v48, %s8171_s20 }
0x232b   : > { %v3762_v33 = vpop.xlane.xlu0 %3761 }
0x232c   : > { %v3763_v34 = vsub.f32 %v3759_v25, %v3762_v33  ;;  %v6682_v33 = vld [vmem:[%s8121_s10 + $0xb0] ss:$8 sps:$4 sm:$0xff]  }
0x232e   : > { %v3764_v35 = vmul.f32 1.442695, %v3763_v34  ;;  %v6685_v34 = vld [vmem:[%s8123_s12 + $0x140] sm:$0xff]  }
0x232f   : > { %v3601_v36 = vpop.xlane.xlu0 %3600  ;;  %6200 = vmatprep.subr.bf16.mxu0 %v6685_v34  ;;  %v6712_v34 = vld [vmem:[%s8116_s5 + $0xf4] ss:$8 sps:$4 sm:$0xff]  }
0x2330   : > { %6797 = vpow2.f32 %v3764_v35  ;;  %v6686_v35 = vld [vmem:[%s8123_s12 + $0x100] sm:$0xff]  }
0x2333   : > { %v3438_v37 = vpop.permute.xlu0 %3437 }
0x2334   : > { %6410 = vmatpush3.msra.mxu1 %v3438_v37  ;;  %v3427_v40 = vpop.xlane.xlu1 %3426  ;;  %v6688_v37 = vld [vmem:[%s8123_s12 + $0x108] sm:$0xff]  }
0x2335   : > { %6419 = vmatprep.subr.mxu1 %v6894_v2  ;;  %v3428_v41 = vsub.f32 %v3424_v31, %v3427_v40  ;;  %v6679_v31 = vld [vmem:[%s8121_s10 + $0xa0] ss:$8 sps:$4 sm:$0xff]   ;;  %v6691_v40 = vld [vmem:[%s8123_s12 + $0x158] sm:$0xff]  }
0x2337   : > { %v3429_v42 = vmul.f32 1.442695, %v3428_v41  ;;  %v6692_v41 = vld [vmem:[%s8123_s12 + $0x118] sm:$0xff]  }
0x2339   : > { %6799 = vpow2.f32 %v3429_v42  ;;  %v6693_v42 = vld [vmem:[%s8123_s12 + $0x160] sm:$0xff]  }
0x233a   : > { %v6798_v38 = vpop.eup %6797 }
0x233b   : > { %v3766_v39 = vsel %vm840_vm6, %v6798_v38, 0.0 }
0x233c   : > { %3767 = vadd.xlane.f32.xlu1 %v3766_v39  ;;  %v6690_v39 = vld [vmem:[%s8123_s12 + $0x110] sm:$0xff]  }
0x2343   : > { %v6800_v43 = vpop.eup %6799 }
0x2344   : > { %v3431_v44 = vsel %vm840_vm6, %v6800_v43, 0.0 }
0x234d   : > { %3604 = vrot.lane.b32.xlu1 %v7621_v48, %s8175_s18 }
0x2371   : > { %3432 = vadd.xlane.f32.xlu1 %v3431_v44  ;;  %v6695_v44 = vld [vmem:[%s8123_s12 + $0x168] sm:$0xff]  }
0x2382   : > { %3771 = vrot.lane.b32.xlu1 %v7621_v48, %s8176_s26 }
0x23c9   : > { %v3768_v47 = vpop.xlane.xlu1 %3767 }
0x23cd   : > { %v3605_v49 = vpop.permute.xlu1 %3604 }
0x23fe   : > { %v3433_v52 = vpop.xlane.xlu1 %3432 }
0x23ff   : > { %6801 = vrcp.f32 %v3433_v52 }
0x2400   : > { %6803 = vrcp.f32 %v3601_v36  ;;  %v6687_v36 = vld [vmem:[%s8123_s12 + $0x148] sm:$0xff]  }
0x2401   : > { %6805 = vrcp.f32 %v3768_v47  ;;  %v6696_v47 = vld [vmem:[%s8123_s12 + $0x128] sm:$0xff]  }
0x2402   : > { %v3772_v48 = vpop.permute.xlu1 %3771 }
0x2409   : > { %v6802_v53 = vpop.eup %6801 }
0x240a   : > { %v3435_v45 = vmul.f32 %v6802_v53, %v6800_v43  ;;  %v6804_v54 = vpop.eup %6803  ;;  %v6694_v43 = vld [vmem:[%s8123_s12 + $0x120] sm:$0xff]  }
0x240b   : > { %v3603_v55 = vmul.f32 %v6804_v54, %v6796_v21  ;;  %v6806_v56 = vpop.eup %6805  ;;  %v5884_v54 = vld [vmem:[%s8119_s8 + $0x2] ss:$0 sm:$0xff] }
0x240c   : > { %6412 = vmatmul.mubr.msk.f32.vlgmr.msra.gmra.mrb[54].mxu1 %vm840_vm6, %v3435_v45  ;;  %v3770_v57 = vmul.f32 %v6806_v56, %v6798_v38  ;;  %v6689_v38 = vld [vmem:[%s8123_s12 + $0x150] sm:$0xff]   ;;  %v5885_v56 = vld [vmem:[%s8120_s9 + $0x2] ss:$0 sm:$0xff] }
0x240d   : > { %6420 = vmatpush3.msra.mxu1 %v3605_v49  ;;  %6421 = vmatprep.mubr.msk.f32.mxu1 %vm6895_vm0, %v6894_v2 }
0x240e   : > { %6429 = vmatprep.subr.mxu1 %v6894_v2 }
0x2410   : > { %6422 = vmatmul.mubr.msk.f32.vlgmr.msra.gmra.mrb[56].mxu1 %vm840_vm6, %v3603_v55 }
0x2411   : > { %6430 = vmatpush3.msra.mxu1 %v3772_v48  ;;  %6431 = vmatprep.mubr.msk.f32.mxu1 %vm6895_vm0, %v6894_v2 }
0x2414   : > { %6432 = vmatmul.mubr.msk.f32.vlgmr.msra.gmra.mrb[58].mxu1 %vm840_vm6, %v3770_v57 }
0x2415   : > { %4078 = vmatprep.mubr.bf16.mxu1 %v6893_v1 }
0x24df   : > { %v3509_v63 = vpop.f32.mrb[54].mxu1 }
0x24e0   : > { %3848 = vrot.lane.b32.xlu0 %v3509_v63, %s8173_s30  ;;  %v6413_v0 = vpop.f32.mrb[55].mxu1  ;;  %v6700_v63 = vld [vmem:[%s8123_s12 + $0x138] sm:$0xff]  }
0x24e1   : > { %v5894_v0 = vld [vmem:[%s8122_s11 + $0x4] sm:$0x3] }
0x24e3   : > { %v3676_v3 = vpop.f32.mrb[56].mxu1 }
0x24e4   : > { %3852 = vrot.lane.b32.xlu1 %v3676_v3, %s8172_s23  ;;  %v6423_v4 = vpop.f32.mrb[57].mxu1  ;;  %v3996_v3 = vrot.slane %v5894_v0, %v7331_v46 }
0x24e5   : > { %v4000_v4 = vrot.slane %v5894_v0, %v7337_v62 }
0x24e7   : > { %v3843_v6 = vpop.f32.mrb[58].mxu1 }
0x24e8   : > { %3856 = vrot.lane.b32.xlu0 %v3843_v6, %s8174_s29  ;;  %v6433_v7 = vpop.f32.mrb[59].mxu1 }
0x2552   : > { %v3849_v8 = vpop.permute.xlu0 %3848 }
0x2553   : > { %v3859_v10 = vsel %vm763_vm4, %v7664_v27, %v3849_v8 }
0x2556   : > { %v3853_v9 = vpop.permute.xlu1 %3852 }
0x2557   : > { %v3860_v11 = vsel %vm1440_vm7, %v3859_v10, %v3853_v9 }
0x255a   : > { %v3857_v12 = vpop.permute.xlu0 %3856 }
0x255b   : > { %v3861_v13 = vsel %vm1442_vm8, %v3860_v11, %v3857_v12 }
0x255c   : > { %v3871_v50 = vpack.c.bf16 %v3861_v13, %v3861_v13 }
0x255e   : > { %6443 = vmatmul.mubr.msk.bf16.vlgmr.msra.gmra.mrb[28].mxu0 %vm638_vm3, %v3871_v50 }
0x255f   : > { %6201 = vmatpush3.bf16.msra.mxu0 %v6686_v35  ;;  %v6710_v35 = vld [vmem:[%s8116_s5 + $0xf0] ss:$8 sps:$4 sm:$0xff]  }
0x2560   : > { %6202 = vmatprep.subr.bf16.mxu0 %v6687_v36 }
0x2563   : > { %6203 = vmatpush3.bf16.msra.mxu0 %v6688_v37 }
0x2564   : > { %6204 = vmatprep.subr.bf16.mxu0 %v6689_v38 }
0x2567   : > { %6205 = vmatpush3.bf16.msra.mxu0 %v6690_v39 }
0x2568   : > { %6206 = vmatprep.subr.bf16.mxu0 %v6691_v40  ;;  %v5956_v40 = vld [vmem:[%s8114_s3 + $0x3] ss:$0 sm:$0xff] }
0x256b   : > { %6207 = vmatpush3.bf16.msra.mxu0 %v6692_v41 }
0x256c   : > { %6208 = vmatprep.subr.bf16.mxu0 %v6693_v42  ;;  %v5957_v42 = vld [vmem:[%s8115_s4 + $0x3] ss:$0 sm:$0xff] }
0x256f   : > { %6209 = vmatpush3.bf16.msra.mxu0 %v6694_v43 }
0x2570   : > { %6210 = vmatprep.subr.bf16.mxu0 %v6695_v44 }
0x2573   : > { %6211 = vmatpush3.bf16.msra.mxu0 %v6696_v47 }
0x2574   : > { %6212 = vmatprep.subr.bf16.mxu0 %v6697_v59 }
0x2577   : > { %6213 = vmatpush3.bf16.msra.mxu0 %v6698_v60 }
0x2578   : > { %6214 = vmatprep.subr.bf16.mxu0 %v6699_v61 }
0x257b   : > { %6215 = vmatpush3.bf16.msra.mxu0 %v6700_v63 }
0x257c   : > { %6466 = vmatprep.subr.mxu0 %v6894_v2 }
0x2631   : > { %v3933_v14 = vpop.f32.mrb[28].mxu0 }
0x2632   : > { %v3939_v16 = vadd.f32 %v3933_v14, %v7580_v24  ;;  %v6444_v19 = vpop.f32.mrb[29].mxu0  ;;  %v6675_v24 = vld [vmem:[%s8121_s10 + $0x84] ss:$8 sps:$4 sm:$0xff]  }
0x2633   : > { %v3936_v18 = vpop.f32.mrb[30].mxu0  ;;  %4046 = vmatprep.subr.bf16.mxu1 %v6675_v24 }
0x2634   : > { %v7715_v22 = vadd.f32 %v5881_v15, %v3939_v16  ;;  %v6445_v23 = vpop.f32.mrb[31].mxu0  ;;  %4047 = vmatpush1.bf16.msra.mxu1 %v6673_v28 }
0x2635   : > { %4048 = vmatprep.subr.bf16.mxu1 %v6678_v20  ;;  %v5953_v23 = vld [vmem:[%s8124_s13 + $0x2] ss:$0 sm:$0xff] }
0x2636   : > { %v3953_v17 = vsel %vm638_vm3, %v7715_v22, 0.0 }
0x2637   : > { %3954 = vadd.xlane.f32.xlu1 %v3953_v17 }
0x2638   : > { %4049 = vmatpush1.bf16.msra.mxu1 %v6676_v29  ;;  %v6703_v29 = vld [vmem:[%s8116_s5 + $0xc4] ss:$8 sps:$4 sm:$0xff]  }
0x2639   : > { %4050 = vmatprep.subr.bf16.mxu1 %v6681_v30  ;;  %v6706_v30 = vld [vmem:[%s8116_s5 + $0xd4] ss:$8 sps:$4 sm:$0xff]  }
0x263c   : > { %4051 = vmatpush1.bf16.msra.mxu1 %v6679_v31  ;;  %v6704_v31 = vld [vmem:[%s8116_s5 + $0xd0] ss:$8 sps:$4 sm:$0xff]  }
0x263d   : > { %4052 = vmatprep.subr.bf16.mxu1 %v6684_v32  ;;  %v6709_v32 = vld [vmem:[%s8116_s5 + $0xe4] ss:$8 sps:$4 sm:$0xff]  }
0x2640   : > { %4053 = vmatpush1.bf16.msra.mxu1 %v6682_v33  ;;  %v6707_v33 = vld [vmem:[%s8116_s5 + $0xe0] ss:$8 sps:$4 sm:$0xff]  }
0x2641   : > { %4354 = vmatprep.subr.bf16.mxu1 %v6703_v29 }
0x26c4   : > { %v3955_v25 = vpop.xlane.xlu1 %3954 }
0x26c5   : > { %v3956_v26 = vmul.f32 0.015625, %v3955_v25 }
0x26c7   : > { %v3957_v21 = vsub.f32 %v7715_v22, %v3956_v26 }
0x26c9   : > { %v3958_v27 = vmul.f32 %v3957_v21, %v3957_v21 }
0x26cb   : > { %v3959_v5 = vsel %vm638_vm3, %v3958_v27, 0.0 }
0x26cc   : > { %3960 = vadd.xlane.f32.xlu0 %v3959_v5 }
0x2759   : > { %v3961_v49 = vpop.xlane.xlu0 %3960 }
0x275a   : > { %v3962_v52 = vmul.f32 0.015625, %v3961_v49 }
0x275c   : > { %v3963_v53 = vadd.f32 1e-05, %v3962_v52 }
0x275e   : > { %6807 = vrsqrt.f32 %v3963_v53 }
0x2768   : > { %v6808_v45 = vpop.eup %6807 }
0x2769   : > { %v3965_v55 = vmul.f32 %v6808_v45, %v3957_v21 }
0x276b   : > { %v3972_v48 = vmul.f32 %v5884_v54, %v3965_v55 }
0x276d   : > { %v3979_v57 = vadd.f32 %v5885_v56, %v3972_v48 }
0x276f   : > { %v3989_v58 = vpack.c.bf16 %v3979_v57, %v3979_v57 }
0x2771   : > { %5903 = vmatmul.mubr.msk.bf16.vlgmr.msra.gmra.mrb[60].mxu1 %vm638_vm3, %v3989_v58 }
0x2772   : > { %4386 = vmatprep.mubr.bf16.mxu1 %v6893_v1 }
0x2844   : > { %v4080_v6 = vpop.f32.mrb[60].mxu1 }
0x2845   : > { %v4081_v7 = vadd.f32 %v4080_v6, %v3996_v3  ;;  %v4082_v8 = vpop.f32.mrb[61].mxu1 }
0x2846   : > { %v4083_v9 = vadd.f32 %v4082_v8, %v4000_v4  ;;  %v4084_v10 = vpop.f32.mrb[62].mxu1 }
0x2847   : > { %v4087_v11 = vmax.f32 %v4081_v7, 0.0  ;;  %v4085_v12 = vpop.f32.mrb[63].mxu1 }
0x2848   : > { %v4088_v13 = vmax.f32 %v4083_v9, 0.0 }
0x2849   : > { %v4122_v14 = vpack.c.bf16 %v4087_v11, %v4087_v11 }
0x284a   : > { %v4123_v50 = vpack.c.bf16 %v4088_v13, %v4088_v13 }
0x284c   : > { %4252 = vmatprep.mubr.bf16.mxu0 %v4123_v50 }
0x284d   : > { %4253 = vmatmul.mubr.bf16.vlgmr.msra.gmra.mrb[32].mxu0 %v4122_v14 }
0x284e   : > { %6468 = vmatprep.mubr.msk.f32.mxu0 %vm6895_vm0, %v6894_v2 }
0x2920   : > { %v6216_v15 = vpop.f32.mrb[32].mxu0 }
0x2921   : > { %v6217_v16 = vpop.f32.mrb[33].mxu0 }
0x2922   : > { %v6218_v19 = vadd.f32 %v6217_v16, %v6216_v15  ;;  %v6219_v18 = vpop.f32.mrb[34].mxu0 }
0x2923   : > { %v6220_v17 = vpop.f32.mrb[35].mxu0 }
0x2924   : > { %v4260_v25 = vadd.f32 %v6218_v19, %v7715_v22  ;;  %v6701_v22 = vld [vmem:[%s8116_s5 + $0xc0] ss:$8 sps:$4 sm:$0xff]  }
0x2925   : > { %4355 = vmatpush1.bf16.msra.mxu1 %v6701_v22 }
0x2926   : > { %v7813_v26 = vadd.f32 %v5953_v23, %v4260_v25  ;;  %4356 = vmatprep.subr.bf16.mxu1 %v6706_v30 }
0x2928   : > { %v4274_v21 = vsel %vm638_vm3, %v7813_v26, 0.0 }
0x2929   : > { %4275 = vadd.xlane.f32.xlu0 %v4274_v21  ;;  %4357 = vmatpush1.bf16.msra.mxu1 %v6704_v31 }
0x292a   : > { %4358 = vmatprep.subr.bf16.mxu1 %v6709_v32 }
0x292d   : > { %4359 = vmatpush1.bf16.msra.mxu1 %v6707_v33 }
0x292e   : > { %4360 = vmatprep.subr.bf16.mxu1 %v6712_v34 }
0x2931   : > { %4361 = vmatpush1.bf16.msra.mxu1 %v6710_v35 }
0x2932   : > { %6446 = vmatprep.subr.mxu1 %v6894_v2 }
0x29b6   : > { %v4276_v27 = vpop.xlane.xlu0 %4275 }
0x29b7   : > { %v4277_v5 = vmul.f32 0.015625, %v4276_v27 }
0x29b9   : > { %v4278_v24 = vsub.f32 %v7813_v26, %v4277_v5 }
0x29bb   : > { %v4279_v28 = vmul.f32 %v4278_v24, %v4278_v24 }
0x29bd   : > { %v4280_v20 = vsel %vm638_vm3, %v4279_v28, 0.0 }
0x29be   : > { %4281 = vadd.xlane.f32.xlu1 %v4280_v20 }
0x2a4b   : > { %v4282_v36 = vpop.xlane.xlu1 %4281 }
0x2a4c   : > { %v4283_v37 = vmul.f32 0.015625, %v4282_v36 }
0x2a4e   : > { %v4284_v38 = vadd.f32 1e-05, %v4283_v37 }
0x2a50   : > { %6809 = vrsqrt.f32 %v4284_v38 }
0x2a5a   : > { %v6810_v39 = vpop.eup %6809 }
0x2a5b   : > { %v4286_v41 = vmul.f32 %v6810_v39, %v4278_v24 }
0x2a5d   : > { %v4293_v43 = vmul.f32 %v5956_v40, %v4286_v41 }
0x2a5f   : > { %v4300_v44 = vadd.f32 %v5957_v42, %v4293_v43 }
0x2a61   : > { %v4310_v47 = vpack.c.bf16 %v4300_v44, %v4300_v44 }
0x2a63   : > { %5974 = vmatmul.mubr.msk.bf16.vlgmr.msra.gmra.mrb[64].mxu1 %vm638_vm3, %v4310_v47 }
0x2a64   : > { %6448 = vmatprep.mubr.msk.f32.mxu1 %vm6895_vm0, %v6894_v2 }
0x2b36   : > { %v4388_v49 = vpop.f32.mrb[64].mxu1 }
0x2b37   : > { %4396 = vrot.lane.b32.xlu0 %v4388_v49, %s8170_s27  ;;  %v7854_v52 = vpop.f32.mrb[65].mxu1  ;;  %s8179_s27 = sld [smem:[#allocation16_spill]] }
0x2b38   : > { %v4392_v53 = vpop.f32.mrb[66].mxu1 }
0x2b39   : > { %v4393_v45 = vpop.f32.mrb[67].mxu1 }
0x2b3b   : > { %4558 = vrot.lane.b32.xlu0 %v4388_v49, %s8171_s20 }
0x2b3f   : > { %4728 = vrot.lane.b32.xlu0 %v4388_v49, %s8172_s23 }
0x2b43   : > { %4895 = vrot.lane.b32.xlu0 %v4388_v49, %s8173_s30 }
0x2ba9   : > { %v4397_v54 = vpop.permute.xlu0 %4396 }
0x2baa   : > { %6447 = vmatpush3.xpose.msk.msra.mxu1 %vm763_vm4, %v4397_v54 }
0x2bab   : > { %6451 = vmatprep.subr.mxu1 %v6894_v2 }
0x2bad   : > { %6449 = vmatmul.mubr.msk.f32.vlgmr.msra.gmra.mrb[68].mxu1 %vm763_vm4, %v4388_v49  ;;  %v4559_v55 = vpop.permute.xlu0 %4558 }
0x2bae   : > { %6452 = vmatpush3.msra.mxu1 %v7854_v52  ;;  %6453 = vmatprep.mubr.msk.f32.mxu1 %vm6895_vm0, %v6894_v2 }
0x2baf   : > { %6456 = vmatprep.subr.mxu1 %v6894_v2 }
0x2bb1   : > { %v4729_v56 = vpop.permute.xlu0 %4728 }
0x2bb2   : > { %6467 = vmatpush3.xpose.msk.msra.mxu0 %vm763_vm4, %v4729_v56 }
0x2bb3   : > { %6476 = vmatprep.subr.mxu0 %v6894_v2 }
0x2bb5   : > { %v4896_v9 = vpop.permute.xlu0 %4895 }
0x2c80   : > { %v4468_v48 = vpop.f32.mrb[68].mxu1 }
0x2c81   : > { %v4472_v57 = vmul.f32 0.125, %v4468_v48  ;;  %v6450_v58 = vpop.f32.mrb[69].mxu1 }
0x2c82   : > { %v6713_v58 = vld [vmem:[%s8117_s6 + $0x60] sm:$0xff]  }
0x2c83   : > { %v4473_v59 = vsel %vm7148_vm5, %v4472_v57, -inf }
0x2c84   : > { %v4474_v60 = vsel %vm840_vm6, %v4473_v59, -inf }
0x2c85   : > { %4475 = vmax.xlane.f32.xlu1 %v4474_v60  ;;  %v6715_v60 = vld [vmem:[%s8117_s6 + $0x70] sm:$0xff]  }
0x2c96   : > { %4560 = vrot.lane.b32.xlu1 %v4388_v49, %s8174_s29 }
0x2d12   : > { %v4476_v61 = vpop.xlane.xlu1 %4475 }
0x2d13   : > { %v4477_v63 = vsub.f32 %v4473_v59, %v4476_v61  ;;  %v6714_v59 = vld [vmem:[%s8117_s6 + $0x68] sm:$0xff]  }
0x2d15   : > { %v4478_v0 = vmul.f32 1.442695, %v4477_v63 }
0x2d16   : > { %v4561_v6 = vpop.permute.xlu1 %4560 }
0x2d17   : > { %6811 = vpow2.f32 %v4478_v0 }
0x2d21   : > { %v6812_v3 = vpop.eup %6811 }
0x2d22   : > { %v4480_v4 = vsel %vm840_vm6, %v6812_v3, 0.0 }
0x2d23   : > { %4481 = vadd.xlane.f32.xlu1 %v4480_v4 }
0x2d34   : > { %4726 = vrot.lane.b32.xlu1 %v4388_v49, %s8175_s18 }
0x2d38   : > { %4893 = vrot.lane.b32.xlu1 %v4388_v49, %s8176_s26 }
0x2db0   : > { %v4482_v7 = vpop.xlane.xlu1 %4481 }
0x2db1   : > { %6813 = vrcp.f32 %v4482_v7 }
0x2db4   : > { %v4727_v8 = vpop.permute.xlu1 %4726 }
0x2db5   : > { %6469 = vmatmul.mubr.msk.f32.vlgmr.msra.gmra.mrb[36].mxu0 %vm763_vm4, %v4727_v8 }
0x2db6   : > { %6477 = vmatpush3.xpose.msk.msra.mxu0 %vm763_vm4, %v4896_v9  ;;  %6478 = vmatprep.mubr.msk.f32.mxu0 %vm6895_vm0, %v6894_v2 }
0x2db7   : > { %6486 = vmatprep.subr.bf16.mxu0 %v6894_v2 }
0x2db8   : > { %v4894_v10 = vpop.permute.xlu1 %4893 }
0x2db9   : > { %6479 = vmatmul.mubr.msk.f32.vlgmr.msra.gmra.mrb[38].mxu0 %vm763_vm4, %v4894_v10 }
0x2dba   : > { %6494 = vmatprep.mubr.msk.bf16.mxu0 %vm6895_vm0, %v6894_v2  ;;  %6487 = vmatpush3.bf16.msra.mxu0 %v6713_v58  ;;  %v6742_v58 = vld [vmem:[%s8123_s12 + $0x1b0] sm:$0xff]  }
0x2dbb   : > { %v6814_v11 = vpop.eup %6813  ;;  %6488 = vmatprep.subr.bf16.mxu0 %v6894_v2 }
0x2dbc   : > { %v4484_v12 = vmul.f32 %v6814_v11, %v6812_v3 }
0x2dbe   : > { %6454 = vmatmul.mubr.msk.f32.vlgmr.msra.gmra.mrb[70].mxu1 %vm840_vm6, %v4484_v12  ;;  %6489 = vmatpush3.bf16.msra.mxu0 %v6714_v59  ;;  %v6743_v59 = vld [vmem:[%s8123_s12 + $0x1f8] sm:$0xff]  }
0x2dbf   : > { %6457 = vmatpush3.xpose.msk.msra.mxu1 %vm763_vm4, %v4561_v6  ;;  %6458 = vmatprep.mubr.msk.f32.mxu1 %vm6895_vm0, %v6894_v2 }
0x2dc0   : > { %6461 = vmatprep.subr.mxu1 %v6894_v2  ;;  %6490 = vmatprep.subr.bf16.mxu0 %v6894_v2 }
0x2dc2   : > { %6459 = vmatmul.mubr.msk.f32.vlgmr.msra.gmra.mrb[72].mxu1 %vm763_vm4, %v4559_v55  ;;  %6491 = vmatpush3.bf16.msra.mxu0 %v6715_v60  ;;  %v6744_v60 = vld [vmem:[%s8123_s12 + $0x1b8] sm:$0xff]  }
0x2dc3   : > { %6463 = vmatprep.mubr.msk.f32.mxu1 %vm6895_vm0, %v6894_v2  ;;  %6492 = vmatprep.subr.bf16.mxu0 %v6894_v2 }
0x2e88   : > { %v4800_v13 = vpop.f32.mrb[36].mxu0 }
0x2e89   : > { %v4804_v50 = vmul.f32 0.125, %v4800_v13  ;;  %v6470_v14 = vpop.f32.mrb[37].mxu0 }
0x2e8a   : > { %v6001_v14 = vld [vmem:[%s8118_s7 + $0x3] ss:$0 sm:$0xff] }
0x2e8b   : > { %v4805_v15 = vsel %vm7148_vm5, %v4804_v50, -inf }
0x2e8c   : > { %v4967_v16 = vpop.f32.mrb[38].mxu0  ;;  %v4806_v19 = vsel %vm840_vm6, %v4805_v15, -inf }
0x2e8d   : > { %4807 = vmax.xlane.f32.xlu1 %v4806_v19  ;;  %v6480_v18 = vpop.f32.mrb[39].mxu0  ;;  %v4971_v21 = vmul.f32 0.125, %v4967_v16 }
0x2e8f   : > { %v4972_v20 = vsel %vm7148_vm5, %v4971_v21, -inf }
0x2e90   : > { %v4973_v29 = vsel %vm840_vm6, %v4972_v20, -inf }
0x2e91   : > { %v7894_v23 = vpop.f32.mrb[70].mxu1 }
0x2e92   : > { %v6455_v17 = vpop.f32.mrb[71].mxu1 }
0x2e95   : > { %v4632_v25 = vpop.f32.mrb[72].mxu1 }
0x2e96   : > { %v4636_v27 = vmul.f32 0.125, %v4632_v25  ;;  %v6460_v5 = vpop.f32.mrb[73].mxu1 }
0x2e98   : > { %v4637_v24 = vsel %vm7148_vm5, %v4636_v27, -inf }
0x2e99   : > { %v4638_v28 = vsel %vm840_vm6, %v4637_v24, -inf }
0x2e9a   : > { %4639 = vmax.xlane.f32.xlu0 %v4638_v28  ;;  %v6717_v28 = vld [vmem:[%s8121_s10 + $0xc0] ss:$8 sps:$4 sm:$0xff]  }
0x2e9e   : > { %4974 = vmax.xlane.f32.xlu0 %v4973_v29  ;;  %v6720_v29 = vld [vmem:[%s8121_s10 + $0xd0] ss:$8 sps:$4 sm:$0xff]  }
0x2f1a   : > { %v4808_v22 = vpop.xlane.xlu1 %4807 }
0x2f1b   : > { %v4809_v30 = vsub.f32 %v4805_v15, %v4808_v22  ;;  %v6725_v22 = vld [vmem:[%s8121_s10 + $0xe4] ss:$8 sps:$4 sm:$0xff]  }
0x2f1d   : > { %v4810_v31 = vmul.f32 1.442695, %v4809_v30  ;;  %v6723_v30 = vld [vmem:[%s8121_s10 + $0xe0] ss:$8 sps:$4 sm:$0xff]  }
0x2f1f   : > { %6815 = vpow2.f32 %v4810_v31  ;;  %v6726_v31 = vld [vmem:[%s8121_s10 + $0xf0] ss:$8 sps:$4 sm:$0xff]  }
0x2f27   : > { %v4640_v32 = vpop.xlane.xlu0 %4639 }
0x2f28   : > { %v4641_v34 = vsub.f32 %v4637_v24, %v4640_v32  ;;  %v6728_v32 = vld [vmem:[%s8121_s10 + $0xf4] ss:$8 sps:$4 sm:$0xff]  }
0x2f29   : > { %v6816_v33 = vpop.eup %6815 }
0x2f2a   : > { %v4812_v35 = vsel %vm840_vm6, %v6816_v33, 0.0  ;;  %v4642_v38 = vmul.f32 1.442695, %v4641_v34  ;;  %v6730_v34 = vld [vmem:[%s8123_s12 + $0x180] sm:$0xff]  }
0x2f2b   : > { %4813 = vadd.xlane.f32.xlu1 %v4812_v35  ;;  %v4975_v36 = vpop.xlane.xlu0 %4974  ;;  %v6731_v35 = vld [vmem:[%s8123_s12 + $0x1c8] sm:$0xff]  }
0x2f2c   : > { %v4976_v37 = vsub.f32 %v4972_v20, %v4975_v36  ;;  %v6722_v20 = vld [vmem:[%s8121_s10 + $0xd4] ss:$8 sps:$4 sm:$0xff]   ;;  %v6732_v36 = vld [vmem:[%s8123_s12 + $0x188] sm:$0xff]  }
0x2f2e   : > { %v4977_v39 = vmul.f32 1.442695, %v4976_v37  ;;  %v6733_v37 = vld [vmem:[%s8123_s12 + $0x1d0] sm:$0xff]  }
0x2f30   : > { %6817 = vpow2.f32 %v4977_v39  ;;  %v6735_v39 = vld [vmem:[%s8123_s12 + $0x1d8] sm:$0xff]  }
0x2f31   : > { %6819 = vpow2.f32 %v4642_v38  ;;  %v6734_v38 = vld [vmem:[%s8123_s12 + $0x190] sm:$0xff]  }
0x2f3a   : > { %v6818_v51 = vpop.eup %6817 }
0x2f3b   : > { %v4979_v40 = vsel %vm840_vm6, %v6818_v51, 0.0  ;;  %v6820_v41 = vpop.eup %6819 }
0x2f3c   : > { %4650 = vrot.lane.b32.xlu1 %v7854_v52, %s8171_s20  ;;  %4980 = vadd.xlane.f32.xlu0 %v4979_v40  ;;  %v4644_v42 = vsel %vm840_vm6, %v6820_v41, 0.0  ;;  %v6737_v40 = vld [vmem:[%s8123_s12 + $0x1e0] sm:$0xff]   ;;  %s8069_s20 = scalar_lea.hbm %s8179_s27, %s6081_s2 }
0x2f40   : > { %4984 = vrot.lane.b32.xlu1 %v7854_v52, %s8176_s26  ;;  %4645 = vadd.xlane.f32.xlu0 %v4644_v42  ;;  %v6739_v42 = vld [vmem:[%s8123_s12 + $0x1e8] sm:$0xff]   ;;  %s6904_s26 = smov [#allocation2]  }
0x2f41   : > { %s6833_s19 = sshll.u32 %s6904_s26, 4  ;;  %s6834_s19 = int_to_ptr.vmem [resolvable:$false] %s6833_s19 }
0x2f42   : > { %s6835_s17 = scalar_lea.vmem %s6834_s19, 256  ;;  %p6836_p0 = scmp.lt.s32.totalorder %s8071_s0, %s6834_s19 }
0x2f43   : > { %p6837_p1 = scmp.lt.s32.totalorder %s6835_s17, %s6829_s25 }
0x2f45   : > { %p6838_p2 = por %p6837_p1, %p6836_p0 }
0x2f47   : > { %p6839_p3 = pnand %p6838_p2, %p6832_p13 }
0x2f56   : > { %4817 = vrot.lane.b32.xlu0 %v7854_v52, %s8175_s18  ;;  %s5568_s18 = scalar_lea.sflag [#allocation3], %s510_s28 }
0x2fb8   : > { %v4814_v43 = vpop.xlane.xlu1 %4813 }
0x2fbc   : > { %v4651_v44 = vpop.permute.xlu1 %4650 }
0x2fbd   : > { %6462 = vmatpush3.msra.mxu1 %v4651_v44 }
0x2fbe   : > { %6471 = vmatprep.subr.mxu1 %v6894_v2 }
0x2fc0   : > { %v4985_v48 = vpop.permute.xlu1 %4984 }
0x2fc9   : > { %v4981_v47 = vpop.xlane.xlu0 %4980 }
0x2fcd   : > { %v4646_v49 = vpop.xlane.xlu0 %4645 }
0x2fce   : > { %6821 = vrcp.f32 %v4646_v49 }
0x2fcf   : > { %6823 = vrcp.f32 %v4814_v43  ;;  %v6740_v43 = vld [vmem:[%s8123_s12 + $0x1a8] sm:$0xff]  }
0x2fd0   : > { %6825 = vrcp.f32 %v4981_v47 }
0x2fd1   : > { %v4818_v55 = vpop.permute.xlu0 %4817 }
0x2fd8   : > { %v6822_v53 = vpop.eup %6821 }
0x2fd9   : > { %v4648_v45 = vmul.f32 %v6822_v53, %v6820_v41  ;;  %v6824_v54 = vpop.eup %6823  ;;  %v6738_v41 = vld [vmem:[%s8123_s12 + $0x1a0] sm:$0xff]  }
0x2fda   : > { %v4816_v52 = vmul.f32 %v6824_v54, %v6816_v33  ;;  %v6826_v56 = vpop.eup %6825  ;;  %v6729_v33 = vld [vmem:[%s8123_s12 + $0x1c0] sm:$0xff]  }
0x2fdb   : > { %6464 = vmatmul.mubr.msk.f32.vlgmr.msra.gmra.mrb[74].mxu1 %vm840_vm6, %v4648_v45  ;;  %v4983_v57 = vmul.f32 %v6826_v56, %v6818_v51  ;;  %v6736_v51 = vld [vmem:[%s8123_s12 + $0x198] sm:$0xff]   ;;  %v6004_v45 = vld [vmem:[%s8119_s8 + $0x3] ss:$0 sm:$0xff] }
0x2fdc   : > { %6472 = vmatpush3.msra.mxu1 %v4818_v55  ;;  %6473 = vmatprep.mubr.msk.f32.mxu1 %vm6895_vm0, %v6894_v2  ;;  %v6005_v55 = vld [vmem:[%s8120_s9 + $0x3] ss:$0 sm:$0xff] }
0x2fdd   : > { %6481 = vmatprep.subr.mxu1 %v6894_v2 }
0x2fdf   : > { %6474 = vmatmul.mubr.msk.f32.vlgmr.msra.gmra.mrb[76].mxu1 %vm840_vm6, %v4816_v52 }
0x2fe0   : > { %6482 = vmatpush3.msra.mxu1 %v4985_v48  ;;  %6483 = vmatprep.mubr.msk.f32.mxu1 %vm6895_vm0, %v6894_v2 }
0x2fe3   : > { %6484 = vmatmul.mubr.msk.f32.vlgmr.msra.gmra.mrb[78].mxu1 %vm840_vm6, %v4983_v57  ;;  %v6741_v57 = vld [vmem:[%s8123_s12 + $0x1f0] sm:$0xff]  }
0x2fe4   : > { %5291 = vmatprep.mubr.bf16.mxu1 %v6893_v1  ;;  %v6716_v1 = vld [vmem:[%s8117_s6 + $0x78] sm:$0xff]  }
0x2fe5   : > { %6493 = vmatpush3.bf16.msra.mxu0 %v6716_v1  ;;  %v6745_v1 = vld [vmem:[%s8125_s14] sm:$0xff]  }
0x2fe6   : > { %6243 = vmatprep.subr.bf16.mxu0 %v6729_v33 }
0x30ae   : > { %v4722_v61 = vpop.f32.mrb[74].mxu1 }
0x30af   : > { %5061 = vrot.lane.b32.xlu1 %v4722_v61, %s8173_s30  ;;  %v6465_v63 = vpop.f32.mrb[75].mxu1  ;;  %v6746_v61 = vld [vmem:[%s8125_s14 + $0x8] sm:$0xff]  }
0x30b0   : > { %v6014_v63 = vld [vmem:[%s8122_s11 + $0x6] sm:$0x3] }
0x30b2   : > { %v4889_v0 = vpop.f32.mrb[76].mxu1 }
0x30b3   : > { %5065 = vrot.lane.b32.xlu0 %v4889_v0, %s8172_s23  ;;  %v6475_v3 = vpop.f32.mrb[77].mxu1  ;;  %v5209_v0 = vrot.slane %v6014_v63, %v7331_v46  ;;  %v6748_v46 = vld [vmem:[%s8125_s14 + $0x18] sm:$0xff]  }
0x30b4   : > { %v5213_v3 = vrot.slane %v6014_v63, %v7337_v62 }
0x30b6   : > { %v5056_v4 = vpop.f32.mrb[78].mxu1 }
0x30b7   : > { %5069 = vrot.lane.b32.xlu1 %v5056_v4, %s8174_s29  ;;  %v6485_v6 = vpop.f32.mrb[79].mxu1  ;;  %s8177_s29 = sld [smem:[#allocation15_spill]] }
0x3121   : > { %v5062_v7 = vpop.permute.xlu1 %5061 }
0x3122   : > { %v5072_v9 = vsel %vm763_vm4, %v7894_v23, %v5062_v7 }
0x3125   : > { %v5066_v8 = vpop.permute.xlu0 %5065 }
0x3126   : > { %v5073_v10 = vsel %vm1440_vm7, %v5072_v9, %v5066_v8 }
0x3129   : > { %v5070_v11 = vpop.permute.xlu1 %5069 }
0x312a   : > { %v5074_v12 = vsel %vm1442_vm8, %v5073_v10, %v5070_v11 }
0x312b   : > { %v5084_v13 = vpack.c.bf16 %v5074_v12, %v5074_v12 }
0x312d   : > { %6495 = vmatmul.mubr.msk.bf16.vlgmr.msra.gmra.mrb[40].mxu0 %vm638_vm3, %v5084_v13 }
0x312e   : > { %6244 = vmatpush3.bf16.msra.mxu0 %v6730_v34 }
0x312f   : > { %6245 = vmatprep.subr.bf16.mxu0 %v6731_v35 }
0x3132   : > { %6246 = vmatpush3.bf16.msra.mxu0 %v6732_v36 }
0x3133   : > { %6247 = vmatprep.subr.bf16.mxu0 %v6733_v37 }
0x3136   : > { %6248 = vmatpush3.bf16.msra.mxu0 %v6734_v38 }
0x3137   : > { %6249 = vmatprep.subr.bf16.mxu0 %v6735_v39 }
0x313a   : > { %6250 = vmatpush3.bf16.msra.mxu0 %v6736_v51 }
0x313b   : > { %6251 = vmatprep.subr.bf16.mxu0 %v6737_v40 }
0x313e   : > { %6252 = vmatpush3.bf16.msra.mxu0 %v6738_v41 }
0x313f   : > { %6253 = vmatprep.subr.bf16.mxu0 %v6739_v42 }
0x3142   : > { %6254 = vmatpush3.bf16.msra.mxu0 %v6740_v43 }
0x3143   : > { %6255 = vmatprep.subr.bf16.mxu0 %v6741_v57 }
0x3146   : > { %6256 = vmatpush3.bf16.msra.mxu0 %v6742_v58 }
0x3147   : > { %6257 = vmatprep.subr.bf16.mxu0 %v6743_v59 }
0x314a   : > { %6258 = vmatpush3.bf16.msra.mxu0 %v6744_v60 }
0x3200   : > { %v5146_v50 = vpop.f32.mrb[40].mxu0 }
0x3201   : > { %v5152_v15 = vadd.f32 %v5146_v50, %v7813_v26  ;;  %v6496_v16 = vpop.f32.mrb[41].mxu0  ;;  %v6719_v26 = vld [vmem:[%s8121_s10 + $0xc4] ss:$8 sps:$4 sm:$0xff]  }
0x3202   : > { %v5149_v19 = vpop.f32.mrb[42].mxu0  ;;  %5259 = vmatprep.subr.bf16.mxu1 %v6719_v26 }
0x3203   : > { %v7948_v18 = vadd.f32 %v6001_v14, %v5152_v15  ;;  %v6497_v23 = vpop.f32.mrb[43].mxu0  ;;  %5260 = vmatpush1.bf16.msra.mxu1 %v6717_v28  ;;  %v6747_v14 = vld [vmem:[%s8125_s14 + $0x10] sm:$0xff]  }
0x3204   : > { %5261 = vmatprep.subr.bf16.mxu1 %v6722_v20  ;;  %v6073_v23 = vld [vmem:[%s8124_s13 + $0x3] ss:$0 sm:$0xff] }
0x3205   : > { %v5166_v17 = vsel %vm638_vm3, %v7948_v18, 0.0 }
0x3206   : > { %5167 = vadd.xlane.f32.xlu0 %v5166_v17 }
0x3207   : > { %5262 = vmatpush1.bf16.msra.mxu1 %v6720_v29 }
0x3208   : > { %5263 = vmatprep.subr.bf16.mxu1 %v6725_v22 }
0x320b   : > { %5264 = vmatpush1.bf16.msra.mxu1 %v6723_v30 }
0x320c   : > { %5265 = vmatprep.subr.bf16.mxu1 %v6728_v32 }
0x320f   : > { %5266 = vmatpush1.bf16.msra.mxu1 %v6726_v31 }
0x3210   : > { %6498 = vmatprep.subr.bf16.mxu1 %v6894_v2 }
0x3293   : > { %v5168_v25 = vpop.xlane.xlu0 %5167 }
0x3294   : > { %v5169_v21 = vmul.f32 0.015625, %v5168_v25 }
0x3296   : > { %v5170_v27 = vsub.f32 %v7948_v18, %v5169_v21 }
0x3298   : > { %v5171_v5 = vmul.f32 %v5170_v27, %v5170_v27 }
0x329a   : > { %v5172_v24 = vsel %vm638_vm3, %v5171_v5, 0.0 }
0x329b   : > { %5173 = vadd.xlane.f32.xlu1 %v5172_v24 }
0x3328   : > { %v5174_v44 = vpop.xlane.xlu1 %5173 }
0x3329   : > { %v5175_v47 = vmul.f32 0.015625, %v5174_v44 }
0x332b   : > { %v5176_v49 = vadd.f32 1e-05, %v5175_v47 }
0x332d   : > { %6827 = vrsqrt.f32 %v5176_v49 }
0x3337   : > { %v6828_v53 = vpop.eup %6827 }
0x3338   : > { %v5178_v54 = vmul.f32 %v6828_v53, %v5170_v27 }
0x333a   : > { %v5185_v52 = vmul.f32 %v6004_v45, %v5178_v54 }
0x333c   : > { %v5192_v56 = vadd.f32 %v6005_v55, %v5185_v52 }
0x333e   : > { %v5202_v48 = vpack.c.bf16 %v5192_v56, %v5192_v56 }
0x3340   : > { %6023 = vmatmul.mubr.msk.bf16.vlgmr.msra.gmra.mrb[80].mxu1 %vm638_vm3, %v5202_v48 }
0x3341   : > { %6506 = vmatprep.mubr.msk.bf16.mxu1 %vm6895_vm0, %v6894_v2  ;;  %6499 = vmatpush3.bf16.msra.mxu1 %v6745_v1 }
0x3342   : > { %6500 = vmatprep.subr.bf16.mxu1 %v6894_v2 }
0x3345   : > { %6501 = vmatpush3.bf16.msra.mxu1 %v6746_v61 }
0x3346   : > { %6502 = vmatprep.subr.bf16.mxu1 %v6894_v2 }
0x3349   : > { %6503 = vmatpush3.bf16.msra.mxu1 %v6747_v14 }
0x334a   : > { %6504 = vmatprep.subr.bf16.mxu1 %v6894_v2  ;;  %v6074_v2 = vld [vmem:[%s8177_s29] ss:$0 sm:$0xff] }
0x334d   : > { %6505 = vmatpush3.bf16.msra.mxu1 %v6748_v46 }
0x3413   : > { %v5293_v4 = vpop.f32.mrb[80].mxu1 }
0x3414   : > { %v5294_v6 = vadd.f32 %v5293_v4, %v5209_v0  ;;  %v5295_v7 = vpop.f32.mrb[81].mxu1 }
0x3415   : > { %v5296_v8 = vadd.f32 %v5295_v7, %v5213_v3  ;;  %v5297_v9 = vpop.f32.mrb[82].mxu1 }
0x3416   : > { %v5300_v10 = vmax.f32 %v5294_v6, 0.0  ;;  %v5298_v11 = vpop.f32.mrb[83].mxu1 }
0x3417   : > { %v5301_v12 = vmax.f32 %v5296_v8, 0.0 }
0x3418   : > { %v5335_v50 = vpack.c.bf16 %v5300_v10, %v5300_v10 }
0x3419   : > { %v5336_v13 = vpack.c.bf16 %v5301_v12, %v5301_v12 }
0x341b   : > { %5465 = vmatprep.mubr.bf16.mxu0 %v5336_v13 }
0x341c   : > { %5466 = vmatmul.mubr.bf16.vlgmr.msra.gmra.mrb[44].mxu0 %v5335_v50 }
0x34ef   : > { %v6259_v62 = vpop.f32.mrb[44].mxu0 }
0x34f0   : > { %v6260_v15 = vpop.f32.mrb[45].mxu0 }
0x34f1   : > { %v6261_v16 = vadd.f32 %v6260_v15, %v6259_v62  ;;  %v6262_v19 = vpop.f32.mrb[46].mxu0 }
0x34f2   : > { %v6263_v17 = vpop.f32.mrb[47].mxu0 }
0x34f3   : > { %v5473_v25 = vadd.f32 %v6261_v16, %v7948_v18 }
0x34f5   : > { %v5482_v21 = vadd.f32 %v6073_v23, %v5473_v25 }
0x34f7   : > { %v5491_v27 = vpack.c.bf16 %v5482_v21, %v5482_v21 }
0x34f9   : > { %6507 = vmatmul.mubr.msk.bf16.vlgmr.msra.gmra.mrb[84].mxu1 %vm638_vm3, %v5491_v27 }
0x35cc   : > { %v5560_v5 = vpop.f32.mrb[84].mxu1 }
0x35cd   : > { %v5561_v24 = vadd.f32 %v6074_v2, %v5560_v5  ;;  %v6508_v26 = vpop.f32.mrb[85].mxu1 }
0x35ce   : > { %v5563_v18 = vpop.f32.mrb[86].mxu1 }
0x35cf   : > { %5566 = vst [vmem:[%s512_s15] sm:$0xff] %v5561_v24  ;;  %v6509_v28 = vpop.f32.mrb[87].mxu1 }
0x35d0   : > { %6842 = shalt.err (!%p6839_p3)
}
0x35d1   : > { %s6843_s28 = scalar_lea.hbm %s8069_s20, 128  ;;  %s6847_s30 = scalar_lea.hbm %s8179_s27, 256 }
0x35d2   : > { %p6844_p4 = scmp.ne.s32.totalorder %s8069_s20, %s6843_s28  ;;  %p6848_p9 = scmp.lt.u32.totalorder %s8069_s20, %s8179_s27 }
0x35d3   : > { %p6849_p10 = scmp.lt.u32.totalorder %s6847_s30, %s6843_s28  ;;  %p6851_p12 = scmp.lt.u32.totalorder %s6843_s28, %s8069_s20 }
0x35d4   : > { %p6845_p7 = pnand %p6844_p4, %p7028_p5 }
0x35d5   : > { %p6850_p11 = por %p6849_p10, %p6848_p9 }
0x35d6   : > { %p6846_p8 = pneg %p6845_p7 }
0x35d7   : > { %p6852_p13 = por %p6851_p12, %p6850_p11 }
0x35d9   : > { %p6853_p0 = pnand %p6852_p13, %p6846_p8 }
0x35db   : > { %6856 = shalt.err (!%p6853_p0)
}
0x35dc   : > { %6510 = dma.vmem_to_hbm [thread:$0]  (%p7028_p5), %s8071_s0, 128, %s8069_s20, %s5568_s18  }
0x35dd PF: > { %s8180_s15 = sld [smem:[#allocation7_spill]]  ;;  %s8181_s21 = sld [smem:[#allocation5_spill]] }
0x35e3   : > { %p6516_p1 = scmp.ge.s32.totalorder %s8180_s15, 2  ;;  %s5593_s25 = sand.u32 1, %s8181_s21  }
0x35e4   : > { %s5594_s26 = scalar_lea.sflag [#allocation3], %s5593_s25 }
0x35e5   : > { %p6513_p2 = pnand %p6516_p1, %p7032_p6 }
0x35e7   : > { %6874 = dma.done.wait (!%p6513_p2), %s5594_s26, 128  }
0x35e8   : > { %6876 = vsyncadd (!%p6513_p2), %s5594_s26, 4294967168  ;;  %s8183_s24 = sld [smem:[#allocation8_spill]]  ;;  %s8184_s19 = sld [smem:[#allocation6_spill]] }
0x35e9   : > { %s8185_s23 = sld [smem:[#allocation9_spill]]  ;;  %s8186_s21 = smov %s6883_s22 }
0x35ee   : > { %p26_p3 = scmp.ge.s32.totalorder %s8183_s24, 4   ;;  %s8187_s22 = smov %s8184_s19 }
0x35f0   :  { %28 = sbr.rel (!%p26_p3) target bundleno = 9 (0x9), region = 152 }
0x35f7   :  { %5599 = vsyncpa [#allocation3], 1 }
0x35f8   :  { %5601 = vsyncpa [#allocation3 + $0x1], 1 }

</bundles_post_ra>
